<compile_context>
chip_gen: v7x
topology: tpu7x:2x2x1
jax: 0.10.0
libtpu: 0.0.40
codegen_flags: <defaults>
</compile_context>

<pallas_src>
import math

import jax
import jax.numpy as jnp
from jax.experimental import pallas as pl
from jax.experimental.pallas import tpu as pltpu

# ---- small, tutorial-consistent shapes ----
V = 128          # vocab size (must exceed CLS token id 101)
H = 32           # hidden size == embedding dim
S = 8            # encoder input sequence length (batch = 1)
MAX_LENGTH = 6   # greedy decode steps
CLS_TOKEN = 101
N_LAYERS = 1     # encoder & decoder GRU layers (decoder_hidden = enc_hidden[:1])


def _gru_gates(gi, gi_base, gh, gh_base, h):
    """PyTorch-semantics GRU gate math, gate order [r, z, n].

    gi / gh are wide fused rows; this direction's three H-wide gate blocks
    start at static offsets gi_base / gh_base (multiples of H=32).
    """
    i_r = gi[:, gi_base + 0 * H: gi_base + 1 * H]
    i_z = gi[:, gi_base + 1 * H: gi_base + 2 * H]
    i_n = gi[:, gi_base + 2 * H: gi_base + 3 * H]
    h_r = gh[:, gh_base + 0 * H: gh_base + 1 * H]
    h_z = gh[:, gh_base + 1 * H: gh_base + 2 * H]
    h_n = gh[:, gh_base + 2 * H: gh_base + 3 * H]
    r = jax.nn.sigmoid(i_r + h_r)
    z = jax.nn.sigmoid(i_z + h_z)
    n = jnp.tanh(i_n + r * h_n)
    return (1.0 - z) * n + z * h


def greedy_search_kernel(
    ids_ref,                       # (S,)  int32 encoder token ids       [SMEM]
    enc_gi_tab_ref,                # (V, 6H): emb @ [w_ih_f | w_ih_b] + b_ih
    e_w_hh_ref, e_b_hh_ref,        # (2H, 6H), (1, 6H): block-diag fused hidden proj
    d_w_ref, d_b_ref,              # (V+H, 6H), (1, 6H): decoder fused [emb@w_ih ; w_hh]
    w_cat_ref, b_cat_ref,          # concat Linear (2H -> H)
    w_out_ref, b_out_ref,          # out Linear    (H -> V)
    tokens_ref, scores_ref,        # outputs (1, MAX_LENGTH)
):
    H3 = 3 * H

    # ---- EncoderRNN: 1-layer bidirectional GRU ----
    # In-kernel gather of the PRE-PROJECTED embedding rows: each row is already
    # gi = [gi_fwd | gi_bwd] for that token (no prologue matmul, no concat).
    gi_rows = [enc_gi_tab_ref[pl.ds(ids_ref[t], 1), :] for t in range(S)]   # S x (1, 6H)

    e_w_hh = e_w_hh_ref[...]
    e_b_hh = e_b_hh_ref[...]

    h_f = jnp.zeros((1, H), jnp.float32)
    h_b = jnp.zeros((1, H), jnp.float32)
    fwd_outs = [None] * S
    bwd_outs = [None] * S
    for k in range(S):  # static unroll; fwd & bwd recurrences in lockstep
        # One fused (1, 2H) @ (2H, 6H) matmul covers h_f@w_hh_f and h_b@w_hh_b.
        gh_all = jnp.dot(jnp.concatenate([h_f, h_b], axis=1), e_w_hh,
                         preferred_element_type=jnp.float32) + e_b_hh        # (1, 6H)
        h_f = _gru_gates(gi_rows[k], 0, gh_all, 0, h_f)
        h_b = _gru_gates(gi_rows[S - 1 - k], H3, gh_all, H3, h_b)
        fwd_outs[k] = h_f
        bwd_outs[S - 1 - k] = h_b

    # outputs[:, :, :H] + outputs[:, :, H:]  ->  sum of the two directions
    enc_out = jnp.concatenate(fwd_outs, axis=0) + jnp.concatenate(bwd_outs, axis=0)
    # decoder_hidden = encoder_hidden[:decoder.n_layers] -> fwd-dir final state
    dec_h = h_f

    d_w = d_w_ref[...]
    d_b = d_b_ref[...]
    w_cat = w_cat_ref[...]
    b_cat = b_cat_ref[...]
    w_out = w_out_ref[...]
    b_out = b_out_ref[...]

    # ---- Greedy decode loop (LuongAttnDecoderRNN) ----
    tok = jnp.full((1, 1), CLS_TOKEN, jnp.int32)
    lane_v = jax.lax.broadcasted_iota(jnp.int32, (1, V), 1)
    lane_m = jax.lax.broadcasted_iota(jnp.int32, (1, MAX_LENGTH), 1)
    tok_row = jnp.zeros((1, MAX_LENGTH), jnp.int32)
    score_row = jnp.zeros((1, MAX_LENGTH), jnp.float32)
    for step in range(MAX_LENGTH):  # static unroll (MAX_LENGTH small)
        one_hot = (lane_v == tok).astype(jnp.float32)                        # (1, V)

        # Embedding + both GRU projections fused into ONE matmul per step:
        # [one_hot | dec_h] @ blockdiag(emb@w_ih ; w_hh) -> [gi | gh].
        xh = jnp.concatenate([one_hot, dec_h], axis=1)                       # (1, V+H)
        g = jnp.dot(xh, d_w, preferred_element_type=jnp.float32) + d_b       # (1, 6H)
        dec_h = _gru_gates(g, 0, g, H3, dec_h)
        rnn_out = dec_h                                                      # (1, H)

        # "dot" attention: energies = rnn_out @ enc_out^T via an NT dot_general
        # (no materialized transpose, no identity matmul).
        energies = jax.lax.dot_general(
            rnn_out, enc_out, (((1,), (1,)), ((), ())),
            preferred_element_type=jnp.float32)                              # (1, S)

        # Deferred softmax normalization: context = (p @ enc_out) / sum(p).
        e_max = jnp.max(energies, axis=1, keepdims=True)
        p = jnp.exp(energies - e_max)                                        # (1, S)
        ctx_un = jnp.dot(p, enc_out, preferred_element_type=jnp.float32)     # (1, H)
        inv_den = pl.reciprocal(jnp.sum(p, axis=1, keepdims=True), approx=True)
        context = ctx_un * inv_den

        concat_out = jnp.tanh(
            jnp.dot(jnp.concatenate([rnn_out, context], axis=1), w_cat,
                    preferred_element_type=jnp.float32) + b_cat)             # (1, H)
        logits = jnp.dot(concat_out, w_out,
                         preferred_element_type=jnp.float32) + b_out         # (1, V)

        # torch.max(softmax(logits)): argmax(probs) == argmax(logits) and
        # max(probs) == 1 / sum(exp(logits - max(logits)))  (no 128-lane divide)
        m = jnp.max(logits, axis=1, keepdims=True)
        tok = jnp.argmax(logits, axis=1).reshape(1, 1).astype(jnp.int32)
        denom = jnp.sum(jnp.exp(logits - m), axis=1, keepdims=True)
        score = pl.reciprocal(denom, approx=True)                            # (1, 1)

        # Lane-major accumulation: merge this step's scalar into lane `step`.
        tok_row = jnp.where(lane_m == step, tok, tok_row)
        score_row = jnp.where(lane_m == step, score, score_row)

    # Single lane-dense store per output (no sublane-concat epilogue).
    tokens_ref[...] = tok_row
    scores_ref[...] = score_row


def init_params(key):
    ks = jax.random.split(key, 24)
    g = 1.0 / math.sqrt(H)

    def u(k, shape):
        return jax.random.uniform(k, shape, jnp.float32, -g, g)

    p = {"embedding": jax.random.normal(ks[0], (V, H), jnp.float32) * 0.1}
    i = 1
    for name in ("enc_f", "enc_b", "dec"):      # three GRU cells
        p[f"{name}_w_ih"] = u(ks[i + 0], (H, 3 * H))
        p[f"{name}_w_hh"] = u(ks[i + 1], (H, 3 * H))
        p[f"{name}_b_ih"] = u(ks[i + 2], (1, 3 * H))
        p[f"{name}_b_hh"] = u(ks[i + 3], (1, 3 * H))
        i += 4
    p["w_cat"] = u(ks[i + 0], (2 * H, H))
    p["b_cat"] = u(ks[i + 1], (1, H))
    p["w_out"] = u(ks[i + 2], (H, V))
    p["b_out"] = u(ks[i + 3], (1, V))
    return p


def pack_params(p):
    """Pack PyTorch-layout weights into the fused operands the kernel expects.

    Done once, outside the per-call jit. The embedding table is folded into
    both GRU input projections here, so it never has to live in VMEM.
    """
    H2, H3, H6 = 2 * H, 3 * H, 6 * H
    hi = jax.lax.Precision.HIGHEST  # keep the fold numerically faithful to f32

    # Encoder: enc_gi_tab[v] = emb[v] @ [w_ih_f | w_ih_b] + [b_ih_f | b_ih_b]
    e_w_ih = jnp.concatenate([p["enc_f_w_ih"], p["enc_b_w_ih"]], axis=1)      # (H, 6H)
    e_b_ih = jnp.concatenate([p["enc_f_b_ih"], p["enc_b_b_ih"]], axis=1)      # (1, 6H)
    enc_gi_tab = jnp.dot(p["embedding"], e_w_ih, precision=hi) + e_b_ih       # (V, 6H)

    # Encoder block-diag fused hidden proj: [h_f | h_b] @ W -> [gh_f | gh_b]
    e_w_hh = jnp.zeros((H2, H6), jnp.float32)
    e_w_hh = e_w_hh.at[:H, :H3].set(p["enc_f_w_hh"])
    e_w_hh = e_w_hh.at[H:, H3:].set(p["enc_b_w_hh"])

    # Decoder: fold embedding into w_ih and fuse with w_hh:
    # [one_hot | h] @ blockdiag(emb @ w_ih  (V,3H) ; w_hh (H,3H)) -> [gi | gh]
    dec_emb_proj = jnp.dot(p["embedding"], p["dec_w_ih"], precision=hi)       # (V, 3H)
    d_w = jnp.zeros((V + H, H6), jnp.float32)
    d_w = d_w.at[:V, :H3].set(dec_emb_proj)
    d_w = d_w.at[V:, H3:].set(p["dec_w_hh"])

    return {
        "enc_gi_tab": enc_gi_tab,
        "e_w_hh": e_w_hh,
        "e_b_hh": jnp.concatenate([p["enc_f_b_hh"], p["enc_b_b_hh"]], axis=1),
        "d_w": d_w,
        "d_b": jnp.concatenate([p["dec_b_ih"], p["dec_b_hh"]], axis=1),
        "w_cat": p["w_cat"], "b_cat": p["b_cat"],
        "w_out": p["w_out"], "b_out": p["b_out"],
    }


@jax.jit
def greedy_search(input_seq, packed):
    # Clamp ids: in-kernel VMEM gathers have no bounds check.
    ids = jnp.clip(input_seq.astype(jnp.int32), 0, V - 1)
    args = [
        packed["enc_gi_tab"],
        packed["e_w_hh"], packed["e_b_hh"],
        packed["d_w"], packed["d_b"],
        packed["w_cat"], packed["b_cat"],
        packed["w_out"], packed["b_out"],
    ]
    tokens, scores = pl.pallas_call(
        greedy_search_kernel,
        out_shape=(
            jax.ShapeDtypeStruct((1, MAX_LENGTH), jnp.int32),
            jax.ShapeDtypeStruct((1, MAX_LENGTH), jnp.float32),
        ),
        # token ids go straight to SMEM; everything else is VMEM-resident.
        in_specs=[pl.BlockSpec(memory_space=pltpu.MemorySpace.SMEM)]
                 + [pl.BlockSpec(memory_space=pltpu.MemorySpace.VMEM)] * len(args),
        out_specs=(
            pl.BlockSpec(memory_space=pltpu.MemorySpace.VMEM),
            pl.BlockSpec(memory_space=pltpu.MemorySpace.VMEM),
        ),
    )(ids, *args)
    # all_tokens: (max_length,) ids; all_scores: (max_length,) max softmax probs
    return tokens[0], scores[0]


if __name__ == "__main__":
    key = jax.random.PRNGKey(0)
    pkey, dkey = jax.random.split(key)
    params = init_params(pkey)
    packed = pack_params(params)
    input_seq = jax.random.randint(dkey, (S,), 0, V, dtype=jnp.int32)

    all_tokens, all_scores = greedy_search(input_seq, packed)
    jax.block_until_ready((all_tokens, all_scores))

    assert all_tokens.shape == (MAX_LENGTH,) and all_tokens.dtype == jnp.int32
    assert all_scores.shape == (MAX_LENGTH,) and all_scores.dtype == jnp.float32
    assert bool(jnp.all(jnp.isfinite(all_scores)))
    assert bool(jnp.all((all_tokens >= 0) & (all_tokens < V)))
    print("KERNEL_OK")
</pallas_src>

<mosaic_0001>
module attributes {stable_mosaic.version = 11 : i64} {
  func.func @greedy_search_kernel(%arg0: memref<8xi32, #tpu.memory_space<smem>>, %arg1: memref<128x192xf32, #tpu.memory_space<vmem>>, %arg2: memref<64x192xf32, #tpu.memory_space<vmem>>, %arg3: memref<1x192xf32, #tpu.memory_space<vmem>>, %arg4: memref<160x192xf32, #tpu.memory_space<vmem>>, %arg5: memref<1x192xf32, #tpu.memory_space<vmem>>, %arg6: memref<64x32xf32, #tpu.memory_space<vmem>>, %arg7: memref<1x32xf32, #tpu.memory_space<vmem>>, %arg8: memref<32x128xf32, #tpu.memory_space<vmem>>, %arg9: memref<1x128xf32, #tpu.memory_space<vmem>>, %arg10: memref<1x6xi32, #tpu.memory_space<vmem>>, %arg11: memref<1x6xf32, #tpu.memory_space<vmem>>) attributes {dimension_semantics = [], scalar_prefetch = 0 : i64, scratch_operands = 0 : i64, tpu.core_type = #tpu.core_type<tc>} {
    %c0 = arith.constant 0 : index
    %0 = memref.load %arg0[%c0] : memref<8xi32, #tpu.memory_space<smem>>
    %1 = arith.index_cast %0 : i32 to index
    %c0_0 = arith.constant 0 : index
    %2 = vector.load %arg1[%1, %c0_0] : memref<128x192xf32, #tpu.memory_space<vmem>>, vector<1x192xf32>
    %c1 = arith.constant 1 : index
    %3 = memref.load %arg0[%c1] : memref<8xi32, #tpu.memory_space<smem>>
    %4 = arith.index_cast %3 : i32 to index
    %c0_1 = arith.constant 0 : index
    %5 = vector.load %arg1[%4, %c0_1] : memref<128x192xf32, #tpu.memory_space<vmem>>, vector<1x192xf32>
    %c2 = arith.constant 2 : index
    %6 = memref.load %arg0[%c2] : memref<8xi32, #tpu.memory_space<smem>>
    %7 = arith.index_cast %6 : i32 to index
    %c0_2 = arith.constant 0 : index
    %8 = vector.load %arg1[%7, %c0_2] : memref<128x192xf32, #tpu.memory_space<vmem>>, vector<1x192xf32>
    %c3 = arith.constant 3 : index
    %9 = memref.load %arg0[%c3] : memref<8xi32, #tpu.memory_space<smem>>
    %10 = arith.index_cast %9 : i32 to index
    %c0_3 = arith.constant 0 : index
    %11 = vector.load %arg1[%10, %c0_3] : memref<128x192xf32, #tpu.memory_space<vmem>>, vector<1x192xf32>
    %c4 = arith.constant 4 : index
    %12 = memref.load %arg0[%c4] : memref<8xi32, #tpu.memory_space<smem>>
    %13 = arith.index_cast %12 : i32 to index
    %c0_4 = arith.constant 0 : index
    %14 = vector.load %arg1[%13, %c0_4] : memref<128x192xf32, #tpu.memory_space<vmem>>, vector<1x192xf32>
    %c5 = arith.constant 5 : index
    %15 = memref.load %arg0[%c5] : memref<8xi32, #tpu.memory_space<smem>>
    %16 = arith.index_cast %15 : i32 to index
    %c0_5 = arith.constant 0 : index
    %17 = vector.load %arg1[%16, %c0_5] : memref<128x192xf32, #tpu.memory_space<vmem>>, vector<1x192xf32>
    %c6 = arith.constant 6 : index
    %18 = memref.load %arg0[%c6] : memref<8xi32, #tpu.memory_space<smem>>
    %19 = arith.index_cast %18 : i32 to index
    %c0_6 = arith.constant 0 : index
    %20 = vector.load %arg1[%19, %c0_6] : memref<128x192xf32, #tpu.memory_space<vmem>>, vector<1x192xf32>
    %c7 = arith.constant 7 : index
    %21 = memref.load %arg0[%c7] : memref<8xi32, #tpu.memory_space<smem>>
    %22 = arith.index_cast %21 : i32 to index
    %c0_7 = arith.constant 0 : index
    %23 = vector.load %arg1[%22, %c0_7] : memref<128x192xf32, #tpu.memory_space<vmem>>, vector<1x192xf32>
    %c0_8 = arith.constant 0 : index
    %c0_9 = arith.constant 0 : index
    %24 = vector.load %arg2[%c0_8, %c0_9] : memref<64x192xf32, #tpu.memory_space<vmem>>, vector<64x192xf32>
    %c0_10 = arith.constant 0 : index
    %c0_11 = arith.constant 0 : index
    %25 = vector.load %arg3[%c0_10, %c0_11] : memref<1x192xf32, #tpu.memory_space<vmem>>, vector<1x192xf32>
    %cst = arith.constant 0.000000e+00 : f32
    %26 = vector.broadcast %cst : f32 to vector<1x32xf32>
    %cst_12 = arith.constant 0.000000e+00 : f32
    %27 = vector.broadcast %cst_12 : f32 to vector<1x32xf32>
    %28 = tpu.concatenate %26, %27 in 1 : vector<1x32xf32>, vector<1x32xf32> -> vector<1x64xf32>
    %cst_13 = arith.constant dense<0.000000e+00> : vector<1x192xf32>
    %29 = tpu.matmul %28, %24, %cst_13 {dimension_numbers = #tpu.dot_dimension_numbers<[1], [0], [0], [1], [0, 0, 1, 1], [], []>} : vector<1x64xf32>, vector<64x192xf32>, vector<1x192xf32> -> vector<1x192xf32>
    %30 = arith.addf %29, %25 : vector<1x192xf32>
    %31 = vector.extract_strided_slice %2 {offsets = [0, 0], sizes = [1, 32], strides = [1, 1]} : vector<1x192xf32> to vector<1x32xf32>
    %32 = vector.extract_strided_slice %2 {offsets = [0, 32], sizes = [1, 32], strides = [1, 1]} : vector<1x192xf32> to vector<1x32xf32>
    %33 = vector.extract_strided_slice %2 {offsets = [0, 64], sizes = [1, 32], strides = [1, 1]} : vector<1x192xf32> to vector<1x32xf32>
    %34 = vector.extract_strided_slice %30 {offsets = [0, 0], sizes = [1, 32], strides = [1, 1]} : vector<1x192xf32> to vector<1x32xf32>
    %35 = vector.extract_strided_slice %30 {offsets = [0, 32], sizes = [1, 32], strides = [1, 1]} : vector<1x192xf32> to vector<1x32xf32>
    %36 = vector.extract_strided_slice %30 {offsets = [0, 64], sizes = [1, 32], strides = [1, 1]} : vector<1x192xf32> to vector<1x32xf32>
    %37 = arith.addf %31, %34 : vector<1x32xf32>
    %38 = arith.negf %37 : vector<1x32xf32>
    %39 = math.exp %38 : vector<1x32xf32>
    %cst_14 = arith.constant 1.000000e+00 : f32
    %40 = vector.broadcast %cst_14 : f32 to vector<1x32xf32>
    %41 = arith.addf %40, %39 : vector<1x32xf32>
    %42 = arith.divf %40, %41 : vector<1x32xf32>
    %43 = arith.addf %32, %35 : vector<1x32xf32>
    %44 = arith.negf %43 : vector<1x32xf32>
    %45 = math.exp %44 : vector<1x32xf32>
    %cst_15 = arith.constant 1.000000e+00 : f32
    %46 = vector.broadcast %cst_15 : f32 to vector<1x32xf32>
    %47 = arith.addf %46, %45 : vector<1x32xf32>
    %48 = arith.divf %46, %47 : vector<1x32xf32>
    %49 = arith.mulf %42, %36 : vector<1x32xf32>
    %50 = arith.addf %33, %49 : vector<1x32xf32>
    %51 = math.tanh %50 : vector<1x32xf32>
    %cst_16 = arith.constant 1.000000e+00 : f32
    %52 = vector.broadcast %cst_16 : f32 to vector<1x32xf32>
    %53 = arith.subf %52, %48 : vector<1x32xf32>
    %54 = arith.mulf %53, %51 : vector<1x32xf32>
    %55 = arith.mulf %48, %26 : vector<1x32xf32>
    %56 = arith.addf %54, %55 : vector<1x32xf32>
    %57 = vector.extract_strided_slice %23 {offsets = [0, 96], sizes = [1, 32], strides = [1, 1]} : vector<1x192xf32> to vector<1x32xf32>
    %58 = vector.extract_strided_slice %23 {offsets = [0, 128], sizes = [1, 32], strides = [1, 1]} : vector<1x192xf32> to vector<1x32xf32>
    %59 = vector.extract_strided_slice %23 {offsets = [0, 160], sizes = [1, 32], strides = [1, 1]} : vector<1x192xf32> to vector<1x32xf32>
    %60 = vector.extract_strided_slice %30 {offsets = [0, 96], sizes = [1, 32], strides = [1, 1]} : vector<1x192xf32> to vector<1x32xf32>
    %61 = vector.extract_strided_slice %30 {offsets = [0, 128], sizes = [1, 32], strides = [1, 1]} : vector<1x192xf32> to vector<1x32xf32>
    %62 = vector.extract_strided_slice %30 {offsets = [0, 160], sizes = [1, 32], strides = [1, 1]} : vector<1x192xf32> to vector<1x32xf32>
    %63 = arith.addf %57, %60 : vector<1x32xf32>
    %64 = arith.negf %63 : vector<1x32xf32>
    %65 = math.exp %64 : vector<1x32xf32>
    %cst_17 = arith.constant 1.000000e+00 : f32
    %66 = vector.broadcast %cst_17 : f32 to vector<1x32xf32>
    %67 = arith.addf %66, %65 : vector<1x32xf32>
    %68 = arith.divf %66, %67 : vector<1x32xf32>
    %69 = arith.addf %58, %61 : vector<1x32xf32>
    %70 = arith.negf %69 : vector<1x32xf32>
    %71 = math.exp %70 : vector<1x32xf32>
    %cst_18 = arith.constant 1.000000e+00 : f32
    %72 = vector.broadcast %cst_18 : f32 to vector<1x32xf32>
    %73 = arith.addf %72, %71 : vector<1x32xf32>
    %74 = arith.divf %72, %73 : vector<1x32xf32>
    %75 = arith.mulf %68, %62 : vector<1x32xf32>
    %76 = arith.addf %59, %75 : vector<1x32xf32>
    %77 = math.tanh %76 : vector<1x32xf32>
    %cst_19 = arith.constant 1.000000e+00 : f32
    %78 = vector.broadcast %cst_19 : f32 to vector<1x32xf32>
    %79 = arith.subf %78, %74 : vector<1x32xf32>
    %80 = arith.mulf %79, %77 : vector<1x32xf32>
    %81 = arith.mulf %74, %27 : vector<1x32xf32>
    %82 = arith.addf %80, %81 : vector<1x32xf32>
    %83 = tpu.concatenate %56, %82 in 1 : vector<1x32xf32>, vector<1x32xf32> -> vector<1x64xf32>
    %cst_20 = arith.constant dense<0.000000e+00> : vector<1x192xf32>
    %84 = tpu.matmul %83, %24, %cst_20 {dimension_numbers = #tpu.dot_dimension_numbers<[1], [0], [0], [1], [0, 0, 1, 1], [], []>} : vector<1x64xf32>, vector<64x192xf32>, vector<1x192xf32> -> vector<1x192xf32>
    %85 = arith.addf %84, %25 : vector<1x192xf32>
    %86 = vector.extract_strided_slice %5 {offsets = [0, 0], sizes = [1, 32], strides = [1, 1]} : vector<1x192xf32> to vector<1x32xf32>
    %87 = vector.extract_strided_slice %5 {offsets = [0, 32], sizes = [1, 32], strides = [1, 1]} : vector<1x192xf32> to vector<1x32xf32>
    %88 = vector.extract_strided_slice %5 {offsets = [0, 64], sizes = [1, 32], strides = [1, 1]} : vector<1x192xf32> to vector<1x32xf32>
    %89 = vector.extract_strided_slice %85 {offsets = [0, 0], sizes = [1, 32], strides = [1, 1]} : vector<1x192xf32> to vector<1x32xf32>
    %90 = vector.extract_strided_slice %85 {offsets = [0, 32], sizes = [1, 32], strides = [1, 1]} : vector<1x192xf32> to vector<1x32xf32>
    %91 = vector.extract_strided_slice %85 {offsets = [0, 64], sizes = [1, 32], strides = [1, 1]} : vector<1x192xf32> to vector<1x32xf32>
    %92 = arith.addf %86, %89 : vector<1x32xf32>
    %93 = arith.negf %92 : vector<1x32xf32>
    %94 = math.exp %93 : vector<1x32xf32>
    %cst_21 = arith.constant 1.000000e+00 : f32
    %95 = vector.broadcast %cst_21 : f32 to vector<1x32xf32>
    %96 = arith.addf %95, %94 : vector<1x32xf32>
    %97 = arith.divf %95, %96 : vector<1x32xf32>
    %98 = arith.addf %87, %90 : vector<1x32xf32>
    %99 = arith.negf %98 : vector<1x32xf32>
    %100 = math.exp %99 : vector<1x32xf32>
    %cst_22 = arith.constant 1.000000e+00 : f32
    %101 = vector.broadcast %cst_22 : f32 to vector<1x32xf32>
    %102 = arith.addf %101, %100 : vector<1x32xf32>
    %103 = arith.divf %101, %102 : vector<1x32xf32>
    %104 = arith.mulf %97, %91 : vector<1x32xf32>
    %105 = arith.addf %88, %104 : vector<1x32xf32>
    %106 = math.tanh %105 : vector<1x32xf32>
    %cst_23 = arith.constant 1.000000e+00 : f32
    %107 = vector.broadcast %cst_23 : f32 to vector<1x32xf32>
    %108 = arith.subf %107, %103 : vector<1x32xf32>
    %109 = arith.mulf %108, %106 : vector<1x32xf32>
    %110 = arith.mulf %103, %56 : vector<1x32xf32>
    %111 = arith.addf %109, %110 : vector<1x32xf32>
    %112 = vector.extract_strided_slice %20 {offsets = [0, 96], sizes = [1, 32], strides = [1, 1]} : vector<1x192xf32> to vector<1x32xf32>
    %113 = vector.extract_strided_slice %20 {offsets = [0, 128], sizes = [1, 32], strides = [1, 1]} : vector<1x192xf32> to vector<1x32xf32>
    %114 = vector.extract_strided_slice %20 {offsets = [0, 160], sizes = [1, 32], strides = [1, 1]} : vector<1x192xf32> to vector<1x32xf32>
    %115 = vector.extract_strided_slice %85 {offsets = [0, 96], sizes = [1, 32], strides = [1, 1]} : vector<1x192xf32> to vector<1x32xf32>
    %116 = vector.extract_strided_slice %85 {offsets = [0, 128], sizes = [1, 32], strides = [1, 1]} : vector<1x192xf32> to vector<1x32xf32>
    %117 = vector.extract_strided_slice %85 {offsets = [0, 160], sizes = [1, 32], strides = [1, 1]} : vector<1x192xf32> to vector<1x32xf32>
    %118 = arith.addf %112, %115 : vector<1x32xf32>
    %119 = arith.negf %118 : vector<1x32xf32>
    %120 = math.exp %119 : vector<1x32xf32>
    %cst_24 = arith.constant 1.000000e+00 : f32
    %121 = vector.broadcast %cst_24 : f32 to vector<1x32xf32>
    %122 = arith.addf %121, %120 : vector<1x32xf32>
    %123 = arith.divf %121, %122 : vector<1x32xf32>
    %124 = arith.addf %113, %116 : vector<1x32xf32>
    %125 = arith.negf %124 : vector<1x32xf32>
    %126 = math.exp %125 : vector<1x32xf32>
    %cst_25 = arith.constant 1.000000e+00 : f32
    %127 = vector.broadcast %cst_25 : f32 to vector<1x32xf32>
    %128 = arith.addf %127, %126 : vector<1x32xf32>
    %129 = arith.divf %127, %128 : vector<1x32xf32>
    %130 = arith.mulf %123, %117 : vector<1x32xf32>
    %131 = arith.addf %114, %130 : vector<1x32xf32>
    %132 = math.tanh %131 : vector<1x32xf32>
    %cst_26 = arith.constant 1.000000e+00 : f32
    %133 = vector.broadcast %cst_26 : f32 to vector<1x32xf32>
    %134 = arith.subf %133, %129 : vector<1x32xf32>
    %135 = arith.mulf %134, %132 : vector<1x32xf32>
    %136 = arith.mulf %129, %82 : vector<1x32xf32>
    %137 = arith.addf %135, %136 : vector<1x32xf32>
    %138 = tpu.concatenate %111, %137 in 1 : vector<1x32xf32>, vector<1x32xf32> -> vector<1x64xf32>
    %cst_27 = arith.constant dense<0.000000e+00> : vector<1x192xf32>
    %139 = tpu.matmul %138, %24, %cst_27 {dimension_numbers = #tpu.dot_dimension_numbers<[1], [0], [0], [1], [0, 0, 1, 1], [], []>} : vector<1x64xf32>, vector<64x192xf32>, vector<1x192xf32> -> vector<1x192xf32>
    %140 = arith.addf %139, %25 : vector<1x192xf32>
    %141 = vector.extract_strided_slice %8 {offsets = [0, 0], sizes = [1, 32], strides = [1, 1]} : vector<1x192xf32> to vector<1x32xf32>
    %142 = vector.extract_strided_slice %8 {offsets = [0, 32], sizes = [1, 32], strides = [1, 1]} : vector<1x192xf32> to vector<1x32xf32>
    %143 = vector.extract_strided_slice %8 {offsets = [0, 64], sizes = [1, 32], strides = [1, 1]} : vector<1x192xf32> to vector<1x32xf32>
    %144 = vector.extract_strided_slice %140 {offsets = [0, 0], sizes = [1, 32], strides = [1, 1]} : vector<1x192xf32> to vector<1x32xf32>
    %145 = vector.extract_strided_slice %140 {offsets = [0, 32], sizes = [1, 32], strides = [1, 1]} : vector<1x192xf32> to vector<1x32xf32>
    %146 = vector.extract_strided_slice %140 {offsets = [0, 64], sizes = [1, 32], strides = [1, 1]} : vector<1x192xf32> to vector<1x32xf32>
    %147 = arith.addf %141, %144 : vector<1x32xf32>
    %148 = arith.negf %147 : vector<1x32xf32>
    %149 = math.exp %148 : vector<1x32xf32>
    %cst_28 = arith.constant 1.000000e+00 : f32
    %150 = vector.broadcast %cst_28 : f32 to vector<1x32xf32>
    %151 = arith.addf %150, %149 : vector<1x32xf32>
    %152 = arith.divf %150, %151 : vector<1x32xf32>
    %153 = arith.addf %142, %145 : vector<1x32xf32>
    %154 = arith.negf %153 : vector<1x32xf32>
    %155 = math.exp %154 : vector<1x32xf32>
    %cst_29 = arith.constant 1.000000e+00 : f32
    %156 = vector.broadcast %cst_29 : f32 to vector<1x32xf32>
    %157 = arith.addf %156, %155 : vector<1x32xf32>
    %158 = arith.divf %156, %157 : vector<1x32xf32>
    %159 = arith.mulf %152, %146 : vector<1x32xf32>
    %160 = arith.addf %143, %159 : vector<1x32xf32>
    %161 = math.tanh %160 : vector<1x32xf32>
    %cst_30 = arith.constant 1.000000e+00 : f32
    %162 = vector.broadcast %cst_30 : f32 to vector<1x32xf32>
    %163 = arith.subf %162, %158 : vector<1x32xf32>
    %164 = arith.mulf %163, %161 : vector<1x32xf32>
    %165 = arith.mulf %158, %111 : vector<1x32xf32>
    %166 = arith.addf %164, %165 : vector<1x32xf32>
    %167 = vector.extract_strided_slice %17 {offsets = [0, 96], sizes = [1, 32], strides = [1, 1]} : vector<1x192xf32> to vector<1x32xf32>
    %168 = vector.extract_strided_slice %17 {offsets = [0, 128], sizes = [1, 32], strides = [1, 1]} : vector<1x192xf32> to vector<1x32xf32>
    %169 = vector.extract_strided_slice %17 {offsets = [0, 160], sizes = [1, 32], strides = [1, 1]} : vector<1x192xf32> to vector<1x32xf32>
    %170 = vector.extract_strided_slice %140 {offsets = [0, 96], sizes = [1, 32], strides = [1, 1]} : vector<1x192xf32> to vector<1x32xf32>
    %171 = vector.extract_strided_slice %140 {offsets = [0, 128], sizes = [1, 32], strides = [1, 1]} : vector<1x192xf32> to vector<1x32xf32>
    %172 = vector.extract_strided_slice %140 {offsets = [0, 160], sizes = [1, 32], strides = [1, 1]} : vector<1x192xf32> to vector<1x32xf32>
    %173 = arith.addf %167, %170 : vector<1x32xf32>
    %174 = arith.negf %173 : vector<1x32xf32>
    %175 = math.exp %174 : vector<1x32xf32>
    %cst_31 = arith.constant 1.000000e+00 : f32
    %176 = vector.broadcast %cst_31 : f32 to vector<1x32xf32>
    %177 = arith.addf %176, %175 : vector<1x32xf32>
    %178 = arith.divf %176, %177 : vector<1x32xf32>
    %179 = arith.addf %168, %171 : vector<1x32xf32>
    %180 = arith.negf %179 : vector<1x32xf32>
    %181 = math.exp %180 : vector<1x32xf32>
    %cst_32 = arith.constant 1.000000e+00 : f32
    %182 = vector.broadcast %cst_32 : f32 to vector<1x32xf32>
    %183 = arith.addf %182, %181 : vector<1x32xf32>
    %184 = arith.divf %182, %183 : vector<1x32xf32>
    %185 = arith.mulf %178, %172 : vector<1x32xf32>
    %186 = arith.addf %169, %185 : vector<1x32xf32>
    %187 = math.tanh %186 : vector<1x32xf32>
    %cst_33 = arith.constant 1.000000e+00 : f32
    %188 = vector.broadcast %cst_33 : f32 to vector<1x32xf32>
    %189 = arith.subf %188, %184 : vector<1x32xf32>
    %190 = arith.mulf %189, %187 : vector<1x32xf32>
    %191 = arith.mulf %184, %137 : vector<1x32xf32>
    %192 = arith.addf %190, %191 : vector<1x32xf32>
    %193 = tpu.concatenate %166, %192 in 1 : vector<1x32xf32>, vector<1x32xf32> -> vector<1x64xf32>
    %cst_34 = arith.constant dense<0.000000e+00> : vector<1x192xf32>
    %194 = tpu.matmul %193, %24, %cst_34 {dimension_numbers = #tpu.dot_dimension_numbers<[1], [0], [0], [1], [0, 0, 1, 1], [], []>} : vector<1x64xf32>, vector<64x192xf32>, vector<1x192xf32> -> vector<1x192xf32>
    %195 = arith.addf %194, %25 : vector<1x192xf32>
    %196 = vector.extract_strided_slice %11 {offsets = [0, 0], sizes = [1, 32], strides = [1, 1]} : vector<1x192xf32> to vector<1x32xf32>
    %197 = vector.extract_strided_slice %11 {offsets = [0, 32], sizes = [1, 32], strides = [1, 1]} : vector<1x192xf32> to vector<1x32xf32>
    %198 = vector.extract_strided_slice %11 {offsets = [0, 64], sizes = [1, 32], strides = [1, 1]} : vector<1x192xf32> to vector<1x32xf32>
    %199 = vector.extract_strided_slice %195 {offsets = [0, 0], sizes = [1, 32], strides = [1, 1]} : vector<1x192xf32> to vector<1x32xf32>
    %200 = vector.extract_strided_slice %195 {offsets = [0, 32], sizes = [1, 32], strides = [1, 1]} : vector<1x192xf32> to vector<1x32xf32>
    %201 = vector.extract_strided_slice %195 {offsets = [0, 64], sizes = [1, 32], strides = [1, 1]} : vector<1x192xf32> to vector<1x32xf32>
    %202 = arith.addf %196, %199 : vector<1x32xf32>
    %203 = arith.negf %202 : vector<1x32xf32>
    %204 = math.exp %203 : vector<1x32xf32>
    %cst_35 = arith.constant 1.000000e+00 : f32
    %205 = vector.broadcast %cst_35 : f32 to vector<1x32xf32>
    %206 = arith.addf %205, %204 : vector<1x32xf32>
    %207 = arith.divf %205, %206 : vector<1x32xf32>
    %208 = arith.addf %197, %200 : vector<1x32xf32>
    %209 = arith.negf %208 : vector<1x32xf32>
    %210 = math.exp %209 : vector<1x32xf32>
    %cst_36 = arith.constant 1.000000e+00 : f32
    %211 = vector.broadcast %cst_36 : f32 to vector<1x32xf32>
    %212 = arith.addf %211, %210 : vector<1x32xf32>
    %213 = arith.divf %211, %212 : vector<1x32xf32>
    %214 = arith.mulf %207, %201 : vector<1x32xf32>
    %215 = arith.addf %198, %214 : vector<1x32xf32>
    %216 = math.tanh %215 : vector<1x32xf32>
    %cst_37 = arith.constant 1.000000e+00 : f32
    %217 = vector.broadcast %cst_37 : f32 to vector<1x32xf32>
    %218 = arith.subf %217, %213 : vector<1x32xf32>
    %219 = arith.mulf %218, %216 : vector<1x32xf32>
    %220 = arith.mulf %213, %166 : vector<1x32xf32>
    %221 = arith.addf %219, %220 : vector<1x32xf32>
    %222 = vector.extract_strided_slice %14 {offsets = [0, 96], sizes = [1, 32], strides = [1, 1]} : vector<1x192xf32> to vector<1x32xf32>
    %223 = vector.extract_strided_slice %14 {offsets = [0, 128], sizes = [1, 32], strides = [1, 1]} : vector<1x192xf32> to vector<1x32xf32>
    %224 = vector.extract_strided_slice %14 {offsets = [0, 160], sizes = [1, 32], strides = [1, 1]} : vector<1x192xf32> to vector<1x32xf32>
    %225 = vector.extract_strided_slice %195 {offsets = [0, 96], sizes = [1, 32], strides = [1, 1]} : vector<1x192xf32> to vector<1x32xf32>
    %226 = vector.extract_strided_slice %195 {offsets = [0, 128], sizes = [1, 32], strides = [1, 1]} : vector<1x192xf32> to vector<1x32xf32>
    %227 = vector.extract_strided_slice %195 {offsets = [0, 160], sizes = [1, 32], strides = [1, 1]} : vector<1x192xf32> to vector<1x32xf32>
    %228 = arith.addf %222, %225 : vector<1x32xf32>
    %229 = arith.negf %228 : vector<1x32xf32>
    %230 = math.exp %229 : vector<1x32xf32>
    %cst_38 = arith.constant 1.000000e+00 : f32
    %231 = vector.broadcast %cst_38 : f32 to vector<1x32xf32>
    %232 = arith.addf %231, %230 : vector<1x32xf32>
    %233 = arith.divf %231, %232 : vector<1x32xf32>
    %234 = arith.addf %223, %226 : vector<1x32xf32>
    %235 = arith.negf %234 : vector<1x32xf32>
    %236 = math.exp %235 : vector<1x32xf32>
    %cst_39 = arith.constant 1.000000e+00 : f32
    %237 = vector.broadcast %cst_39 : f32 to vector<1x32xf32>
    %238 = arith.addf %237, %236 : vector<1x32xf32>
    %239 = arith.divf %237, %238 : vector<1x32xf32>
    %240 = arith.mulf %233, %227 : vector<1x32xf32>
    %241 = arith.addf %224, %240 : vector<1x32xf32>
    %242 = math.tanh %241 : vector<1x32xf32>
    %cst_40 = arith.constant 1.000000e+00 : f32
    %243 = vector.broadcast %cst_40 : f32 to vector<1x32xf32>
    %244 = arith.subf %243, %239 : vector<1x32xf32>
    %245 = arith.mulf %244, %242 : vector<1x32xf32>
    %246 = arith.mulf %239, %192 : vector<1x32xf32>
    %247 = arith.addf %245, %246 : vector<1x32xf32>
    %248 = tpu.concatenate %221, %247 in 1 : vector<1x32xf32>, vector<1x32xf32> -> vector<1x64xf32>
    %cst_41 = arith.constant dense<0.000000e+00> : vector<1x192xf32>
    %249 = tpu.matmul %248, %24, %cst_41 {dimension_numbers = #tpu.dot_dimension_numbers<[1], [0], [0], [1], [0, 0, 1, 1], [], []>} : vector<1x64xf32>, vector<64x192xf32>, vector<1x192xf32> -> vector<1x192xf32>
    %250 = arith.addf %249, %25 : vector<1x192xf32>
    %251 = vector.extract_strided_slice %14 {offsets = [0, 0], sizes = [1, 32], strides = [1, 1]} : vector<1x192xf32> to vector<1x32xf32>
    %252 = vector.extract_strided_slice %14 {offsets = [0, 32], sizes = [1, 32], strides = [1, 1]} : vector<1x192xf32> to vector<1x32xf32>
    %253 = vector.extract_strided_slice %14 {offsets = [0, 64], sizes = [1, 32], strides = [1, 1]} : vector<1x192xf32> to vector<1x32xf32>
    %254 = vector.extract_strided_slice %250 {offsets = [0, 0], sizes = [1, 32], strides = [1, 1]} : vector<1x192xf32> to vector<1x32xf32>
    %255 = vector.extract_strided_slice %250 {offsets = [0, 32], sizes = [1, 32], strides = [1, 1]} : vector<1x192xf32> to vector<1x32xf32>
    %256 = vector.extract_strided_slice %250 {offsets = [0, 64], sizes = [1, 32], strides = [1, 1]} : vector<1x192xf32> to vector<1x32xf32>
    %257 = arith.addf %251, %254 : vector<1x32xf32>
    %258 = arith.negf %257 : vector<1x32xf32>
    %259 = math.exp %258 : vector<1x32xf32>
    %cst_42 = arith.constant 1.000000e+00 : f32
    %260 = vector.broadcast %cst_42 : f32 to vector<1x32xf32>
    %261 = arith.addf %260, %259 : vector<1x32xf32>
    %262 = arith.divf %260, %261 : vector<1x32xf32>
    %263 = arith.addf %252, %255 : vector<1x32xf32>
    %264 = arith.negf %263 : vector<1x32xf32>
    %265 = math.exp %264 : vector<1x32xf32>
    %cst_43 = arith.constant 1.000000e+00 : f32
    %266 = vector.broadcast %cst_43 : f32 to vector<1x32xf32>
    %267 = arith.addf %266, %265 : vector<1x32xf32>
    %268 = arith.divf %266, %267 : vector<1x32xf32>
    %269 = arith.mulf %262, %256 : vector<1x32xf32>
    %270 = arith.addf %253, %269 : vector<1x32xf32>
    %271 = math.tanh %270 : vector<1x32xf32>
    %cst_44 = arith.constant 1.000000e+00 : f32
    %272 = vector.broadcast %cst_44 : f32 to vector<1x32xf32>
    %273 = arith.subf %272, %268 : vector<1x32xf32>
    %274 = arith.mulf %273, %271 : vector<1x32xf32>
    %275 = arith.mulf %268, %221 : vector<1x32xf32>
    %276 = arith.addf %274, %275 : vector<1x32xf32>
    %277 = vector.extract_strided_slice %11 {offsets = [0, 96], sizes = [1, 32], strides = [1, 1]} : vector<1x192xf32> to vector<1x32xf32>
    %278 = vector.extract_strided_slice %11 {offsets = [0, 128], sizes = [1, 32], strides = [1, 1]} : vector<1x192xf32> to vector<1x32xf32>
    %279 = vector.extract_strided_slice %11 {offsets = [0, 160], sizes = [1, 32], strides = [1, 1]} : vector<1x192xf32> to vector<1x32xf32>
    %280 = vector.extract_strided_slice %250 {offsets = [0, 96], sizes = [1, 32], strides = [1, 1]} : vector<1x192xf32> to vector<1x32xf32>
    %281 = vector.extract_strided_slice %250 {offsets = [0, 128], sizes = [1, 32], strides = [1, 1]} : vector<1x192xf32> to vector<1x32xf32>
    %282 = vector.extract_strided_slice %250 {offsets = [0, 160], sizes = [1, 32], strides = [1, 1]} : vector<1x192xf32> to vector<1x32xf32>
    %283 = arith.addf %277, %280 : vector<1x32xf32>
    %284 = arith.negf %283 : vector<1x32xf32>
    %285 = math.exp %284 : vector<1x32xf32>
    %cst_45 = arith.constant 1.000000e+00 : f32
    %286 = vector.broadcast %cst_45 : f32 to vector<1x32xf32>
    %287 = arith.addf %286, %285 : vector<1x32xf32>
    %288 = arith.divf %286, %287 : vector<1x32xf32>
    %289 = arith.addf %278, %281 : vector<1x32xf32>
    %290 = arith.negf %289 : vector<1x32xf32>
    %291 = math.exp %290 : vector<1x32xf32>
    %cst_46 = arith.constant 1.000000e+00 : f32
    %292 = vector.broadcast %cst_46 : f32 to vector<1x32xf32>
    %293 = arith.addf %292, %291 : vector<1x32xf32>
    %294 = arith.divf %292, %293 : vector<1x32xf32>
    %295 = arith.mulf %288, %282 : vector<1x32xf32>
    %296 = arith.addf %279, %295 : vector<1x32xf32>
    %297 = math.tanh %296 : vector<1x32xf32>
    %cst_47 = arith.constant 1.000000e+00 : f32
    %298 = vector.broadcast %cst_47 : f32 to vector<1x32xf32>
    %299 = arith.subf %298, %294 : vector<1x32xf32>
    %300 = arith.mulf %299, %297 : vector<1x32xf32>
    %301 = arith.mulf %294, %247 : vector<1x32xf32>
    %302 = arith.addf %300, %301 : vector<1x32xf32>
    %303 = tpu.concatenate %276, %302 in 1 : vector<1x32xf32>, vector<1x32xf32> -> vector<1x64xf32>
    %cst_48 = arith.constant dense<0.000000e+00> : vector<1x192xf32>
    %304 = tpu.matmul %303, %24, %cst_48 {dimension_numbers = #tpu.dot_dimension_numbers<[1], [0], [0], [1], [0, 0, 1, 1], [], []>} : vector<1x64xf32>, vector<64x192xf32>, vector<1x192xf32> -> vector<1x192xf32>
    %305 = arith.addf %304, %25 : vector<1x192xf32>
    %306 = vector.extract_strided_slice %17 {offsets = [0, 0], sizes = [1, 32], strides = [1, 1]} : vector<1x192xf32> to vector<1x32xf32>
    %307 = vector.extract_strided_slice %17 {offsets = [0, 32], sizes = [1, 32], strides = [1, 1]} : vector<1x192xf32> to vector<1x32xf32>
    %308 = vector.extract_strided_slice %17 {offsets = [0, 64], sizes = [1, 32], strides = [1, 1]} : vector<1x192xf32> to vector<1x32xf32>
    %309 = vector.extract_strided_slice %305 {offsets = [0, 0], sizes = [1, 32], strides = [1, 1]} : vector<1x192xf32> to vector<1x32xf32>
    %310 = vector.extract_strided_slice %305 {offsets = [0, 32], sizes = [1, 32], strides = [1, 1]} : vector<1x192xf32> to vector<1x32xf32>
    %311 = vector.extract_strided_slice %305 {offsets = [0, 64], sizes = [1, 32], strides = [1, 1]} : vector<1x192xf32> to vector<1x32xf32>
    %312 = arith.addf %306, %309 : vector<1x32xf32>
    %313 = arith.negf %312 : vector<1x32xf32>
    %314 = math.exp %313 : vector<1x32xf32>
    %cst_49 = arith.constant 1.000000e+00 : f32
    %315 = vector.broadcast %cst_49 : f32 to vector<1x32xf32>
    %316 = arith.addf %315, %314 : vector<1x32xf32>
    %317 = arith.divf %315, %316 : vector<1x32xf32>
    %318 = arith.addf %307, %310 : vector<1x32xf32>
    %319 = arith.negf %318 : vector<1x32xf32>
    %320 = math.exp %319 : vector<1x32xf32>
    %cst_50 = arith.constant 1.000000e+00 : f32
    %321 = vector.broadcast %cst_50 : f32 to vector<1x32xf32>
    %322 = arith.addf %321, %320 : vector<1x32xf32>
    %323 = arith.divf %321, %322 : vector<1x32xf32>
    %324 = arith.mulf %317, %311 : vector<1x32xf32>
    %325 = arith.addf %308, %324 : vector<1x32xf32>
    %326 = math.tanh %325 : vector<1x32xf32>
    %cst_51 = arith.constant 1.000000e+00 : f32
    %327 = vector.broadcast %cst_51 : f32 to vector<1x32xf32>
    %328 = arith.subf %327, %323 : vector<1x32xf32>
    %329 = arith.mulf %328, %326 : vector<1x32xf32>
    %330 = arith.mulf %323, %276 : vector<1x32xf32>
    %331 = arith.addf %329, %330 : vector<1x32xf32>
    %332 = vector.extract_strided_slice %8 {offsets = [0, 96], sizes = [1, 32], strides = [1, 1]} : vector<1x192xf32> to vector<1x32xf32>
    %333 = vector.extract_strided_slice %8 {offsets = [0, 128], sizes = [1, 32], strides = [1, 1]} : vector<1x192xf32> to vector<1x32xf32>
    %334 = vector.extract_strided_slice %8 {offsets = [0, 160], sizes = [1, 32], strides = [1, 1]} : vector<1x192xf32> to vector<1x32xf32>
    %335 = vector.extract_strided_slice %305 {offsets = [0, 96], sizes = [1, 32], strides = [1, 1]} : vector<1x192xf32> to vector<1x32xf32>
    %336 = vector.extract_strided_slice %305 {offsets = [0, 128], sizes = [1, 32], strides = [1, 1]} : vector<1x192xf32> to vector<1x32xf32>
    %337 = vector.extract_strided_slice %305 {offsets = [0, 160], sizes = [1, 32], strides = [1, 1]} : vector<1x192xf32> to vector<1x32xf32>
    %338 = arith.addf %332, %335 : vector<1x32xf32>
    %339 = arith.negf %338 : vector<1x32xf32>
    %340 = math.exp %339 : vector<1x32xf32>
    %cst_52 = arith.constant 1.000000e+00 : f32
    %341 = vector.broadcast %cst_52 : f32 to vector<1x32xf32>
    %342 = arith.addf %341, %340 : vector<1x32xf32>
    %343 = arith.divf %341, %342 : vector<1x32xf32>
    %344 = arith.addf %333, %336 : vector<1x32xf32>
    %345 = arith.negf %344 : vector<1x32xf32>
    %346 = math.exp %345 : vector<1x32xf32>
    %cst_53 = arith.constant 1.000000e+00 : f32
    %347 = vector.broadcast %cst_53 : f32 to vector<1x32xf32>
    %348 = arith.addf %347, %346 : vector<1x32xf32>
    %349 = arith.divf %347, %348 : vector<1x32xf32>
    %350 = arith.mulf %343, %337 : vector<1x32xf32>
    %351 = arith.addf %334, %350 : vector<1x32xf32>
    %352 = math.tanh %351 : vector<1x32xf32>
    %cst_54 = arith.constant 1.000000e+00 : f32
    %353 = vector.broadcast %cst_54 : f32 to vector<1x32xf32>
    %354 = arith.subf %353, %349 : vector<1x32xf32>
    %355 = arith.mulf %354, %352 : vector<1x32xf32>
    %356 = arith.mulf %349, %302 : vector<1x32xf32>
    %357 = arith.addf %355, %356 : vector<1x32xf32>
    %358 = tpu.concatenate %331, %357 in 1 : vector<1x32xf32>, vector<1x32xf32> -> vector<1x64xf32>
    %cst_55 = arith.constant dense<0.000000e+00> : vector<1x192xf32>
    %359 = tpu.matmul %358, %24, %cst_55 {dimension_numbers = #tpu.dot_dimension_numbers<[1], [0], [0], [1], [0, 0, 1, 1], [], []>} : vector<1x64xf32>, vector<64x192xf32>, vector<1x192xf32> -> vector<1x192xf32>
    %360 = arith.addf %359, %25 : vector<1x192xf32>
    %361 = vector.extract_strided_slice %20 {offsets = [0, 0], sizes = [1, 32], strides = [1, 1]} : vector<1x192xf32> to vector<1x32xf32>
    %362 = vector.extract_strided_slice %20 {offsets = [0, 32], sizes = [1, 32], strides = [1, 1]} : vector<1x192xf32> to vector<1x32xf32>
    %363 = vector.extract_strided_slice %20 {offsets = [0, 64], sizes = [1, 32], strides = [1, 1]} : vector<1x192xf32> to vector<1x32xf32>
    %364 = vector.extract_strided_slice %360 {offsets = [0, 0], sizes = [1, 32], strides = [1, 1]} : vector<1x192xf32> to vector<1x32xf32>
    %365 = vector.extract_strided_slice %360 {offsets = [0, 32], sizes = [1, 32], strides = [1, 1]} : vector<1x192xf32> to vector<1x32xf32>
    %366 = vector.extract_strided_slice %360 {offsets = [0, 64], sizes = [1, 32], strides = [1, 1]} : vector<1x192xf32> to vector<1x32xf32>
    %367 = arith.addf %361, %364 : vector<1x32xf32>
    %368 = arith.negf %367 : vector<1x32xf32>
    %369 = math.exp %368 : vector<1x32xf32>
    %cst_56 = arith.constant 1.000000e+00 : f32
    %370 = vector.broadcast %cst_56 : f32 to vector<1x32xf32>
    %371 = arith.addf %370, %369 : vector<1x32xf32>
    %372 = arith.divf %370, %371 : vector<1x32xf32>
    %373 = arith.addf %362, %365 : vector<1x32xf32>
    %374 = arith.negf %373 : vector<1x32xf32>
    %375 = math.exp %374 : vector<1x32xf32>
    %cst_57 = arith.constant 1.000000e+00 : f32
    %376 = vector.broadcast %cst_57 : f32 to vector<1x32xf32>
    %377 = arith.addf %376, %375 : vector<1x32xf32>
    %378 = arith.divf %376, %377 : vector<1x32xf32>
    %379 = arith.mulf %372, %366 : vector<1x32xf32>
    %380 = arith.addf %363, %379 : vector<1x32xf32>
    %381 = math.tanh %380 : vector<1x32xf32>
    %cst_58 = arith.constant 1.000000e+00 : f32
    %382 = vector.broadcast %cst_58 : f32 to vector<1x32xf32>
    %383 = arith.subf %382, %378 : vector<1x32xf32>
    %384 = arith.mulf %383, %381 : vector<1x32xf32>
    %385 = arith.mulf %378, %331 : vector<1x32xf32>
    %386 = arith.addf %384, %385 : vector<1x32xf32>
    %387 = vector.extract_strided_slice %5 {offsets = [0, 96], sizes = [1, 32], strides = [1, 1]} : vector<1x192xf32> to vector<1x32xf32>
    %388 = vector.extract_strided_slice %5 {offsets = [0, 128], sizes = [1, 32], strides = [1, 1]} : vector<1x192xf32> to vector<1x32xf32>
    %389 = vector.extract_strided_slice %5 {offsets = [0, 160], sizes = [1, 32], strides = [1, 1]} : vector<1x192xf32> to vector<1x32xf32>
    %390 = vector.extract_strided_slice %360 {offsets = [0, 96], sizes = [1, 32], strides = [1, 1]} : vector<1x192xf32> to vector<1x32xf32>
    %391 = vector.extract_strided_slice %360 {offsets = [0, 128], sizes = [1, 32], strides = [1, 1]} : vector<1x192xf32> to vector<1x32xf32>
    %392 = vector.extract_strided_slice %360 {offsets = [0, 160], sizes = [1, 32], strides = [1, 1]} : vector<1x192xf32> to vector<1x32xf32>
    %393 = arith.addf %387, %390 : vector<1x32xf32>
    %394 = arith.negf %393 : vector<1x32xf32>
    %395 = math.exp %394 : vector<1x32xf32>
    %cst_59 = arith.constant 1.000000e+00 : f32
    %396 = vector.broadcast %cst_59 : f32 to vector<1x32xf32>
    %397 = arith.addf %396, %395 : vector<1x32xf32>
    %398 = arith.divf %396, %397 : vector<1x32xf32>
    %399 = arith.addf %388, %391 : vector<1x32xf32>
    %400 = arith.negf %399 : vector<1x32xf32>
    %401 = math.exp %400 : vector<1x32xf32>
    %cst_60 = arith.constant 1.000000e+00 : f32
    %402 = vector.broadcast %cst_60 : f32 to vector<1x32xf32>
    %403 = arith.addf %402, %401 : vector<1x32xf32>
    %404 = arith.divf %402, %403 : vector<1x32xf32>
    %405 = arith.mulf %398, %392 : vector<1x32xf32>
    %406 = arith.addf %389, %405 : vector<1x32xf32>
    %407 = math.tanh %406 : vector<1x32xf32>
    %cst_61 = arith.constant 1.000000e+00 : f32
    %408 = vector.broadcast %cst_61 : f32 to vector<1x32xf32>
    %409 = arith.subf %408, %404 : vector<1x32xf32>
    %410 = arith.mulf %409, %407 : vector<1x32xf32>
    %411 = arith.mulf %404, %357 : vector<1x32xf32>
    %412 = arith.addf %410, %411 : vector<1x32xf32>
    %413 = tpu.concatenate %386, %412 in 1 : vector<1x32xf32>, vector<1x32xf32> -> vector<1x64xf32>
    %cst_62 = arith.constant dense<0.000000e+00> : vector<1x192xf32>
    %414 = tpu.matmul %413, %24, %cst_62 {dimension_numbers = #tpu.dot_dimension_numbers<[1], [0], [0], [1], [0, 0, 1, 1], [], []>} : vector<1x64xf32>, vector<64x192xf32>, vector<1x192xf32> -> vector<1x192xf32>
    %415 = arith.addf %414, %25 : vector<1x192xf32>
    %416 = vector.extract_strided_slice %23 {offsets = [0, 0], sizes = [1, 32], strides = [1, 1]} : vector<1x192xf32> to vector<1x32xf32>
    %417 = vector.extract_strided_slice %23 {offsets = [0, 32], sizes = [1, 32], strides = [1, 1]} : vector<1x192xf32> to vector<1x32xf32>
    %418 = vector.extract_strided_slice %23 {offsets = [0, 64], sizes = [1, 32], strides = [1, 1]} : vector<1x192xf32> to vector<1x32xf32>
    %419 = vector.extract_strided_slice %415 {offsets = [0, 0], sizes = [1, 32], strides = [1, 1]} : vector<1x192xf32> to vector<1x32xf32>
    %420 = vector.extract_strided_slice %415 {offsets = [0, 32], sizes = [1, 32], strides = [1, 1]} : vector<1x192xf32> to vector<1x32xf32>
    %421 = vector.extract_strided_slice %415 {offsets = [0, 64], sizes = [1, 32], strides = [1, 1]} : vector<1x192xf32> to vector<1x32xf32>
    %422 = arith.addf %416, %419 : vector<1x32xf32>
    %423 = arith.negf %422 : vector<1x32xf32>
    %424 = math.exp %423 : vector<1x32xf32>
    %cst_63 = arith.constant 1.000000e+00 : f32
    %425 = vector.broadcast %cst_63 : f32 to vector<1x32xf32>
    %426 = arith.addf %425, %424 : vector<1x32xf32>
    %427 = arith.divf %425, %426 : vector<1x32xf32>
    %428 = arith.addf %417, %420 : vector<1x32xf32>
    %429 = arith.negf %428 : vector<1x32xf32>
    %430 = math.exp %429 : vector<1x32xf32>
    %cst_64 = arith.constant 1.000000e+00 : f32
    %431 = vector.broadcast %cst_64 : f32 to vector<1x32xf32>
    %432 = arith.addf %431, %430 : vector<1x32xf32>
    %433 = arith.divf %431, %432 : vector<1x32xf32>
    %434 = arith.mulf %427, %421 : vector<1x32xf32>
    %435 = arith.addf %418, %434 : vector<1x32xf32>
    %436 = math.tanh %435 : vector<1x32xf32>
    %cst_65 = arith.constant 1.000000e+00 : f32
    %437 = vector.broadcast %cst_65 : f32 to vector<1x32xf32>
    %438 = arith.subf %437, %433 : vector<1x32xf32>
    %439 = arith.mulf %438, %436 : vector<1x32xf32>
    %440 = arith.mulf %433, %386 : vector<1x32xf32>
    %441 = arith.addf %439, %440 : vector<1x32xf32>
    %442 = vector.extract_strided_slice %2 {offsets = [0, 96], sizes = [1, 32], strides = [1, 1]} : vector<1x192xf32> to vector<1x32xf32>
    %443 = vector.extract_strided_slice %2 {offsets = [0, 128], sizes = [1, 32], strides = [1, 1]} : vector<1x192xf32> to vector<1x32xf32>
    %444 = vector.extract_strided_slice %2 {offsets = [0, 160], sizes = [1, 32], strides = [1, 1]} : vector<1x192xf32> to vector<1x32xf32>
    %445 = vector.extract_strided_slice %415 {offsets = [0, 96], sizes = [1, 32], strides = [1, 1]} : vector<1x192xf32> to vector<1x32xf32>
    %446 = vector.extract_strided_slice %415 {offsets = [0, 128], sizes = [1, 32], strides = [1, 1]} : vector<1x192xf32> to vector<1x32xf32>
    %447 = vector.extract_strided_slice %415 {offsets = [0, 160], sizes = [1, 32], strides = [1, 1]} : vector<1x192xf32> to vector<1x32xf32>
    %448 = arith.addf %442, %445 : vector<1x32xf32>
    %449 = arith.negf %448 : vector<1x32xf32>
    %450 = math.exp %449 : vector<1x32xf32>
    %cst_66 = arith.constant 1.000000e+00 : f32
    %451 = vector.broadcast %cst_66 : f32 to vector<1x32xf32>
    %452 = arith.addf %451, %450 : vector<1x32xf32>
    %453 = arith.divf %451, %452 : vector<1x32xf32>
    %454 = arith.addf %443, %446 : vector<1x32xf32>
    %455 = arith.negf %454 : vector<1x32xf32>
    %456 = math.exp %455 : vector<1x32xf32>
    %cst_67 = arith.constant 1.000000e+00 : f32
    %457 = vector.broadcast %cst_67 : f32 to vector<1x32xf32>
    %458 = arith.addf %457, %456 : vector<1x32xf32>
    %459 = arith.divf %457, %458 : vector<1x32xf32>
    %460 = arith.mulf %453, %447 : vector<1x32xf32>
    %461 = arith.addf %444, %460 : vector<1x32xf32>
    %462 = math.tanh %461 : vector<1x32xf32>
    %cst_68 = arith.constant 1.000000e+00 : f32
    %463 = vector.broadcast %cst_68 : f32 to vector<1x32xf32>
    %464 = arith.subf %463, %459 : vector<1x32xf32>
    %465 = arith.mulf %464, %462 : vector<1x32xf32>
    %466 = arith.mulf %459, %412 : vector<1x32xf32>
    %467 = arith.addf %465, %466 : vector<1x32xf32>
    %468 = tpu.concatenate %56, %111, %166, %221, %276, %331, %386, %441 in 0 : vector<1x32xf32>, vector<1x32xf32>, vector<1x32xf32>, vector<1x32xf32>, vector<1x32xf32>, vector<1x32xf32>, vector<1x32xf32>, vector<1x32xf32> -> vector<8x32xf32>
    %469 = tpu.concatenate %467, %412, %357, %302, %247, %192, %137, %82 in 0 : vector<1x32xf32>, vector<1x32xf32>, vector<1x32xf32>, vector<1x32xf32>, vector<1x32xf32>, vector<1x32xf32>, vector<1x32xf32>, vector<1x32xf32> -> vector<8x32xf32>
    %470 = arith.addf %468, %469 : vector<8x32xf32>
    %c0_69 = arith.constant 0 : index
    %c0_70 = arith.constant 0 : index
    %471 = vector.load %arg4[%c0_69, %c0_70] : memref<160x192xf32, #tpu.memory_space<vmem>>, vector<160x192xf32>
    %c0_71 = arith.constant 0 : index
    %c0_72 = arith.constant 0 : index
    %472 = vector.load %arg5[%c0_71, %c0_72] : memref<1x192xf32, #tpu.memory_space<vmem>>, vector<1x192xf32>
    %c0_73 = arith.constant 0 : index
    %c0_74 = arith.constant 0 : index
    %473 = vector.load %arg6[%c0_73, %c0_74] : memref<64x32xf32, #tpu.memory_space<vmem>>, vector<64x32xf32>
    %c0_75 = arith.constant 0 : index
    %c0_76 = arith.constant 0 : index
    %474 = vector.load %arg7[%c0_75, %c0_76] : memref<1x32xf32, #tpu.memory_space<vmem>>, vector<1x32xf32>
    %c0_77 = arith.constant 0 : index
    %c0_78 = arith.constant 0 : index
    %475 = vector.load %arg8[%c0_77, %c0_78] : memref<32x128xf32, #tpu.memory_space<vmem>>, vector<32x128xf32>
    %c0_79 = arith.constant 0 : index
    %c0_80 = arith.constant 0 : index
    %476 = vector.load %arg9[%c0_79, %c0_80] : memref<1x128xf32, #tpu.memory_space<vmem>>, vector<1x128xf32>
    %c101_i32 = arith.constant 101 : i32
    %477 = vector.broadcast %c101_i32 : i32 to vector<1x1xi32>
    %478 = tpu.iota {dimensions = array<i32: 1>} : vector<1x128xi32>
    %479 = tpu.iota {dimensions = array<i32: 1>} : vector<1x6xi32>
    %c0_i32 = arith.constant 0 : i32
    %480 = vector.broadcast %c0_i32 : i32 to vector<1x6xi32>
    %cst_81 = arith.constant 0.000000e+00 : f32
    %481 = vector.broadcast %cst_81 : f32 to vector<1x6xf32>
    %482 = vector.broadcast %477 : vector<1x1xi32> to vector<1x128xi32>
    %483 = arith.cmpi eq, %478, %482 : vector<1x128xi32>
    %484 = arith.extui %483 : vector<1x128xi1> to vector<1x128xi32>
    %485 = arith.sitofp %484 : vector<1x128xi32> to vector<1x128xf32>
    %486 = tpu.concatenate %485, %441 in 1 : vector<1x128xf32>, vector<1x32xf32> -> vector<1x160xf32>
    %cst_82 = arith.constant dense<0.000000e+00> : vector<1x192xf32>
    %487 = tpu.matmul %486, %471, %cst_82 {dimension_numbers = #tpu.dot_dimension_numbers<[1], [0], [0], [1], [0, 0, 1, 1], [], []>} : vector<1x160xf32>, vector<160x192xf32>, vector<1x192xf32> -> vector<1x192xf32>
    %488 = arith.addf %487, %472 : vector<1x192xf32>
    %489 = vector.extract_strided_slice %488 {offsets = [0, 0], sizes = [1, 32], strides = [1, 1]} : vector<1x192xf32> to vector<1x32xf32>
    %490 = vector.extract_strided_slice %488 {offsets = [0, 32], sizes = [1, 32], strides = [1, 1]} : vector<1x192xf32> to vector<1x32xf32>
    %491 = vector.extract_strided_slice %488 {offsets = [0, 64], sizes = [1, 32], strides = [1, 1]} : vector<1x192xf32> to vector<1x32xf32>
    %492 = vector.extract_strided_slice %488 {offsets = [0, 96], sizes = [1, 32], strides = [1, 1]} : vector<1x192xf32> to vector<1x32xf32>
    %493 = vector.extract_strided_slice %488 {offsets = [0, 128], sizes = [1, 32], strides = [1, 1]} : vector<1x192xf32> to vector<1x32xf32>
    %494 = vector.extract_strided_slice %488 {offsets = [0, 160], sizes = [1, 32], strides = [1, 1]} : vector<1x192xf32> to vector<1x32xf32>
    %495 = arith.addf %489, %492 : vector<1x32xf32>
    %496 = arith.negf %495 : vector<1x32xf32>
    %497 = math.exp %496 : vector<1x32xf32>
    %cst_83 = arith.constant 1.000000e+00 : f32
    %498 = vector.broadcast %cst_83 : f32 to vector<1x32xf32>
    %499 = arith.addf %498, %497 : vector<1x32xf32>
    %500 = arith.divf %498, %499 : vector<1x32xf32>
    %501 = arith.addf %490, %493 : vector<1x32xf32>
    %502 = arith.negf %501 : vector<1x32xf32>
    %503 = math.exp %502 : vector<1x32xf32>
    %cst_84 = arith.constant 1.000000e+00 : f32
    %504 = vector.broadcast %cst_84 : f32 to vector<1x32xf32>
    %505 = arith.addf %504, %503 : vector<1x32xf32>
    %506 = arith.divf %504, %505 : vector<1x32xf32>
    %507 = arith.mulf %500, %494 : vector<1x32xf32>
    %508 = arith.addf %491, %507 : vector<1x32xf32>
    %509 = math.tanh %508 : vector<1x32xf32>
    %cst_85 = arith.constant 1.000000e+00 : f32
    %510 = vector.broadcast %cst_85 : f32 to vector<1x32xf32>
    %511 = arith.subf %510, %506 : vector<1x32xf32>
    %512 = arith.mulf %511, %509 : vector<1x32xf32>
    %513 = arith.mulf %506, %441 : vector<1x32xf32>
    %514 = arith.addf %512, %513 : vector<1x32xf32>
    %cst_86 = arith.constant dense<0.000000e+00> : vector<1x8xf32>
    %515 = tpu.matmul %514, %470, %cst_86 {dimension_numbers = #tpu.dot_dimension_numbers<[1], [1], [0], [0], [0, 0, 1, 0], [], []>} : vector<1x32xf32>, vector<8x32xf32>, vector<1x8xf32> -> vector<1x8xf32>
    %cst_87 = arith.constant dense<0xFF800000> : vector<1xf32>
    %516 = vector.multi_reduction <maximumf>, %515, %cst_87 [1] : vector<1x8xf32> to vector<1xf32>
    %517 = vector.shape_cast %516 : vector<1xf32> to vector<1x1xf32>
    %518 = vector.broadcast %517 : vector<1x1xf32> to vector<1x8xf32>
    %519 = arith.subf %515, %518 : vector<1x8xf32>
    %520 = math.exp %519 : vector<1x8xf32>
    %cst_88 = arith.constant dense<0.000000e+00> : vector<1x32xf32>
    %521 = tpu.matmul %520, %470, %cst_88 {dimension_numbers = #tpu.dot_dimension_numbers<[1], [0], [0], [1], [0, 0, 1, 1], [], []>} : vector<1x8xf32>, vector<8x32xf32>, vector<1x32xf32> -> vector<1x32xf32>
    %cst_89 = arith.constant dense<0.000000e+00> : vector<1xf32>
    %522 = vector.multi_reduction <add>, %520, %cst_89 [1] : vector<1x8xf32> to vector<1xf32>
    %523 = vector.shape_cast %522 : vector<1xf32> to vector<1x1xf32>
    %524 = tpu.reciprocal %523 {approx = true} : vector<1x1xf32> -> vector<1x1xf32>
    %525 = vector.broadcast %524 : vector<1x1xf32> to vector<1x32xf32>
    %526 = arith.mulf %521, %525 : vector<1x32xf32>
    %527 = tpu.concatenate %514, %526 in 1 : vector<1x32xf32>, vector<1x32xf32> -> vector<1x64xf32>
    %cst_90 = arith.constant dense<0.000000e+00> : vector<1x32xf32>
    %528 = tpu.matmul %527, %473, %cst_90 {dimension_numbers = #tpu.dot_dimension_numbers<[1], [0], [0], [1], [0, 0, 1, 1], [], []>} : vector<1x64xf32>, vector<64x32xf32>, vector<1x32xf32> -> vector<1x32xf32>
    %529 = arith.addf %528, %474 : vector<1x32xf32>
    %530 = math.tanh %529 : vector<1x32xf32>
    %cst_91 = arith.constant dense<0.000000e+00> : vector<1x128xf32>
    %531 = tpu.matmul %530, %475, %cst_91 {dimension_numbers = #tpu.dot_dimension_numbers<[1], [0], [0], [1], [0, 0, 1, 1], [], []>} : vector<1x32xf32>, vector<32x128xf32>, vector<1x128xf32> -> vector<1x128xf32>
    %532 = arith.addf %531, %476 : vector<1x128xf32>
    %cst_92 = arith.constant dense<0xFF800000> : vector<1xf32>
    %533 = vector.multi_reduction <maximumf>, %532, %cst_92 [1] : vector<1x128xf32> to vector<1xf32>
    %534 = vector.shape_cast %533 : vector<1xf32> to vector<1x1xf32>
    %535 = tpu.reduce_index %532 {axis = 1 : i32, kind = #tpu.reduction_kind<arg_max>} : vector<1x128xf32> -> vector<1xi32>
    %536 = vector.shape_cast %535 : vector<1xi32> to vector<1x1xi32>
    %537 = vector.broadcast %534 : vector<1x1xf32> to vector<1x128xf32>
    %538 = arith.subf %532, %537 : vector<1x128xf32>
    %539 = math.exp %538 : vector<1x128xf32>
    %cst_93 = arith.constant dense<0.000000e+00> : vector<1xf32>
    %540 = vector.multi_reduction <add>, %539, %cst_93 [1] : vector<1x128xf32> to vector<1xf32>
    %541 = vector.shape_cast %540 : vector<1xf32> to vector<1x1xf32>
    %542 = tpu.reciprocal %541 {approx = true} : vector<1x1xf32> -> vector<1x1xf32>
    %c0_i32_94 = arith.constant 0 : i32
    %543 = vector.broadcast %c0_i32_94 : i32 to vector<1x6xi32>
    %544 = arith.cmpi eq, %479, %543 : vector<1x6xi32>
    %545 = vector.shape_cast %536 : vector<1x1xi32> to vector<1x1xi32>
    %546 = vector.broadcast %545 : vector<1x1xi32> to vector<1x6xi32>
    %547 = arith.select %544, %546, %480 : vector<1x6xi1>, vector<1x6xi32>
    %c0_i32_95 = arith.constant 0 : i32
    %548 = vector.broadcast %c0_i32_95 : i32 to vector<1x6xi32>
    %549 = arith.cmpi eq, %479, %548 : vector<1x6xi32>
    %550 = vector.shape_cast %542 : vector<1x1xf32> to vector<1x1xf32>
    %551 = vector.broadcast %550 : vector<1x1xf32> to vector<1x6xf32>
    %552 = arith.select %549, %551, %481 : vector<1x6xi1>, vector<1x6xf32>
    %553 = vector.broadcast %536 : vector<1x1xi32> to vector<1x128xi32>
    %554 = arith.cmpi eq, %478, %553 : vector<1x128xi32>
    %555 = arith.extui %554 : vector<1x128xi1> to vector<1x128xi32>
    %556 = arith.sitofp %555 : vector<1x128xi32> to vector<1x128xf32>
    %557 = tpu.concatenate %556, %514 in 1 : vector<1x128xf32>, vector<1x32xf32> -> vector<1x160xf32>
    %cst_96 = arith.constant dense<0.000000e+00> : vector<1x192xf32>
    %558 = tpu.matmul %557, %471, %cst_96 {dimension_numbers = #tpu.dot_dimension_numbers<[1], [0], [0], [1], [0, 0, 1, 1], [], []>} : vector<1x160xf32>, vector<160x192xf32>, vector<1x192xf32> -> vector<1x192xf32>
    %559 = arith.addf %558, %472 : vector<1x192xf32>
    %560 = vector.extract_strided_slice %559 {offsets = [0, 0], sizes = [1, 32], strides = [1, 1]} : vector<1x192xf32> to vector<1x32xf32>
    %561 = vector.extract_strided_slice %559 {offsets = [0, 32], sizes = [1, 32], strides = [1, 1]} : vector<1x192xf32> to vector<1x32xf32>
    %562 = vector.extract_strided_slice %559 {offsets = [0, 64], sizes = [1, 32], strides = [1, 1]} : vector<1x192xf32> to vector<1x32xf32>
    %563 = vector.extract_strided_slice %559 {offsets = [0, 96], sizes = [1, 32], strides = [1, 1]} : vector<1x192xf32> to vector<1x32xf32>
    %564 = vector.extract_strided_slice %559 {offsets = [0, 128], sizes = [1, 32], strides = [1, 1]} : vector<1x192xf32> to vector<1x32xf32>
    %565 = vector.extract_strided_slice %559 {offsets = [0, 160], sizes = [1, 32], strides = [1, 1]} : vector<1x192xf32> to vector<1x32xf32>
    %566 = arith.addf %560, %563 : vector<1x32xf32>
    %567 = arith.negf %566 : vector<1x32xf32>
    %568 = math.exp %567 : vector<1x32xf32>
    %cst_97 = arith.constant 1.000000e+00 : f32
    %569 = vector.broadcast %cst_97 : f32 to vector<1x32xf32>
    %570 = arith.addf %569, %568 : vector<1x32xf32>
    %571 = arith.divf %569, %570 : vector<1x32xf32>
    %572 = arith.addf %561, %564 : vector<1x32xf32>
    %573 = arith.negf %572 : vector<1x32xf32>
    %574 = math.exp %573 : vector<1x32xf32>
    %cst_98 = arith.constant 1.000000e+00 : f32
    %575 = vector.broadcast %cst_98 : f32 to vector<1x32xf32>
    %576 = arith.addf %575, %574 : vector<1x32xf32>
    %577 = arith.divf %575, %576 : vector<1x32xf32>
    %578 = arith.mulf %571, %565 : vector<1x32xf32>
    %579 = arith.addf %562, %578 : vector<1x32xf32>
    %580 = math.tanh %579 : vector<1x32xf32>
    %cst_99 = arith.constant 1.000000e+00 : f32
    %581 = vector.broadcast %cst_99 : f32 to vector<1x32xf32>
    %582 = arith.subf %581, %577 : vector<1x32xf32>
    %583 = arith.mulf %582, %580 : vector<1x32xf32>
    %584 = arith.mulf %577, %514 : vector<1x32xf32>
    %585 = arith.addf %583, %584 : vector<1x32xf32>
    %cst_100 = arith.constant dense<0.000000e+00> : vector<1x8xf32>
    %586 = tpu.matmul %585, %470, %cst_100 {dimension_numbers = #tpu.dot_dimension_numbers<[1], [1], [0], [0], [0, 0, 1, 0], [], []>} : vector<1x32xf32>, vector<8x32xf32>, vector<1x8xf32> -> vector<1x8xf32>
    %cst_101 = arith.constant dense<0xFF800000> : vector<1xf32>
    %587 = vector.multi_reduction <maximumf>, %586, %cst_101 [1] : vector<1x8xf32> to vector<1xf32>
    %588 = vector.shape_cast %587 : vector<1xf32> to vector<1x1xf32>
    %589 = vector.broadcast %588 : vector<1x1xf32> to vector<1x8xf32>
    %590 = arith.subf %586, %589 : vector<1x8xf32>
    %591 = math.exp %590 : vector<1x8xf32>
    %cst_102 = arith.constant dense<0.000000e+00> : vector<1x32xf32>
    %592 = tpu.matmul %591, %470, %cst_102 {dimension_numbers = #tpu.dot_dimension_numbers<[1], [0], [0], [1], [0, 0, 1, 1], [], []>} : vector<1x8xf32>, vector<8x32xf32>, vector<1x32xf32> -> vector<1x32xf32>
    %cst_103 = arith.constant dense<0.000000e+00> : vector<1xf32>
    %593 = vector.multi_reduction <add>, %591, %cst_103 [1] : vector<1x8xf32> to vector<1xf32>
    %594 = vector.shape_cast %593 : vector<1xf32> to vector<1x1xf32>
    %595 = tpu.reciprocal %594 {approx = true} : vector<1x1xf32> -> vector<1x1xf32>
    %596 = vector.broadcast %595 : vector<1x1xf32> to vector<1x32xf32>
    %597 = arith.mulf %592, %596 : vector<1x32xf32>
    %598 = tpu.concatenate %585, %597 in 1 : vector<1x32xf32>, vector<1x32xf32> -> vector<1x64xf32>
    %cst_104 = arith.constant dense<0.000000e+00> : vector<1x32xf32>
    %599 = tpu.matmul %598, %473, %cst_104 {dimension_numbers = #tpu.dot_dimension_numbers<[1], [0], [0], [1], [0, 0, 1, 1], [], []>} : vector<1x64xf32>, vector<64x32xf32>, vector<1x32xf32> -> vector<1x32xf32>
    %600 = arith.addf %599, %474 : vector<1x32xf32>
    %601 = math.tanh %600 : vector<1x32xf32>
    %cst_105 = arith.constant dense<0.000000e+00> : vector<1x128xf32>
    %602 = tpu.matmul %601, %475, %cst_105 {dimension_numbers = #tpu.dot_dimension_numbers<[1], [0], [0], [1], [0, 0, 1, 1], [], []>} : vector<1x32xf32>, vector<32x128xf32>, vector<1x128xf32> -> vector<1x128xf32>
    %603 = arith.addf %602, %476 : vector<1x128xf32>
    %cst_106 = arith.constant dense<0xFF800000> : vector<1xf32>
    %604 = vector.multi_reduction <maximumf>, %603, %cst_106 [1] : vector<1x128xf32> to vector<1xf32>
    %605 = vector.shape_cast %604 : vector<1xf32> to vector<1x1xf32>
    %606 = tpu.reduce_index %603 {axis = 1 : i32, kind = #tpu.reduction_kind<arg_max>} : vector<1x128xf32> -> vector<1xi32>
    %607 = vector.shape_cast %606 : vector<1xi32> to vector<1x1xi32>
    %608 = vector.broadcast %605 : vector<1x1xf32> to vector<1x128xf32>
    %609 = arith.subf %603, %608 : vector<1x128xf32>
    %610 = math.exp %609 : vector<1x128xf32>
    %cst_107 = arith.constant dense<0.000000e+00> : vector<1xf32>
    %611 = vector.multi_reduction <add>, %610, %cst_107 [1] : vector<1x128xf32> to vector<1xf32>
    %612 = vector.shape_cast %611 : vector<1xf32> to vector<1x1xf32>
    %613 = tpu.reciprocal %612 {approx = true} : vector<1x1xf32> -> vector<1x1xf32>
    %c1_i32 = arith.constant 1 : i32
    %614 = vector.broadcast %c1_i32 : i32 to vector<1x6xi32>
    %615 = arith.cmpi eq, %479, %614 : vector<1x6xi32>
    %616 = vector.shape_cast %607 : vector<1x1xi32> to vector<1x1xi32>
    %617 = vector.broadcast %616 : vector<1x1xi32> to vector<1x6xi32>
    %618 = arith.select %615, %617, %547 : vector<1x6xi1>, vector<1x6xi32>
    %c1_i32_108 = arith.constant 1 : i32
    %619 = vector.broadcast %c1_i32_108 : i32 to vector<1x6xi32>
    %620 = arith.cmpi eq, %479, %619 : vector<1x6xi32>
    %621 = vector.shape_cast %613 : vector<1x1xf32> to vector<1x1xf32>
    %622 = vector.broadcast %621 : vector<1x1xf32> to vector<1x6xf32>
    %623 = arith.select %620, %622, %552 : vector<1x6xi1>, vector<1x6xf32>
    %624 = vector.broadcast %607 : vector<1x1xi32> to vector<1x128xi32>
    %625 = arith.cmpi eq, %478, %624 : vector<1x128xi32>
    %626 = arith.extui %625 : vector<1x128xi1> to vector<1x128xi32>
    %627 = arith.sitofp %626 : vector<1x128xi32> to vector<1x128xf32>
    %628 = tpu.concatenate %627, %585 in 1 : vector<1x128xf32>, vector<1x32xf32> -> vector<1x160xf32>
    %cst_109 = arith.constant dense<0.000000e+00> : vector<1x192xf32>
    %629 = tpu.matmul %628, %471, %cst_109 {dimension_numbers = #tpu.dot_dimension_numbers<[1], [0], [0], [1], [0, 0, 1, 1], [], []>} : vector<1x160xf32>, vector<160x192xf32>, vector<1x192xf32> -> vector<1x192xf32>
    %630 = arith.addf %629, %472 : vector<1x192xf32>
    %631 = vector.extract_strided_slice %630 {offsets = [0, 0], sizes = [1, 32], strides = [1, 1]} : vector<1x192xf32> to vector<1x32xf32>
    %632 = vector.extract_strided_slice %630 {offsets = [0, 32], sizes = [1, 32], strides = [1, 1]} : vector<1x192xf32> to vector<1x32xf32>
    %633 = vector.extract_strided_slice %630 {offsets = [0, 64], sizes = [1, 32], strides = [1, 1]} : vector<1x192xf32> to vector<1x32xf32>
    %634 = vector.extract_strided_slice %630 {offsets = [0, 96], sizes = [1, 32], strides = [1, 1]} : vector<1x192xf32> to vector<1x32xf32>
    %635 = vector.extract_strided_slice %630 {offsets = [0, 128], sizes = [1, 32], strides = [1, 1]} : vector<1x192xf32> to vector<1x32xf32>
    %636 = vector.extract_strided_slice %630 {offsets = [0, 160], sizes = [1, 32], strides = [1, 1]} : vector<1x192xf32> to vector<1x32xf32>
    %637 = arith.addf %631, %634 : vector<1x32xf32>
    %638 = arith.negf %637 : vector<1x32xf32>
    %639 = math.exp %638 : vector<1x32xf32>
    %cst_110 = arith.constant 1.000000e+00 : f32
    %640 = vector.broadcast %cst_110 : f32 to vector<1x32xf32>
    %641 = arith.addf %640, %639 : vector<1x32xf32>
    %642 = arith.divf %640, %641 : vector<1x32xf32>
    %643 = arith.addf %632, %635 : vector<1x32xf32>
    %644 = arith.negf %643 : vector<1x32xf32>
    %645 = math.exp %644 : vector<1x32xf32>
    %cst_111 = arith.constant 1.000000e+00 : f32
    %646 = vector.broadcast %cst_111 : f32 to vector<1x32xf32>
    %647 = arith.addf %646, %645 : vector<1x32xf32>
    %648 = arith.divf %646, %647 : vector<1x32xf32>
    %649 = arith.mulf %642, %636 : vector<1x32xf32>
    %650 = arith.addf %633, %649 : vector<1x32xf32>
    %651 = math.tanh %650 : vector<1x32xf32>
    %cst_112 = arith.constant 1.000000e+00 : f32
    %652 = vector.broadcast %cst_112 : f32 to vector<1x32xf32>
    %653 = arith.subf %652, %648 : vector<1x32xf32>
    %654 = arith.mulf %653, %651 : vector<1x32xf32>
    %655 = arith.mulf %648, %585 : vector<1x32xf32>
    %656 = arith.addf %654, %655 : vector<1x32xf32>
    %cst_113 = arith.constant dense<0.000000e+00> : vector<1x8xf32>
    %657 = tpu.matmul %656, %470, %cst_113 {dimension_numbers = #tpu.dot_dimension_numbers<[1], [1], [0], [0], [0, 0, 1, 0], [], []>} : vector<1x32xf32>, vector<8x32xf32>, vector<1x8xf32> -> vector<1x8xf32>
    %cst_114 = arith.constant dense<0xFF800000> : vector<1xf32>
    %658 = vector.multi_reduction <maximumf>, %657, %cst_114 [1] : vector<1x8xf32> to vector<1xf32>
    %659 = vector.shape_cast %658 : vector<1xf32> to vector<1x1xf32>
    %660 = vector.broadcast %659 : vector<1x1xf32> to vector<1x8xf32>
    %661 = arith.subf %657, %660 : vector<1x8xf32>
    %662 = math.exp %661 : vector<1x8xf32>
    %cst_115 = arith.constant dense<0.000000e+00> : vector<1x32xf32>
    %663 = tpu.matmul %662, %470, %cst_115 {dimension_numbers = #tpu.dot_dimension_numbers<[1], [0], [0], [1], [0, 0, 1, 1], [], []>} : vector<1x8xf32>, vector<8x32xf32>, vector<1x32xf32> -> vector<1x32xf32>
    %cst_116 = arith.constant dense<0.000000e+00> : vector<1xf32>
    %664 = vector.multi_reduction <add>, %662, %cst_116 [1] : vector<1x8xf32> to vector<1xf32>
    %665 = vector.shape_cast %664 : vector<1xf32> to vector<1x1xf32>
    %666 = tpu.reciprocal %665 {approx = true} : vector<1x1xf32> -> vector<1x1xf32>
    %667 = vector.broadcast %666 : vector<1x1xf32> to vector<1x32xf32>
    %668 = arith.mulf %663, %667 : vector<1x32xf32>
    %669 = tpu.concatenate %656, %668 in 1 : vector<1x32xf32>, vector<1x32xf32> -> vector<1x64xf32>
    %cst_117 = arith.constant dense<0.000000e+00> : vector<1x32xf32>
    %670 = tpu.matmul %669, %473, %cst_117 {dimension_numbers = #tpu.dot_dimension_numbers<[1], [0], [0], [1], [0, 0, 1, 1], [], []>} : vector<1x64xf32>, vector<64x32xf32>, vector<1x32xf32> -> vector<1x32xf32>
    %671 = arith.addf %670, %474 : vector<1x32xf32>
    %672 = math.tanh %671 : vector<1x32xf32>
    %cst_118 = arith.constant dense<0.000000e+00> : vector<1x128xf32>
    %673 = tpu.matmul %672, %475, %cst_118 {dimension_numbers = #tpu.dot_dimension_numbers<[1], [0], [0], [1], [0, 0, 1, 1], [], []>} : vector<1x32xf32>, vector<32x128xf32>, vector<1x128xf32> -> vector<1x128xf32>
    %674 = arith.addf %673, %476 : vector<1x128xf32>
    %cst_119 = arith.constant dense<0xFF800000> : vector<1xf32>
    %675 = vector.multi_reduction <maximumf>, %674, %cst_119 [1] : vector<1x128xf32> to vector<1xf32>
    %676 = vector.shape_cast %675 : vector<1xf32> to vector<1x1xf32>
    %677 = tpu.reduce_index %674 {axis = 1 : i32, kind = #tpu.reduction_kind<arg_max>} : vector<1x128xf32> -> vector<1xi32>
    %678 = vector.shape_cast %677 : vector<1xi32> to vector<1x1xi32>
    %679 = vector.broadcast %676 : vector<1x1xf32> to vector<1x128xf32>
    %680 = arith.subf %674, %679 : vector<1x128xf32>
    %681 = math.exp %680 : vector<1x128xf32>
    %cst_120 = arith.constant dense<0.000000e+00> : vector<1xf32>
    %682 = vector.multi_reduction <add>, %681, %cst_120 [1] : vector<1x128xf32> to vector<1xf32>
    %683 = vector.shape_cast %682 : vector<1xf32> to vector<1x1xf32>
    %684 = tpu.reciprocal %683 {approx = true} : vector<1x1xf32> -> vector<1x1xf32>
    %c2_i32 = arith.constant 2 : i32
    %685 = vector.broadcast %c2_i32 : i32 to vector<1x6xi32>
    %686 = arith.cmpi eq, %479, %685 : vector<1x6xi32>
    %687 = vector.shape_cast %678 : vector<1x1xi32> to vector<1x1xi32>
    %688 = vector.broadcast %687 : vector<1x1xi32> to vector<1x6xi32>
    %689 = arith.select %686, %688, %618 : vector<1x6xi1>, vector<1x6xi32>
    %c2_i32_121 = arith.constant 2 : i32
    %690 = vector.broadcast %c2_i32_121 : i32 to vector<1x6xi32>
    %691 = arith.cmpi eq, %479, %690 : vector<1x6xi32>
    %692 = vector.shape_cast %684 : vector<1x1xf32> to vector<1x1xf32>
    %693 = vector.broadcast %692 : vector<1x1xf32> to vector<1x6xf32>
    %694 = arith.select %691, %693, %623 : vector<1x6xi1>, vector<1x6xf32>
    %695 = vector.broadcast %678 : vector<1x1xi32> to vector<1x128xi32>
    %696 = arith.cmpi eq, %478, %695 : vector<1x128xi32>
    %697 = arith.extui %696 : vector<1x128xi1> to vector<1x128xi32>
    %698 = arith.sitofp %697 : vector<1x128xi32> to vector<1x128xf32>
    %699 = tpu.concatenate %698, %656 in 1 : vector<1x128xf32>, vector<1x32xf32> -> vector<1x160xf32>
    %cst_122 = arith.constant dense<0.000000e+00> : vector<1x192xf32>
    %700 = tpu.matmul %699, %471, %cst_122 {dimension_numbers = #tpu.dot_dimension_numbers<[1], [0], [0], [1], [0, 0, 1, 1], [], []>} : vector<1x160xf32>, vector<160x192xf32>, vector<1x192xf32> -> vector<1x192xf32>
    %701 = arith.addf %700, %472 : vector<1x192xf32>
    %702 = vector.extract_strided_slice %701 {offsets = [0, 0], sizes = [1, 32], strides = [1, 1]} : vector<1x192xf32> to vector<1x32xf32>
    %703 = vector.extract_strided_slice %701 {offsets = [0, 32], sizes = [1, 32], strides = [1, 1]} : vector<1x192xf32> to vector<1x32xf32>
    %704 = vector.extract_strided_slice %701 {offsets = [0, 64], sizes = [1, 32], strides = [1, 1]} : vector<1x192xf32> to vector<1x32xf32>
    %705 = vector.extract_strided_slice %701 {offsets = [0, 96], sizes = [1, 32], strides = [1, 1]} : vector<1x192xf32> to vector<1x32xf32>
    %706 = vector.extract_strided_slice %701 {offsets = [0, 128], sizes = [1, 32], strides = [1, 1]} : vector<1x192xf32> to vector<1x32xf32>
    %707 = vector.extract_strided_slice %701 {offsets = [0, 160], sizes = [1, 32], strides = [1, 1]} : vector<1x192xf32> to vector<1x32xf32>
    %708 = arith.addf %702, %705 : vector<1x32xf32>
    %709 = arith.negf %708 : vector<1x32xf32>
    %710 = math.exp %709 : vector<1x32xf32>
    %cst_123 = arith.constant 1.000000e+00 : f32
    %711 = vector.broadcast %cst_123 : f32 to vector<1x32xf32>
    %712 = arith.addf %711, %710 : vector<1x32xf32>
    %713 = arith.divf %711, %712 : vector<1x32xf32>
    %714 = arith.addf %703, %706 : vector<1x32xf32>
    %715 = arith.negf %714 : vector<1x32xf32>
    %716 = math.exp %715 : vector<1x32xf32>
    %cst_124 = arith.constant 1.000000e+00 : f32
    %717 = vector.broadcast %cst_124 : f32 to vector<1x32xf32>
    %718 = arith.addf %717, %716 : vector<1x32xf32>
    %719 = arith.divf %717, %718 : vector<1x32xf32>
    %720 = arith.mulf %713, %707 : vector<1x32xf32>
    %721 = arith.addf %704, %720 : vector<1x32xf32>
    %722 = math.tanh %721 : vector<1x32xf32>
    %cst_125 = arith.constant 1.000000e+00 : f32
    %723 = vector.broadcast %cst_125 : f32 to vector<1x32xf32>
    %724 = arith.subf %723, %719 : vector<1x32xf32>
    %725 = arith.mulf %724, %722 : vector<1x32xf32>
    %726 = arith.mulf %719, %656 : vector<1x32xf32>
    %727 = arith.addf %725, %726 : vector<1x32xf32>
    %cst_126 = arith.constant dense<0.000000e+00> : vector<1x8xf32>
    %728 = tpu.matmul %727, %470, %cst_126 {dimension_numbers = #tpu.dot_dimension_numbers<[1], [1], [0], [0], [0, 0, 1, 0], [], []>} : vector<1x32xf32>, vector<8x32xf32>, vector<1x8xf32> -> vector<1x8xf32>
    %cst_127 = arith.constant dense<0xFF800000> : vector<1xf32>
    %729 = vector.multi_reduction <maximumf>, %728, %cst_127 [1] : vector<1x8xf32> to vector<1xf32>
    %730 = vector.shape_cast %729 : vector<1xf32> to vector<1x1xf32>
    %731 = vector.broadcast %730 : vector<1x1xf32> to vector<1x8xf32>
    %732 = arith.subf %728, %731 : vector<1x8xf32>
    %733 = math.exp %732 : vector<1x8xf32>
    %cst_128 = arith.constant dense<0.000000e+00> : vector<1x32xf32>
    %734 = tpu.matmul %733, %470, %cst_128 {dimension_numbers = #tpu.dot_dimension_numbers<[1], [0], [0], [1], [0, 0, 1, 1], [], []>} : vector<1x8xf32>, vector<8x32xf32>, vector<1x32xf32> -> vector<1x32xf32>
    %cst_129 = arith.constant dense<0.000000e+00> : vector<1xf32>
    %735 = vector.multi_reduction <add>, %733, %cst_129 [1] : vector<1x8xf32> to vector<1xf32>
    %736 = vector.shape_cast %735 : vector<1xf32> to vector<1x1xf32>
    %737 = tpu.reciprocal %736 {approx = true} : vector<1x1xf32> -> vector<1x1xf32>
    %738 = vector.broadcast %737 : vector<1x1xf32> to vector<1x32xf32>
    %739 = arith.mulf %734, %738 : vector<1x32xf32>
    %740 = tpu.concatenate %727, %739 in 1 : vector<1x32xf32>, vector<1x32xf32> -> vector<1x64xf32>
    %cst_130 = arith.constant dense<0.000000e+00> : vector<1x32xf32>
    %741 = tpu.matmul %740, %473, %cst_130 {dimension_numbers = #tpu.dot_dimension_numbers<[1], [0], [0], [1], [0, 0, 1, 1], [], []>} : vector<1x64xf32>, vector<64x32xf32>, vector<1x32xf32> -> vector<1x32xf32>
    %742 = arith.addf %741, %474 : vector<1x32xf32>
    %743 = math.tanh %742 : vector<1x32xf32>
    %cst_131 = arith.constant dense<0.000000e+00> : vector<1x128xf32>
    %744 = tpu.matmul %743, %475, %cst_131 {dimension_numbers = #tpu.dot_dimension_numbers<[1], [0], [0], [1], [0, 0, 1, 1], [], []>} : vector<1x32xf32>, vector<32x128xf32>, vector<1x128xf32> -> vector<1x128xf32>
    %745 = arith.addf %744, %476 : vector<1x128xf32>
    %cst_132 = arith.constant dense<0xFF800000> : vector<1xf32>
    %746 = vector.multi_reduction <maximumf>, %745, %cst_132 [1] : vector<1x128xf32> to vector<1xf32>
    %747 = vector.shape_cast %746 : vector<1xf32> to vector<1x1xf32>
    %748 = tpu.reduce_index %745 {axis = 1 : i32, kind = #tpu.reduction_kind<arg_max>} : vector<1x128xf32> -> vector<1xi32>
    %749 = vector.shape_cast %748 : vector<1xi32> to vector<1x1xi32>
    %750 = vector.broadcast %747 : vector<1x1xf32> to vector<1x128xf32>
    %751 = arith.subf %745, %750 : vector<1x128xf32>
    %752 = math.exp %751 : vector<1x128xf32>
    %cst_133 = arith.constant dense<0.000000e+00> : vector<1xf32>
    %753 = vector.multi_reduction <add>, %752, %cst_133 [1] : vector<1x128xf32> to vector<1xf32>
    %754 = vector.shape_cast %753 : vector<1xf32> to vector<1x1xf32>
    %755 = tpu.reciprocal %754 {approx = true} : vector<1x1xf32> -> vector<1x1xf32>
    %c3_i32 = arith.constant 3 : i32
    %756 = vector.broadcast %c3_i32 : i32 to vector<1x6xi32>
    %757 = arith.cmpi eq, %479, %756 : vector<1x6xi32>
    %758 = vector.shape_cast %749 : vector<1x1xi32> to vector<1x1xi32>
    %759 = vector.broadcast %758 : vector<1x1xi32> to vector<1x6xi32>
    %760 = arith.select %757, %759, %689 : vector<1x6xi1>, vector<1x6xi32>
    %c3_i32_134 = arith.constant 3 : i32
    %761 = vector.broadcast %c3_i32_134 : i32 to vector<1x6xi32>
    %762 = arith.cmpi eq, %479, %761 : vector<1x6xi32>
    %763 = vector.shape_cast %755 : vector<1x1xf32> to vector<1x1xf32>
    %764 = vector.broadcast %763 : vector<1x1xf32> to vector<1x6xf32>
    %765 = arith.select %762, %764, %694 : vector<1x6xi1>, vector<1x6xf32>
    %766 = vector.broadcast %749 : vector<1x1xi32> to vector<1x128xi32>
    %767 = arith.cmpi eq, %478, %766 : vector<1x128xi32>
    %768 = arith.extui %767 : vector<1x128xi1> to vector<1x128xi32>
    %769 = arith.sitofp %768 : vector<1x128xi32> to vector<1x128xf32>
    %770 = tpu.concatenate %769, %727 in 1 : vector<1x128xf32>, vector<1x32xf32> -> vector<1x160xf32>
    %cst_135 = arith.constant dense<0.000000e+00> : vector<1x192xf32>
    %771 = tpu.matmul %770, %471, %cst_135 {dimension_numbers = #tpu.dot_dimension_numbers<[1], [0], [0], [1], [0, 0, 1, 1], [], []>} : vector<1x160xf32>, vector<160x192xf32>, vector<1x192xf32> -> vector<1x192xf32>
    %772 = arith.addf %771, %472 : vector<1x192xf32>
    %773 = vector.extract_strided_slice %772 {offsets = [0, 0], sizes = [1, 32], strides = [1, 1]} : vector<1x192xf32> to vector<1x32xf32>
    %774 = vector.extract_strided_slice %772 {offsets = [0, 32], sizes = [1, 32], strides = [1, 1]} : vector<1x192xf32> to vector<1x32xf32>
    %775 = vector.extract_strided_slice %772 {offsets = [0, 64], sizes = [1, 32], strides = [1, 1]} : vector<1x192xf32> to vector<1x32xf32>
    %776 = vector.extract_strided_slice %772 {offsets = [0, 96], sizes = [1, 32], strides = [1, 1]} : vector<1x192xf32> to vector<1x32xf32>
    %777 = vector.extract_strided_slice %772 {offsets = [0, 128], sizes = [1, 32], strides = [1, 1]} : vector<1x192xf32> to vector<1x32xf32>
    %778 = vector.extract_strided_slice %772 {offsets = [0, 160], sizes = [1, 32], strides = [1, 1]} : vector<1x192xf32> to vector<1x32xf32>
    %779 = arith.addf %773, %776 : vector<1x32xf32>
    %780 = arith.negf %779 : vector<1x32xf32>
    %781 = math.exp %780 : vector<1x32xf32>
    %cst_136 = arith.constant 1.000000e+00 : f32
    %782 = vector.broadcast %cst_136 : f32 to vector<1x32xf32>
    %783 = arith.addf %782, %781 : vector<1x32xf32>
    %784 = arith.divf %782, %783 : vector<1x32xf32>
    %785 = arith.addf %774, %777 : vector<1x32xf32>
    %786 = arith.negf %785 : vector<1x32xf32>
    %787 = math.exp %786 : vector<1x32xf32>
    %cst_137 = arith.constant 1.000000e+00 : f32
    %788 = vector.broadcast %cst_137 : f32 to vector<1x32xf32>
    %789 = arith.addf %788, %787 : vector<1x32xf32>
    %790 = arith.divf %788, %789 : vector<1x32xf32>
    %791 = arith.mulf %784, %778 : vector<1x32xf32>
    %792 = arith.addf %775, %791 : vector<1x32xf32>
    %793 = math.tanh %792 : vector<1x32xf32>
    %cst_138 = arith.constant 1.000000e+00 : f32
    %794 = vector.broadcast %cst_138 : f32 to vector<1x32xf32>
    %795 = arith.subf %794, %790 : vector<1x32xf32>
    %796 = arith.mulf %795, %793 : vector<1x32xf32>
    %797 = arith.mulf %790, %727 : vector<1x32xf32>
    %798 = arith.addf %796, %797 : vector<1x32xf32>
    %cst_139 = arith.constant dense<0.000000e+00> : vector<1x8xf32>
    %799 = tpu.matmul %798, %470, %cst_139 {dimension_numbers = #tpu.dot_dimension_numbers<[1], [1], [0], [0], [0, 0, 1, 0], [], []>} : vector<1x32xf32>, vector<8x32xf32>, vector<1x8xf32> -> vector<1x8xf32>
    %cst_140 = arith.constant dense<0xFF800000> : vector<1xf32>
    %800 = vector.multi_reduction <maximumf>, %799, %cst_140 [1] : vector<1x8xf32> to vector<1xf32>
    %801 = vector.shape_cast %800 : vector<1xf32> to vector<1x1xf32>
    %802 = vector.broadcast %801 : vector<1x1xf32> to vector<1x8xf32>
    %803 = arith.subf %799, %802 : vector<1x8xf32>
    %804 = math.exp %803 : vector<1x8xf32>
    %cst_141 = arith.constant dense<0.000000e+00> : vector<1x32xf32>
    %805 = tpu.matmul %804, %470, %cst_141 {dimension_numbers = #tpu.dot_dimension_numbers<[1], [0], [0], [1], [0, 0, 1, 1], [], []>} : vector<1x8xf32>, vector<8x32xf32>, vector<1x32xf32> -> vector<1x32xf32>
    %cst_142 = arith.constant dense<0.000000e+00> : vector<1xf32>
    %806 = vector.multi_reduction <add>, %804, %cst_142 [1] : vector<1x8xf32> to vector<1xf32>
    %807 = vector.shape_cast %806 : vector<1xf32> to vector<1x1xf32>
    %808 = tpu.reciprocal %807 {approx = true} : vector<1x1xf32> -> vector<1x1xf32>
    %809 = vector.broadcast %808 : vector<1x1xf32> to vector<1x32xf32>
    %810 = arith.mulf %805, %809 : vector<1x32xf32>
    %811 = tpu.concatenate %798, %810 in 1 : vector<1x32xf32>, vector<1x32xf32> -> vector<1x64xf32>
    %cst_143 = arith.constant dense<0.000000e+00> : vector<1x32xf32>
    %812 = tpu.matmul %811, %473, %cst_143 {dimension_numbers = #tpu.dot_dimension_numbers<[1], [0], [0], [1], [0, 0, 1, 1], [], []>} : vector<1x64xf32>, vector<64x32xf32>, vector<1x32xf32> -> vector<1x32xf32>
    %813 = arith.addf %812, %474 : vector<1x32xf32>
    %814 = math.tanh %813 : vector<1x32xf32>
    %cst_144 = arith.constant dense<0.000000e+00> : vector<1x128xf32>
    %815 = tpu.matmul %814, %475, %cst_144 {dimension_numbers = #tpu.dot_dimension_numbers<[1], [0], [0], [1], [0, 0, 1, 1], [], []>} : vector<1x32xf32>, vector<32x128xf32>, vector<1x128xf32> -> vector<1x128xf32>
    %816 = arith.addf %815, %476 : vector<1x128xf32>
    %cst_145 = arith.constant dense<0xFF800000> : vector<1xf32>
    %817 = vector.multi_reduction <maximumf>, %816, %cst_145 [1] : vector<1x128xf32> to vector<1xf32>
    %818 = vector.shape_cast %817 : vector<1xf32> to vector<1x1xf32>
    %819 = tpu.reduce_index %816 {axis = 1 : i32, kind = #tpu.reduction_kind<arg_max>} : vector<1x128xf32> -> vector<1xi32>
    %820 = vector.shape_cast %819 : vector<1xi32> to vector<1x1xi32>
    %821 = vector.broadcast %818 : vector<1x1xf32> to vector<1x128xf32>
    %822 = arith.subf %816, %821 : vector<1x128xf32>
    %823 = math.exp %822 : vector<1x128xf32>
    %cst_146 = arith.constant dense<0.000000e+00> : vector<1xf32>
    %824 = vector.multi_reduction <add>, %823, %cst_146 [1] : vector<1x128xf32> to vector<1xf32>
    %825 = vector.shape_cast %824 : vector<1xf32> to vector<1x1xf32>
    %826 = tpu.reciprocal %825 {approx = true} : vector<1x1xf32> -> vector<1x1xf32>
    %c4_i32 = arith.constant 4 : i32
    %827 = vector.broadcast %c4_i32 : i32 to vector<1x6xi32>
    %828 = arith.cmpi eq, %479, %827 : vector<1x6xi32>
    %829 = vector.shape_cast %820 : vector<1x1xi32> to vector<1x1xi32>
    %830 = vector.broadcast %829 : vector<1x1xi32> to vector<1x6xi32>
    %831 = arith.select %828, %830, %760 : vector<1x6xi1>, vector<1x6xi32>
    %c4_i32_147 = arith.constant 4 : i32
    %832 = vector.broadcast %c4_i32_147 : i32 to vector<1x6xi32>
    %833 = arith.cmpi eq, %479, %832 : vector<1x6xi32>
    %834 = vector.shape_cast %826 : vector<1x1xf32> to vector<1x1xf32>
    %835 = vector.broadcast %834 : vector<1x1xf32> to vector<1x6xf32>
    %836 = arith.select %833, %835, %765 : vector<1x6xi1>, vector<1x6xf32>
    %837 = vector.broadcast %820 : vector<1x1xi32> to vector<1x128xi32>
    %838 = arith.cmpi eq, %478, %837 : vector<1x128xi32>
    %839 = arith.extui %838 : vector<1x128xi1> to vector<1x128xi32>
    %840 = arith.sitofp %839 : vector<1x128xi32> to vector<1x128xf32>
    %841 = tpu.concatenate %840, %798 in 1 : vector<1x128xf32>, vector<1x32xf32> -> vector<1x160xf32>
    %cst_148 = arith.constant dense<0.000000e+00> : vector<1x192xf32>
    %842 = tpu.matmul %841, %471, %cst_148 {dimension_numbers = #tpu.dot_dimension_numbers<[1], [0], [0], [1], [0, 0, 1, 1], [], []>} : vector<1x160xf32>, vector<160x192xf32>, vector<1x192xf32> -> vector<1x192xf32>
    %843 = arith.addf %842, %472 : vector<1x192xf32>
    %844 = vector.extract_strided_slice %843 {offsets = [0, 0], sizes = [1, 32], strides = [1, 1]} : vector<1x192xf32> to vector<1x32xf32>
    %845 = vector.extract_strided_slice %843 {offsets = [0, 32], sizes = [1, 32], strides = [1, 1]} : vector<1x192xf32> to vector<1x32xf32>
    %846 = vector.extract_strided_slice %843 {offsets = [0, 64], sizes = [1, 32], strides = [1, 1]} : vector<1x192xf32> to vector<1x32xf32>
    %847 = vector.extract_strided_slice %843 {offsets = [0, 96], sizes = [1, 32], strides = [1, 1]} : vector<1x192xf32> to vector<1x32xf32>
    %848 = vector.extract_strided_slice %843 {offsets = [0, 128], sizes = [1, 32], strides = [1, 1]} : vector<1x192xf32> to vector<1x32xf32>
    %849 = vector.extract_strided_slice %843 {offsets = [0, 160], sizes = [1, 32], strides = [1, 1]} : vector<1x192xf32> to vector<1x32xf32>
    %850 = arith.addf %844, %847 : vector<1x32xf32>
    %851 = arith.negf %850 : vector<1x32xf32>
    %852 = math.exp %851 : vector<1x32xf32>
    %cst_149 = arith.constant 1.000000e+00 : f32
    %853 = vector.broadcast %cst_149 : f32 to vector<1x32xf32>
    %854 = arith.addf %853, %852 : vector<1x32xf32>
    %855 = arith.divf %853, %854 : vector<1x32xf32>
    %856 = arith.addf %845, %848 : vector<1x32xf32>
    %857 = arith.negf %856 : vector<1x32xf32>
    %858 = math.exp %857 : vector<1x32xf32>
    %cst_150 = arith.constant 1.000000e+00 : f32
    %859 = vector.broadcast %cst_150 : f32 to vector<1x32xf32>
    %860 = arith.addf %859, %858 : vector<1x32xf32>
    %861 = arith.divf %859, %860 : vector<1x32xf32>
    %862 = arith.mulf %855, %849 : vector<1x32xf32>
    %863 = arith.addf %846, %862 : vector<1x32xf32>
    %864 = math.tanh %863 : vector<1x32xf32>
    %cst_151 = arith.constant 1.000000e+00 : f32
    %865 = vector.broadcast %cst_151 : f32 to vector<1x32xf32>
    %866 = arith.subf %865, %861 : vector<1x32xf32>
    %867 = arith.mulf %866, %864 : vector<1x32xf32>
    %868 = arith.mulf %861, %798 : vector<1x32xf32>
    %869 = arith.addf %867, %868 : vector<1x32xf32>
    %cst_152 = arith.constant dense<0.000000e+00> : vector<1x8xf32>
    %870 = tpu.matmul %869, %470, %cst_152 {dimension_numbers = #tpu.dot_dimension_numbers<[1], [1], [0], [0], [0, 0, 1, 0], [], []>} : vector<1x32xf32>, vector<8x32xf32>, vector<1x8xf32> -> vector<1x8xf32>
    %cst_153 = arith.constant dense<0xFF800000> : vector<1xf32>
    %871 = vector.multi_reduction <maximumf>, %870, %cst_153 [1] : vector<1x8xf32> to vector<1xf32>
    %872 = vector.shape_cast %871 : vector<1xf32> to vector<1x1xf32>
    %873 = vector.broadcast %872 : vector<1x1xf32> to vector<1x8xf32>
    %874 = arith.subf %870, %873 : vector<1x8xf32>
    %875 = math.exp %874 : vector<1x8xf32>
    %cst_154 = arith.constant dense<0.000000e+00> : vector<1x32xf32>
    %876 = tpu.matmul %875, %470, %cst_154 {dimension_numbers = #tpu.dot_dimension_numbers<[1], [0], [0], [1], [0, 0, 1, 1], [], []>} : vector<1x8xf32>, vector<8x32xf32>, vector<1x32xf32> -> vector<1x32xf32>
    %cst_155 = arith.constant dense<0.000000e+00> : vector<1xf32>
    %877 = vector.multi_reduction <add>, %875, %cst_155 [1] : vector<1x8xf32> to vector<1xf32>
    %878 = vector.shape_cast %877 : vector<1xf32> to vector<1x1xf32>
    %879 = tpu.reciprocal %878 {approx = true} : vector<1x1xf32> -> vector<1x1xf32>
    %880 = vector.broadcast %879 : vector<1x1xf32> to vector<1x32xf32>
    %881 = arith.mulf %876, %880 : vector<1x32xf32>
    %882 = tpu.concatenate %869, %881 in 1 : vector<1x32xf32>, vector<1x32xf32> -> vector<1x64xf32>
    %cst_156 = arith.constant dense<0.000000e+00> : vector<1x32xf32>
    %883 = tpu.matmul %882, %473, %cst_156 {dimension_numbers = #tpu.dot_dimension_numbers<[1], [0], [0], [1], [0, 0, 1, 1], [], []>} : vector<1x64xf32>, vector<64x32xf32>, vector<1x32xf32> -> vector<1x32xf32>
    %884 = arith.addf %883, %474 : vector<1x32xf32>
    %885 = math.tanh %884 : vector<1x32xf32>
    %cst_157 = arith.constant dense<0.000000e+00> : vector<1x128xf32>
    %886 = tpu.matmul %885, %475, %cst_157 {dimension_numbers = #tpu.dot_dimension_numbers<[1], [0], [0], [1], [0, 0, 1, 1], [], []>} : vector<1x32xf32>, vector<32x128xf32>, vector<1x128xf32> -> vector<1x128xf32>
    %887 = arith.addf %886, %476 : vector<1x128xf32>
    %cst_158 = arith.constant dense<0xFF800000> : vector<1xf32>
    %888 = vector.multi_reduction <maximumf>, %887, %cst_158 [1] : vector<1x128xf32> to vector<1xf32>
    %889 = vector.shape_cast %888 : vector<1xf32> to vector<1x1xf32>
    %890 = tpu.reduce_index %887 {axis = 1 : i32, kind = #tpu.reduction_kind<arg_max>} : vector<1x128xf32> -> vector<1xi32>
    %891 = vector.shape_cast %890 : vector<1xi32> to vector<1x1xi32>
    %892 = vector.broadcast %889 : vector<1x1xf32> to vector<1x128xf32>
    %893 = arith.subf %887, %892 : vector<1x128xf32>
    %894 = math.exp %893 : vector<1x128xf32>
    %cst_159 = arith.constant dense<0.000000e+00> : vector<1xf32>
    %895 = vector.multi_reduction <add>, %894, %cst_159 [1] : vector<1x128xf32> to vector<1xf32>
    %896 = vector.shape_cast %895 : vector<1xf32> to vector<1x1xf32>
    %897 = tpu.reciprocal %896 {approx = true} : vector<1x1xf32> -> vector<1x1xf32>
    %c5_i32 = arith.constant 5 : i32
    %898 = vector.broadcast %c5_i32 : i32 to vector<1x6xi32>
    %899 = arith.cmpi eq, %479, %898 : vector<1x6xi32>
    %900 = vector.shape_cast %891 : vector<1x1xi32> to vector<1x1xi32>
    %901 = vector.broadcast %900 : vector<1x1xi32> to vector<1x6xi32>
    %902 = arith.select %899, %901, %831 : vector<1x6xi1>, vector<1x6xi32>
    %c5_i32_160 = arith.constant 5 : i32
    %903 = vector.broadcast %c5_i32_160 : i32 to vector<1x6xi32>
    %904 = arith.cmpi eq, %479, %903 : vector<1x6xi32>
    %905 = vector.shape_cast %897 : vector<1x1xf32> to vector<1x1xf32>
    %906 = vector.broadcast %905 : vector<1x1xf32> to vector<1x6xf32>
    %907 = arith.select %904, %906, %836 : vector<1x6xi1>, vector<1x6xf32>
    %c0_161 = arith.constant 0 : index
    %c0_162 = arith.constant 0 : index
    %908 = vector.load %arg10[%c0_161, %c0_162] : memref<1x6xi32, #tpu.memory_space<vmem>>, vector<1x6xi32>
    tpu.vector_store %arg10[%c0_161, %c0_162], %902 {strides = array<i32>} : memref<1x6xi32, #tpu.memory_space<vmem>>, vector<1x6xi32>,
    %c0_163 = arith.constant 0 : index
    %c0_164 = arith.constant 0 : index
    %909 = vector.load %arg11[%c0_163, %c0_164] : memref<1x6xf32, #tpu.memory_space<vmem>>, vector<1x6xf32>
    tpu.vector_store %arg11[%c0_163, %c0_164], %907 {strides = array<i32>} : memref<1x6xf32, #tpu.memory_space<vmem>>, vector<1x6xf32>,
    return
  }
}

</mosaic_0001>

<bundles_post_ra>
// kernel: greedy_search.1
= control target key start
LH: loop header
LB: loop body
LE: loop exit
PB: predicated region body
PF: predicated region fallthrough
CT: control target
= control target key end

     0   :  { %17 = vsyncpa [#allocation4], 0  ;;  %s7058_s0 = inlined_call_operand.vmem [shape: s32[8], index: 0, kind: input, shape index: {}]   ;;  %s7059_s1 = inlined_call_operand.vmem [shape: f32[128,192], index: 1, kind: input, shape index: {}]   ;;  %s7060_s2 = inlined_call_operand.vmem [shape: f32[64,192], index: 2, kind: input, shape index: {}]   ;;  %s7061_s3 = inlined_call_operand.vmem [shape: f32[1,192], index: 3, kind: input, shape index: {}]   ;;  %s7062_s4 = inlined_call_operand.vmem [shape: f32[160,192], index: 4, kind: input, shape index: {}]   ;;  %s7063_s5 = inlined_call_operand.vmem [shape: f32[1,192], index: 5, kind: input, shape index: {}]   ;;  %s7064_s6 = inlined_call_operand.vmem [shape: f32[64,32], index: 6, kind: input, shape index: {}]   ;;  %s7065_s7 = inlined_call_operand.vmem [shape: f32[1,32], index: 7, kind: input, shape index: {}]   ;;  %s7066_s8 = inlined_call_operand.vmem [shape: f32[32,128], index: 8, kind: input, shape index: {}]   ;;  %s7067_s9 = inlined_call_operand.vmem [shape: f32[1,128], index: 9, kind: input, shape index: {}]   ;;  %s7068_s10 = inlined_call_operand.hbm [shape: s32[1,6], index: 10, kind: output, shape index: {0}]   ;;  %s7069_s11 = inlined_call_operand.hbm [shape: f32[1,6], index: 11, kind: output, shape index: {1}]  }
   0x1   :  { %18 = vsyncpa [#allocation3], 0 }
   0x2   :  { %19 = vsyncpa [#allocation7], 0  ;;  %s26_s19 = sshll.u32 %s7058_s0, 4  ;;  %s27_s19 = int_to_ptr.vmem [resolvable:$true] %s26_s19 }
   0x3   :  { %s5629_s20 = scalar_lea.vmem %s27_s19, 16  ;;  %p5634_p1 = scmp.lt.s32.totalorder %s27_s19, %s27_s19 }
   0x4   :  { %p5630_p0 = scmp.ne.s32.totalorder %s27_s19, %s5629_s20  ;;  %p5635_p2 = scmp.lt.s32.totalorder %s5629_s20, %s5629_s20 }
   0x6   :  { %p5636_p3 = por %p5635_p2, %p5634_p1 }
   0x8   :  { %p5637_p4 = pnand %p5636_p3, %p5630_p0 }
   0xa   :  { %5640 = shalt.err (!%p5637_p4)
}
   0xb   :  { %s5691_s21 = smov [#allocation2]  }
   0xc   :  { %29 = dma.vmem_to_smem %s27_s19, 16, %s5691_s21, [#allocation4]  }
   0xd   :  { %5685 = dma.done.wait [#allocation4], 16  }
   0xe   :  { %5686 = vsyncadd [#allocation4], 4294967280 }
   0xf   :  { %51 = sfence }
  0x10   :  { %v133_v0 = vld [vmem:[%s7060_s2 + $0x8] sm:$0xff]  ;;  %v135_v1 = vld [vmem:[%s7060_s2 + $0x18] sm:$0xff]  ;;  %v132_v2 = vld [vmem:[%s7060_s2] sm:$0xff]  ;;  %v5692_v7 = vmov 0.0   ;;  %v150_v25 = vlaneseq  ;;  %v5693_v27 = vmov 1966171168  }
  0x11   :  { %v5774_v3 = vpack.c.bf16 %v135_v1, %v133_v0  ;;  %v134_v4 = vld [vmem:[%s7060_s2 + $0x10] sm:$0xff]  ;;  %v137_v5 = vld [vmem:[%s7060_s2 + $0x28] sm:$0xff]  ;;  %v139_v6 = vld [vmem:[%s7060_s2 + $0x38] sm:$0xff]  ;;  %228 = vmatprep.mubr.f32.mxu0 %v5692_v7  ;;  %410 = vmatprep.mubr.f32.mxu1 %v5692_v7  ;;  %v244_v28 = vunpack.c.l.s4 %v5693_v27  ;;  %s52_s15 = sld [smem:[#allocation2]]  ;;  %s4440_s16 = sld [smem:[#allocation2 + $0x7]]  ;;  %vm341_vm0 = vcmask 261120  }
  0x12   :  { %v5787_v8 = vpack.c.bf16 %v134_v4, %v132_v2  ;;  %v5789_v9 = vpack.c.bf16 %v139_v6, %v137_v5  ;;  %v136_v10 = vld [vmem:[%s7060_s2 + $0x20] sm:$0xff]  ;;  %v138_v11 = vld [vmem:[%s7060_s2 + $0x30] sm:$0xff]  ;;  %v141_v12 = vld [vmem:[%s7060_s2 + $0x48] sm:$0xff]  ;;  %v5860_v26 = vshrl.u32 %v150_v25, 7  ;;  %s5695_s30 = smov 32   ;;  %s5696_s12 = smov 96  }
  0x13   :  { %4891 = vmatprep.subr.bf16.mxu0 %v5774_v3  ;;  %v143_v13 = vld [vmem:[%s7060_s2 + $0x58] sm:$0xff]  ;;  %4907 = vmatprep.subr.bf16.mxu1 %v5774_v3  ;;  %v5806_v14 = vpack.c.bf16 %v138_v11, %v136_v10  ;;  %v140_v16 = vld [vmem:[%s7060_s2 + $0x40] sm:$0xff]  ;;  %v142_v17 = vld [vmem:[%s7060_s2 + $0x50] sm:$0xff]  ;;  %v245_v32 = vunpack.c.0.s8 %v244_v28  ;;  %vm160_vm1 = vcmask 523264   ;;  %s4437_s13 = sld [smem:[#allocation2 + $0x6]]  ;;  %s4434_s28 = sld [smem:[#allocation2 + $0x5]] }
  0x14   :  { %4893 = vmatpush1.bf16.msra.mxu0 %v5787_v8  ;;  %4909 = vmatpush1.bf16.msra.mxu1 %v5787_v8  ;;  %v5810_v15 = vpack.c.bf16 %v143_v13, %v141_v12  ;;  %v145_v18 = vld [vmem:[%s7060_s2 + $0x68] sm:$0xff]  ;;  %v147_v19 = vld [vmem:[%s7060_s2 + $0x78] sm:$0xff]  ;;  %v5826_v20 = vpack.c.bf16 %v142_v17, %v140_v16  ;;  %v144_v22 = vld [vmem:[%s7060_s2 + $0x60] sm:$0xff]  ;;  %v5863_v29 = vsub.s32 0, %v5860_v26  ;;  %v156_v31 = vsub.s32 1, %v5860_v26 }
  0x15   :  { %4895 = vmatprep.subr.bf16.mxu0 %v5789_v9  ;;  %4911 = vmatprep.subr.bf16.mxu1 %v5789_v9  ;;  %v5830_v21 = vpack.c.bf16 %v147_v19, %v145_v18  ;;  %v146_v23 = vld [vmem:[%s7060_s2 + $0x70] sm:$0xff]  ;;  %v148_v30 = vld [vmem:[%s7061_s3] sm:$0x3]  ;;  %v5877_v35 = vsub.s32 %v245_v32, %v5860_v26  ;;  %s5694_s3 = smov 64   ;;  %vm1605_vm2 = vcmask 1040384   ;;  %vm1607_vm3 = vcmask 1041408  }
  0x16   :  { %v5840_v24 = vpack.c.bf16 %v146_v23, %v144_v22  ;;  %v5870_v33 = vrot.slane %v148_v30, %v5863_v29  ;;  %v5874_v34 = vrot.slane %v148_v30, %v156_v31  ;;  %vm1609_vm4 = vcmask 1042432  }
  0x17   :  { %s53_s17 = sshra.s32 %s52_s15, 3  ;;  %s56_s18 = sand.u32 7, %s52_s15  ;;  %vm1611_vm5 = vcmask 1043456   ;;  %vm1613_vm6 = vcmask 1044480   ;;  %vm1615_vm7 = vcmask 1045504   ;;  %vm1617_vm8 = vcmask 1046528  }
  0x18   :  { %4897 = vmatpush1.bf16.msra.mxu0 %v5806_v14  ;;  %4913 = vmatpush1.bf16.msra.mxu1 %v5806_v14  ;;  %s4534_s19 = sshll.u32 %s53_s17, 4  ;;  %s123_s20 = sshra.s32 %s4440_s16, 3  ;;  %vm5698_vm10 = vmmov 0   ;;  %vm1904_vm11 = vcmask 57344   ;;  %vm1912_vm12 = vcmask 64512  }
  0x19   :  { %4899 = vmatprep.subr.bf16.mxu0 %v5810_v15  ;;  %4915 = vmatprep.subr.bf16.mxu1 %v5810_v15  ;;  %s59_s21 = sadd.s32 %s4534_s19, %s56_s18  ;;  %s126_s22 = sand.u32 7, %s4440_s16 }
  0x1a   :  { %s4541_s23 = sshll.u32 %s123_s20, 4  ;;  %s5890_s0 = scalar_lea.vmem %s7059_s1, %s59_s21 }
  0x1b   :  { %s129_s26 = sadd.s32 %s4541_s23, %s126_s22  ;;  %v61_v44 = vld [vmem:[%s5890_s0] ss:$8 sm:$0x3]  ;;  %s113_s2 = sshra.s32 %s4437_s13, 3 }
  0x1c   :  { %4901 = vmatpush1.bf16.msra.mxu0 %v5826_v20  ;;  %4917 = vmatpush1.bf16.msra.mxu1 %v5826_v20  ;;  %s5896_s29 = scalar_lea.vmem %s7059_s1, %s129_s26  ;;  %s116_s14 = sand.u32 7, %s4437_s13 }
  0x1d   :  { %4903 = vmatprep.subr.bf16.mxu0 %v5830_v21  ;;  %4919 = vmatprep.subr.bf16.mxu1 %v5830_v21  ;;  %v131_v46 = vld [vmem:[%s5896_s29] ss:$8 sm:$0x3]  ;;  %s4540_s15 = sshll.u32 %s113_s2, 4  ;;  %s4422_s20 = sld [smem:[#allocation2 + $0x1]] }
  0x1e   :  { %v283_v60 = vrot.slane %v131_v46, 1  ;;  %s119_s16 = sadd.s32 %s4540_s15, %s116_s14  ;;  %s103_s13 = sshra.s32 %s4434_s28, 3 }
  0x1f   :  { %s120_s19 = scalar_lea.vmem %s7059_s1, %s119_s16  ;;  %s106_s2 = sand.u32 7, %s4434_s28 }
  0x20   :  { %4905 = vmatpush1.bf16.msra.mxu0 %v5840_v24  ;;  %4921 = vmatpush1.bf16.msra.mxu1 %v5840_v24  ;;  %s4539_s14 = sshll.u32 %s103_s13, 4 }
  0x21   :  { %4923 = vmatprep.subr.bf16.mxu0 %v5774_v3  ;;  %4939 = vmatprep.subr.bf16.mxu1 %v5774_v3  ;;  %s109_s15 = sadd.s32 %s4539_s14, %s106_s2 }
  0x22   :  { %s110_s18 = scalar_lea.vmem %s7059_s1, %s109_s15 }
  0x23   :  { %229 = vmatmul.mubr.f32.vlgmr.msra.gmra.mrb[0].mxu0 %v5692_v7  ;;  %s63_s21 = sshra.s32 %s4422_s20, 3  ;;  %s66_s22 = sand.u32 7, %s4422_s20 }
  0x24   :  { %4925 = vmatpush1.bf16.msra.mxu0 %v5787_v8  ;;  %591 = vmatprep.mubr.f32.mxu0 %v5692_v7  ;;  %s4535_s23 = sshll.u32 %s63_s21, 4 }
  0x25   :  { %4927 = vmatprep.subr.bf16.mxu0 %v5789_v9  ;;  %s69_s24 = sadd.s32 %s4535_s23, %s66_s22 }
  0x26   :  { %s70_s27 = scalar_lea.vmem %s7059_s1, %s69_s24 }
  0x28   :  { %4929 = vmatpush1.bf16.msra.mxu0 %v5806_v14 }
  0x29   :  { %4931 = vmatprep.subr.bf16.mxu0 %v5810_v15 }
  0x2c   :  { %4933 = vmatpush1.bf16.msra.mxu0 %v5826_v20 }
  0x2d   :  { %4935 = vmatprep.subr.bf16.mxu0 %v5830_v21 }
  0x30   :  { %4937 = vmatpush1.bf16.msra.mxu0 %v5840_v24 }
  0x31   :  { %4955 = vmatprep.subr.bf16.mxu0 %v5774_v3 }
  0xf6   :  { %v230_v36 = vpop.f32.mrb[0].mxu0 }
  0xf7   :  { %v231_v37 = vadd.f32 %v230_v36, %v5870_v33  ;;  %v232_v38 = vpop.f32.mrb[1].mxu0 }
  0xf8   :  { %v233_v39 = vadd.f32 %v232_v38, %v5874_v34 }
  0xf9   :  { %v249_v40 = vrot.slane %v231_v37, %v5877_v35  ;;  %v235_v45 = vadd.f32 %v231_v37, %v61_v44  ;;  %v275_v48 = vadd.f32 %v231_v37, %v131_v46 }
  0xfa   :  { %v299_v41 = vrot.slane %v233_v39, %v5877_v35  ;;  %v285_v61 = vadd.f32 %v283_v60, %v233_v39 }
  0xfb   :  { %v256_v42 = vrot.slane %v249_v40, %v5877_v35  ;;  %v4443_v47 = vmul.f32 -1.442695, %v235_v45  ;;  %v4444_v49 = vmul.f32 -1.442695, %v275_v48 }
  0xfc   :  { %v306_v43 = vrot.slane %v299_v41, %v5877_v35  ;;  %v4445_v62 = vmul.f32 -1.442695, %v285_v61  ;;  %v5938_v48 = vld [vmem:[%s120_s19] ss:$8 sm:$0x3]  ;;  %s4425_s19 = sld [smem:[#allocation2 + $0x2]] }
  0xfd   :  { %257 = vrot.lane.b32.xlu0 %v256_v42, %s5694_s3  ;;  %5377 = vpow2.f32 %v4443_v47 }
  0xfe   :  { %5379 = vpow2.f32 %v4444_v49  ;;  %v5945_v49 = vld [vmem:[%s70_s27] ss:$8 sm:$0x3]  ;;  %s4431_s27 = sld [smem:[#allocation2 + $0x4]] }
 0x101   :  { %307 = vrot.lane.b32.xlu0 %v306_v43, %s5694_s3 }
 0x102   :  { %s73_s20 = sshra.s32 %s4425_s19, 3  ;;  %s76_s21 = sand.u32 7, %s4425_s19 }
 0x103   :  { %s4536_s22 = sshll.u32 %s73_s20, 4 }
 0x104   :  { %s79_s23 = sadd.s32 %s4536_s22, %s76_s21  ;;  %s93_s28 = sshra.s32 %s4431_s27, 3 }
 0x105   :  { %s80_s26 = scalar_lea.vmem %s7059_s1, %s79_s23  ;;  %s96_s13 = sand.u32 7, %s4431_s27 }
 0x106   :  { %s4538_s2 = sshll.u32 %s93_s28, 4 }
 0x107   :  { %v5378_v50 = vpop.eup %5377  ;;  %s99_s14 = sadd.s32 %s4538_s2, %s96_s13 }
 0x108   :  { %v239_v51 = vadd.f32 1.0, %v5378_v50  ;;  %v5380_v52 = vpop.eup %5379  ;;  %s100_s17 = scalar_lea.vmem %s7059_s1, %s99_s14 }
 0x109   :  { %v279_v53 = vadd.f32 1.0, %v5380_v52 }
 0x10a   :  { %5381 = vrcp.f32 %v239_v51 }
 0x10b   :  { %5383 = vrcp.f32 %v279_v53 }
 0x10c   :  { %5385 = vpow2.f32 %v4445_v62 }
 0x114   :  { %v5382_v54 = vpop.eup %5381 }
 0x115   :  { %v5384_v57 = vpop.eup %5383  ;;  %v267_v23 = vsub.f32 1.0, %v5382_v54  ;;  %v273_v28 = vmul.f32 0.0, %v5382_v54 }
 0x116   :  { %v5386_v63 = vpop.eup %5385 }
 0x117   :  { %v289_v1 = vadd.f32 1.0, %v5386_v63 }
 0x16f   :  { %v258_v55 = vpop.permute.xlu0 %257 }
 0x170   :  { %v260_v56 = vmul.f32 %v5382_v54, %v258_v55 }
 0x172   :  { %262 = vrot.lane.b32.xlu1 %v260_v56, %s5694_s3 }
 0x173   :  { %v308_v58 = vpop.permute.xlu0 %307 }
 0x174   :  { %v310_v59 = vmul.f32 %v5384_v57, %v308_v58 }
 0x176   :  { %316 = vrot.lane.b32.xlu0 %v310_v59, %s5695_s30  ;;  %311 = vrot.lane.b32.xlu1 %v131_v46, %s5696_s12 }
 0x1e4   :  { %v263_v0 = vpop.permute.xlu1 %262 }
 0x1e5   :  { %v265_v2 = vadd.f32 %v263_v0, %v61_v44  ;;  %v465_v0 = vrot.slane %v5938_v48, 1 }
 0x1e7   :  { %5387 = vtanh.f32 %v265_v2 }
 0x1e8   :  { %v312_v4 = vpop.permute.xlu1 %311  ;;  %5389 = vrcp.f32 %v289_v1  ;;  %v317_v6 = vpop.permute.xlu0 %316 }
 0x1e9   :  { %v313_v5 = vrot.slane %v312_v4, 1 }
 0x1eb   :  { %v319_v10 = vadd.f32 %v317_v6, %v313_v5 }
 0x1ed   :  { %5391 = vtanh.f32 %v319_v10 }
 0x1f1   :  { %v5388_v11 = vpop.eup %5387 }
 0x1f2   :  { %269 = vrot.lane.b32.xlu1 %v5388_v11, %s5696_s12  ;;  %v5390_v12 = vpop.eup %5389 }
 0x1f3   :  { %v321_v13 = vsub.f32 1.0, %v5390_v12  ;;  %v323_v18 = vmul.f32 0.0, %v5390_v12 }
 0x1f7   :  { %v5392_v16 = vpop.eup %5391 }
 0x1f8   :  { %v322_v17 = vmul.f32 %v5392_v16, %v321_v13 }
 0x1fa   :  { %v5903_v19 = vadd.f32 %v323_v18, %v322_v17 }
 0x1fc   :  { %v5907_v22 = vrot.slane %v5903_v19, %v5863_v29 }
 0x1fe   :  { %338 = vrot.lane.b32.xlu1 %v5907_v22, %s5695_s30 }
 0x264   :  { %v270_v27 = vpop.permute.xlu1 %269 }
 0x265   :  { %v272_v30 = vmul.f32 %v270_v27, %v267_v23 }
 0x267   :  { %v5911_v32 = vadd.f32 %v273_v28, %v272_v30 }
 0x269   :  { %v329_v36 = vrot.slane %v5911_v32, %v5863_v29 }
 0x26b   :  { %330 = vrot.lane.b32.xlu0 %v329_v36, %s5696_s12 }
 0x270   :  { %v339_v37 = vpop.permute.xlu1 %338 }
 0x2dd   :  { %v331_v38 = vpop.permute.xlu0 %330 }
 0x2de   :  { %v342_v39 = vsel %vm341_vm0, %v331_v38, %v339_v37 }
 0x2df   :  { %4446 = vmatmul.mubr.msk.f32.vlgmr.msra.gmra.mrb[0].mxu1 %vm160_vm1, %v342_v39 }
 0x2e0   :  { %4941 = vmatpush1.bf16.msra.mxu1 %v5787_v8  ;;  %772 = vmatprep.mubr.f32.mxu1 %v5692_v7 }
 0x2e1   :  { %4943 = vmatprep.subr.bf16.mxu1 %v5789_v9 }
 0x2e4   :  { %4945 = vmatpush1.bf16.msra.mxu1 %v5806_v14 }
 0x2e5   :  { %4947 = vmatprep.subr.bf16.mxu1 %v5810_v15 }
 0x2e8   :  { %4949 = vmatpush1.bf16.msra.mxu1 %v5826_v20 }
 0x2e9   :  { %4951 = vmatprep.subr.bf16.mxu1 %v5830_v21 }
 0x2ec   :  { %4953 = vmatpush1.bf16.msra.mxu1 %v5840_v24 }
 0x2ed   :  { %4971 = vmatprep.subr.bf16.mxu1 %v5774_v3 }
 0x3b2   :  { %v412_v40 = vpop.f32.mrb[0].mxu1 }
 0x3b3   :  { %v413_v41 = vadd.f32 %v412_v40, %v5870_v33  ;;  %v414_v42 = vpop.f32.mrb[1].mxu1 }
 0x3b4   :  { %v415_v43 = vadd.f32 %v414_v42, %v5874_v34 }
 0x3b5   :  { %v431_v44 = vrot.slane %v413_v41, %v5877_v35  ;;  %v417_v50 = vadd.f32 %v413_v41, %v5945_v49  ;;  %v457_v52 = vadd.f32 %v413_v41, %v5938_v48 }
 0x3b6   :  { %v481_v45 = vrot.slane %v415_v43, %v5877_v35  ;;  %v467_v1 = vadd.f32 %v465_v0, %v415_v43 }
 0x3b7   :  { %v438_v46 = vrot.slane %v431_v44, %v5877_v35  ;;  %v4447_v51 = vmul.f32 -1.442695, %v417_v50  ;;  %v4448_v53 = vmul.f32 -1.442695, %v457_v52 }
 0x3b8   :  { %v488_v47 = vrot.slane %v481_v45, %v5877_v35  ;;  %v4449_v2 = vmul.f32 -1.442695, %v467_v1 }
 0x3b9   :  { %439 = vrot.lane.b32.xlu0 %v438_v46, %s5694_s3  ;;  %5393 = vpow2.f32 %v4447_v51 }
 0x3ba   :  { %489 = vrot.lane.b32.xlu1 %v488_v47, %s5694_s3  ;;  %5395 = vpow2.f32 %v4448_v53 }
 0x3be   :  { %493 = vrot.lane.b32.xlu1 %v5938_v48, %s5696_s12 }
 0x3c3   :  { %v5394_v54 = vpop.eup %5393 }
 0x3c4   :  { %v421_v55 = vadd.f32 1.0, %v5394_v54  ;;  %v5396_v56 = vpop.eup %5395 }
 0x3c5   :  { %v461_v57 = vadd.f32 1.0, %v5396_v56  ;;  %v5994_v56 = vld [vmem:[%s110_s18] ss:$8 sm:$0x3]  ;;  %s4428_s18 = sld [smem:[#allocation2 + $0x3]] }
 0x3c6   :  { %5397 = vrcp.f32 %v421_v55 }
 0x3c7   :  { %5399 = vrcp.f32 %v461_v57  ;;  %v6001_v57 = vld [vmem:[%s80_s26] ss:$8 sm:$0x3] }
 0x3c8   :  { %5401 = vpow2.f32 %v4449_v2 }
 0x3cb   :  { %s83_s19 = sshra.s32 %s4428_s18, 3  ;;  %s86_s20 = sand.u32 7, %s4428_s18 }
 0x3cc   :  { %s4537_s21 = sshll.u32 %s83_s19, 4 }
 0x3cd   :  { %s89_s22 = sadd.s32 %s4537_s21, %s86_s20 }
 0x3ce   :  { %s90_s25 = scalar_lea.vmem %s7059_s1, %s89_s22 }
 0x3d0   :  { %v5398_v58 = vpop.eup %5397 }
 0x3d1   :  { %v5400_v62 = vpop.eup %5399  ;;  %v449_v38 = vsub.f32 1.0, %v5398_v58  ;;  %v455_v40 = vmul.f32 %v5398_v58, %v5911_v32 }
 0x3d2   :  { %v5402_v4 = vpop.eup %5401 }
 0x3d3   :  { %v471_v5 = vadd.f32 1.0, %v5402_v4 }
 0x3d5   :  { %5403 = vrcp.f32 %v471_v5 }
 0x3df   :  { %v5404_v17 = vpop.eup %5403 }
 0x3e0   :  { %v503_v23 = vsub.f32 1.0, %v5404_v17  ;;  %v505_v30 = vmul.f32 %v5404_v17, %v5903_v19 }
 0x42b   :  { %v440_v59 = vpop.permute.xlu0 %439 }
 0x42c   :  { %v442_v60 = vmul.f32 %v5398_v58, %v440_v59  ;;  %v490_v61 = vpop.permute.xlu1 %489 }
 0x42d   :  { %v492_v63 = vmul.f32 %v5400_v62, %v490_v61 }
 0x42e   :  { %444 = vrot.lane.b32.xlu0 %v442_v60, %s5694_s3 }
 0x430   :  { %v494_v6 = vpop.permute.xlu1 %493 }
 0x431   :  { %v495_v12 = vrot.slane %v494_v6, 1 }
 0x432   :  { %498 = vrot.lane.b32.xlu0 %v492_v63, %s5695_s30 }
 0x4a0   :  { %v445_v10 = vpop.permute.xlu0 %444 }
 0x4a1   :  { %v447_v11 = vadd.f32 %v445_v10, %v5945_v49 }
 0x4a3   :  { %5405 = vtanh.f32 %v447_v11 }
 0x4a4   :  { %v499_v13 = vpop.permute.xlu0 %498 }
 0x4a5   :  { %v501_v16 = vadd.f32 %v499_v13, %v495_v12  ;;  %v646_v12 = vrot.slane %v5994_v56, 1 }
 0x4a7   :  { %5407 = vtanh.f32 %v501_v16 }
 0x4ad   :  { %v5406_v18 = vpop.eup %5405 }
 0x4ae   :  { %451 = vrot.lane.b32.xlu1 %v5406_v18, %s5696_s12 }
 0x4b1   :  { %v5408_v27 = vpop.eup %5407 }
 0x4b2   :  { %v504_v28 = vmul.f32 %v5408_v27, %v503_v23 }
 0x4b4   :  { %v5955_v36 = vadd.f32 %v505_v30, %v504_v28 }
 0x4b6   :  { %v5959_v37 = vrot.slane %v5955_v36, %v5863_v29 }
 0x4b8   :  { %520 = vrot.lane.b32.xlu1 %v5959_v37, %s5695_s30 }
 0x520   :  { %v452_v39 = vpop.permute.xlu1 %451 }
 0x521   :  { %v454_v41 = vmul.f32 %v452_v39, %v449_v38 }
 0x523   :  { %v5964_v42 = vadd.f32 %v455_v40, %v454_v41 }
 0x525   :  { %v5968_v43 = vrot.slane %v5964_v42, %v5863_v29 }
 0x527   :  { %512 = vrot.lane.b32.xlu0 %v5968_v43, %s5696_s12 }
 0x52a   :  { %v521_v19 = vpop.permute.xlu1 %520 }
 0x599   :  { %v513_v44 = vpop.permute.xlu0 %512 }
 0x59a   :  { %v523_v45 = vsel %vm341_vm0, %v513_v44, %v521_v19 }
 0x59b   :  { %4450 = vmatmul.mubr.msk.f32.vlgmr.msra.gmra.mrb[2].mxu0 %vm160_vm1, %v523_v45 }
 0x59c   :  { %4957 = vmatpush1.bf16.msra.mxu0 %v5787_v8  ;;  %953 = vmatprep.mubr.f32.mxu0 %v5692_v7 }
 0x59d   :  { %4959 = vmatprep.subr.bf16.mxu0 %v5789_v9 }
 0x5a0   :  { %4961 = vmatpush1.bf16.msra.mxu0 %v5806_v14 }
 0x5a1   :  { %4963 = vmatprep.subr.bf16.mxu0 %v5810_v15 }
 0x5a4   :  { %4965 = vmatpush1.bf16.msra.mxu0 %v5826_v20 }
 0x5a5   :  { %4967 = vmatprep.subr.bf16.mxu0 %v5830_v21 }
 0x5a8   :  { %4969 = vmatpush1.bf16.msra.mxu0 %v5840_v24 }
 0x5a9   :  { %4987 = vmatprep.subr.bf16.mxu0 %v5774_v3 }
 0x66e   :  { %v593_v46 = vpop.f32.mrb[2].mxu0 }
 0x66f   :  { %v594_v47 = vadd.f32 %v593_v46, %v5870_v33  ;;  %v595_v50 = vpop.f32.mrb[3].mxu0 }
 0x670   :  { %v596_v51 = vadd.f32 %v595_v50, %v5874_v34 }
 0x671   :  { %v612_v52 = vrot.slane %v594_v47, %v5877_v35  ;;  %v598_v58 = vadd.f32 %v594_v47, %v6001_v57  ;;  %v638_v60 = vadd.f32 %v594_v47, %v5994_v56 }
 0x672   :  { %v662_v53 = vrot.slane %v596_v51, %v5877_v35  ;;  %v648_v13 = vadd.f32 %v646_v12, %v596_v51 }
 0x673   :  { %v619_v54 = vrot.slane %v612_v52, %v5877_v35  ;;  %v4451_v59 = vmul.f32 -1.442695, %v598_v58  ;;  %v4452_v61 = vmul.f32 -1.442695, %v638_v60  ;;  %v1606_v58 = vsel %vm1605_vm2, %v5911_v32, %v5968_v43 }
 0x674   :  { %v669_v55 = vrot.slane %v662_v53, %v5877_v35  ;;  %v4453_v16 = vmul.f32 -1.442695, %v648_v13 }
 0x675   :  { %620 = vrot.lane.b32.xlu0 %v619_v54, %s5694_s3  ;;  %5409 = vpow2.f32 %v4451_v59 }
 0x676   :  { %670 = vrot.lane.b32.xlu1 %v669_v55, %s5694_s3  ;;  %5411 = vpow2.f32 %v4452_v61 }
 0x67a   :  { %674 = vrot.lane.b32.xlu1 %v5994_v56, %s5696_s12 }
 0x67f   :  { %v5410_v62 = vpop.eup %5409 }
 0x680   :  { %v602_v63 = vadd.f32 1.0, %v5410_v62  ;;  %v5412_v0 = vpop.eup %5411 }
 0x681   :  { %v642_v1 = vadd.f32 1.0, %v5412_v0 }
 0x682   :  { %5413 = vrcp.f32 %v602_v63 }
 0x683   :  { %5415 = vrcp.f32 %v642_v1 }
 0x684   :  { %5417 = vpow2.f32 %v4453_v16 }
 0x68c   :  { %v5414_v2 = vpop.eup %5413 }
 0x68d   :  { %v5416_v10 = vpop.eup %5415  ;;  %v630_v51 = vsub.f32 1.0, %v5414_v2  ;;  %v636_v53 = vmul.f32 %v5414_v2, %v5964_v42 }
 0x68e   :  { %v5418_v17 = vpop.eup %5417 }
 0x68f   :  { %v652_v18 = vadd.f32 1.0, %v5418_v17 }
 0x691   :  { %5419 = vrcp.f32 %v652_v18 }
 0x69b   :  { %v5420_v40 = vpop.eup %5419 }
 0x69c   :  { %v684_v19 = vsub.f32 1.0, %v5420_v40  ;;  %v686_v46 = vmul.f32 %v5420_v40, %v5955_v36 }
 0x6e7   :  { %v621_v4 = vpop.permute.xlu0 %620 }
 0x6e8   :  { %v623_v5 = vmul.f32 %v5414_v2, %v621_v4  ;;  %v671_v6 = vpop.permute.xlu1 %670 }
 0x6e9   :  { %v673_v11 = vmul.f32 %v5416_v10, %v671_v6 }
 0x6ea   :  { %625 = vrot.lane.b32.xlu0 %v623_v5, %s5694_s3  ;;  %v6060_v5 = vld [vmem:[%s90_s25] ss:$8 sm:$0x3] }
 0x6ec   :  { %v675_v23 = vpop.permute.xlu1 %674 }
 0x6ed   :  { %v676_v30 = vrot.slane %v675_v23, 1 }
 0x6ee   :  { %679 = vrot.lane.b32.xlu0 %v673_v11, %s5695_s30 }
 0x75c   :  { %v626_v27 = vpop.permute.xlu0 %625 }
 0x75d   :  { %v628_v28 = vadd.f32 %v626_v27, %v6001_v57 }
 0x75f   :  { %5421 = vtanh.f32 %v628_v28 }
 0x760   :  { %v680_v38 = vpop.permute.xlu0 %679 }
 0x761   :  { %v682_v39 = vadd.f32 %v680_v38, %v676_v30 }
 0x763   :  { %5423 = vtanh.f32 %v682_v39 }
 0x769   :  { %v5422_v41 = vpop.eup %5421 }
 0x76a   :  { %632 = vrot.lane.b32.xlu1 %v5422_v41, %s5696_s12 }
 0x76d   :  { %v5424_v44 = vpop.eup %5423 }
 0x76e   :  { %v685_v45 = vmul.f32 %v5424_v44, %v684_v19 }
 0x770   :  { %v6011_v47 = vadd.f32 %v686_v46, %v685_v45 }
 0x772   :  { %v6015_v50 = vrot.slane %v6011_v47, %v5863_v29 }
 0x774   :  { %701 = vrot.lane.b32.xlu1 %v6015_v50, %s5695_s30 }
 0x7dc   :  { %v633_v52 = vpop.permute.xlu1 %632 }
 0x7dd   :  { %v635_v54 = vmul.f32 %v633_v52, %v630_v51 }
 0x7df   :  { %v6020_v55 = vadd.f32 %v636_v53, %v635_v54 }
 0x7e1   :  { %v692_v36 = vrot.slane %v6020_v55, %v5863_v29 }
 0x7e3   :  { %693 = vrot.lane.b32.xlu0 %v692_v36, %s5696_s12  ;;  %v6029_v59 = vsel %vm1607_vm3, %v1606_v58, %v692_v36 }
 0x7e6   :  { %v702_v60 = vpop.permute.xlu1 %701 }
 0x855   :  { %v694_v61 = vpop.permute.xlu0 %693 }
 0x856   :  { %v704_v42 = vsel %vm341_vm0, %v694_v61, %v702_v60 }
 0x857   :  { %4454 = vmatmul.mubr.msk.f32.vlgmr.msra.gmra.mrb[2].mxu1 %vm160_vm1, %v704_v42 }
 0x858   :  { %4973 = vmatpush1.bf16.msra.mxu1 %v5787_v8  ;;  %1134 = vmatprep.mubr.f32.mxu1 %v5692_v7 }
 0x859   :  { %4975 = vmatprep.subr.bf16.mxu1 %v5789_v9 }
 0x85c   :  { %4977 = vmatpush1.bf16.msra.mxu1 %v5806_v14 }
 0x85d   :  { %4979 = vmatprep.subr.bf16.mxu1 %v5810_v15 }
 0x860   :  { %4981 = vmatpush1.bf16.msra.mxu1 %v5826_v20 }
 0x861   :  { %4983 = vmatprep.subr.bf16.mxu1 %v5830_v21 }
 0x864   :  { %4985 = vmatpush1.bf16.msra.mxu1 %v5840_v24 }
 0x865   :  { %5003 = vmatprep.subr.bf16.mxu1 %v5774_v3  ;;  %v6053_v3 = vld [vmem:[%s100_s17] ss:$8 sm:$0x3] }
 0x866   :  { %v827_v40 = vrot.slane %v6053_v3, 1 }
 0x92a   :  { %v774_v32 = vpop.f32.mrb[2].mxu1 }
 0x92b   :  { %v775_v43 = vadd.f32 %v774_v32, %v5870_v33  ;;  %v776_v62 = vpop.f32.mrb[3].mxu1 }
 0x92c   :  { %v777_v63 = vadd.f32 %v776_v62, %v5874_v34 }
 0x92d   :  { %v793_v0 = vrot.slane %v775_v43, %v5877_v35  ;;  %v779_v6 = vadd.f32 %v775_v43, %v6060_v5  ;;  %v819_v11 = vadd.f32 %v775_v43, %v6053_v3 }
 0x92e   :  { %v843_v1 = vrot.slane %v777_v63, %v5877_v35  ;;  %v829_v41 = vadd.f32 %v827_v40, %v777_v63 }
 0x92f   :  { %v800_v2 = vrot.slane %v793_v0, %v5877_v35  ;;  %v4455_v10 = vmul.f32 -1.442695, %v779_v6  ;;  %v4456_v12 = vmul.f32 -1.442695, %v819_v11 }
 0x930   :  { %v850_v4 = vrot.slane %v843_v1, %v5877_v35  ;;  %v4457_v19 = vmul.f32 -1.442695, %v829_v41 }
 0x931   :  { %801 = vrot.lane.b32.xlu0 %v800_v2, %s5694_s3  ;;  %5425 = vpow2.f32 %v4455_v10 }
 0x932   :  { %851 = vrot.lane.b32.xlu1 %v850_v4, %s5694_s3  ;;  %5427 = vpow2.f32 %v4456_v12 }
 0x936   :  { %855 = vrot.lane.b32.xlu1 %v6053_v3, %s5696_s12 }
 0x93b   :  { %v5426_v13 = vpop.eup %5425 }
 0x93c   :  { %v783_v16 = vadd.f32 1.0, %v5426_v13  ;;  %v5428_v17 = vpop.eup %5427 }
 0x93d   :  { %v823_v18 = vadd.f32 1.0, %v5428_v17 }
 0x93e   :  { %5429 = vrcp.f32 %v783_v16 }
 0x93f   :  { %5431 = vrcp.f32 %v823_v18 }
 0x940   :  { %5433 = vpow2.f32 %v4457_v19 }
 0x948   :  { %v5430_v23 = vpop.eup %5429 }
 0x949   :  { %v5432_v38 = vpop.eup %5431  ;;  %v811_v0 = vsub.f32 1.0, %v5430_v23  ;;  %v817_v2 = vmul.f32 %v5430_v23, %v6020_v55 }
 0x94a   :  { %v5434_v44 = vpop.eup %5433 }
 0x94b   :  { %v833_v45 = vadd.f32 1.0, %v5434_v44 }
 0x94d   :  { %5435 = vrcp.f32 %v833_v45 }
 0x957   :  { %v5436_v58 = vpop.eup %5435 }
 0x958   :  { %v865_v61 = vsub.f32 1.0, %v5436_v58  ;;  %v867_v43 = vmul.f32 %v5436_v58, %v6011_v47  ;;  %v1008_v58 = vrot.slane %v6060_v5, 1 }
 0x9a3   :  { %v802_v27 = vpop.permute.xlu0 %801 }
 0x9a4   :  { %v804_v28 = vmul.f32 %v5430_v23, %v802_v27  ;;  %v852_v30 = vpop.permute.xlu1 %851 }
 0x9a5   :  { %v854_v39 = vmul.f32 %v5432_v38, %v852_v30 }
 0x9a6   :  { %806 = vrot.lane.b32.xlu0 %v804_v28, %s5694_s3 }
 0x9a8   :  { %v856_v46 = vpop.permute.xlu1 %855 }
 0x9a9   :  { %v857_v53 = vrot.slane %v856_v46, 1 }
 0x9aa   :  { %860 = vrot.lane.b32.xlu0 %v854_v39, %s5695_s30 }
 0xa18   :  { %v807_v51 = vpop.permute.xlu0 %806 }
 0xa19   :  { %v809_v52 = vadd.f32 %v807_v51, %v6060_v5 }
 0xa1b   :  { %5437 = vtanh.f32 %v809_v52 }
 0xa1c   :  { %v861_v54 = vpop.permute.xlu0 %860 }
 0xa1d   :  { %v863_v36 = vadd.f32 %v861_v54, %v857_v53 }
 0xa1f   :  { %5439 = vtanh.f32 %v863_v36 }
 0xa25   :  { %v5438_v60 = vpop.eup %5437 }
 0xa26   :  { %813 = vrot.lane.b32.xlu1 %v5438_v60, %s5696_s12 }
 0xa29   :  { %v5440_v42 = vpop.eup %5439 }
 0xa2a   :  { %v866_v32 = vmul.f32 %v5440_v42, %v865_v61 }
 0xa2c   :  { %v6070_v62 = vadd.f32 %v867_v43, %v866_v32 }
 0xa2e   :  { %v6074_v63 = vrot.slane %v6070_v62, %v5863_v29 }
 0xa30   :  { %882 = vrot.lane.b32.xlu1 %v6074_v63, %s5695_s30 }
 0xa98   :  { %v814_v1 = vpop.permute.xlu1 %813 }
 0xa99   :  { %v816_v4 = vmul.f32 %v814_v1, %v811_v0 }
 0xa9b   :  { %v6079_v6 = vadd.f32 %v817_v2, %v816_v4 }
 0xa9d   :  { %v873_v47 = vrot.slane %v6079_v6, %v5863_v29 }
 0xa9f   :  { %874 = vrot.lane.b32.xlu0 %v873_v47, %s5696_s12  ;;  %v6086_v10 = vsel %vm1609_vm4, %v6029_v59, %v873_v47 }
 0xaa2   :  { %v883_v11 = vpop.permute.xlu1 %882 }
 0xb11   :  { %v875_v12 = vpop.permute.xlu0 %874 }
 0xb12   :  { %v885_v13 = vsel %vm341_vm0, %v875_v12, %v883_v11 }
 0xb13   :  { %4458 = vmatmul.mubr.msk.f32.vlgmr.msra.gmra.mrb[4].mxu0 %vm160_vm1, %v885_v13 }
 0xb14   :  { %4989 = vmatpush1.bf16.msra.mxu0 %v5787_v8  ;;  %1315 = vmatprep.mubr.f32.mxu0 %v5692_v7 }
 0xb15   :  { %4991 = vmatprep.subr.bf16.mxu0 %v5789_v9 }
 0xb18   :  { %4993 = vmatpush1.bf16.msra.mxu0 %v5806_v14 }
 0xb19   :  { %4995 = vmatprep.subr.bf16.mxu0 %v5810_v15 }
 0xb1c   :  { %4997 = vmatpush1.bf16.msra.mxu0 %v5826_v20 }
 0xb1d   :  { %4999 = vmatprep.subr.bf16.mxu0 %v5830_v21 }
 0xb20   :  { %5001 = vmatpush1.bf16.msra.mxu0 %v5840_v24 }
 0xbe6   :  { %v955_v55 = vpop.f32.mrb[4].mxu0 }
 0xbe7   :  { %v956_v59 = vadd.f32 %v955_v55, %v5870_v33  ;;  %v957_v16 = vpop.f32.mrb[5].mxu0 }
 0xbe8   :  { %v958_v17 = vadd.f32 %v957_v16, %v5874_v34 }
 0xbe9   :  { %v974_v18 = vrot.slane %v956_v59, %v5877_v35  ;;  %v960_v30 = vadd.f32 %v956_v59, %v6053_v3  ;;  %v1000_v39 = vadd.f32 %v956_v59, %v6060_v5 }
 0xbea   :  { %v1024_v23 = vrot.slane %v958_v17, %v5877_v35  ;;  %v1010_v60 = vadd.f32 %v1008_v58, %v958_v17 }
 0xbeb   :  { %v981_v27 = vrot.slane %v974_v18, %v5877_v35  ;;  %v4459_v38 = vmul.f32 -1.442695, %v960_v30  ;;  %v4460_v40 = vmul.f32 -1.442695, %v1000_v39 }
 0xbec   :  { %v1031_v28 = vrot.slane %v1024_v23, %v5877_v35  ;;  %v4461_v61 = vmul.f32 -1.442695, %v1010_v60 }
 0xbed   :  { %982 = vrot.lane.b32.xlu0 %v981_v27, %s5694_s3  ;;  %5441 = vpow2.f32 %v4459_v38 }
 0xbee   :  { %1032 = vrot.lane.b32.xlu1 %v1031_v28, %s5694_s3  ;;  %5443 = vpow2.f32 %v4460_v40 }
 0xbf2   :  { %1036 = vrot.lane.b32.xlu1 %v6060_v5, %s5696_s12 }
 0xbf7   :  { %v5442_v41 = vpop.eup %5441 }
 0xbf8   :  { %v964_v19 = vadd.f32 1.0, %v5442_v41  ;;  %v5444_v44 = vpop.eup %5443 }
 0xbf9   :  { %v1004_v45 = vadd.f32 1.0, %v5444_v44 }
 0xbfa   :  { %5445 = vrcp.f32 %v964_v19 }
 0xbfb   :  { %5447 = vrcp.f32 %v1004_v45 }
 0xbfc   :  { %5449 = vpow2.f32 %v4461_v61 }
 0xc04   :  { %v5446_v46 = vpop.eup %5445 }
 0xc05   :  { %v5448_v54 = vpop.eup %5447  ;;  %v992_v17 = vsub.f32 1.0, %v5446_v46  ;;  %v998_v23 = vmul.f32 %v5446_v46, %v6079_v6 }
 0xc06   :  { %v5450_v42 = vpop.eup %5449 }
 0xc07   :  { %v1014_v32 = vadd.f32 1.0, %v5450_v42  ;;  %v1189_v42 = vrot.slane %v6001_v57, 1 }
 0xc09   :  { %5451 = vrcp.f32 %v1014_v32 }
 0xc13   :  { %v5452_v11 = vpop.eup %5451 }
 0xc14   :  { %v1046_v5 = vsub.f32 1.0, %v5452_v11  ;;  %v1048_v59 = vmul.f32 %v5452_v11, %v6070_v62 }
 0xc5f   :  { %v983_v51 = vpop.permute.xlu0 %982 }
 0xc60   :  { %v985_v52 = vmul.f32 %v5446_v46, %v983_v51  ;;  %v1033_v53 = vpop.permute.xlu1 %1032 }
 0xc61   :  { %v1035_v36 = vmul.f32 %v5448_v54, %v1033_v53 }
 0xc62   :  { %987 = vrot.lane.b32.xlu0 %v985_v52, %s5694_s3 }
 0xc64   :  { %v1037_v43 = vpop.permute.xlu1 %1036 }
 0xc65   :  { %v1038_v2 = vrot.slane %v1037_v43, 1 }
 0xc66   :  { %1041 = vrot.lane.b32.xlu0 %v1035_v36, %s5695_s30 }
 0xcd4   :  { %v988_v0 = vpop.permute.xlu0 %987 }
 0xcd5   :  { %v990_v1 = vadd.f32 %v988_v0, %v6053_v3 }
 0xcd7   :  { %5453 = vtanh.f32 %v990_v1 }
 0xcd8   :  { %v1042_v4 = vpop.permute.xlu0 %1041 }
 0xcd9   :  { %v1044_v47 = vadd.f32 %v1042_v4, %v1038_v2 }
 0xcdb   :  { %5455 = vtanh.f32 %v1044_v47 }
 0xce1   :  { %v5454_v12 = vpop.eup %5453 }
 0xce2   :  { %994 = vrot.lane.b32.xlu1 %v5454_v12, %s5696_s12 }
 0xce5   :  { %v5456_v13 = vpop.eup %5455 }
 0xce6   :  { %v1047_v55 = vmul.f32 %v5456_v13, %v1046_v5 }
 0xce8   :  { %v6116_v16 = vadd.f32 %v1048_v59, %v1047_v55 }
 0xcea   :  { %v6120_v3 = vrot.slane %v6116_v16, %v5863_v29 }
 0xcec   :  { %1063 = vrot.lane.b32.xlu1 %v6120_v3, %s5695_s30 }
 0xd54   :  { %v995_v18 = vpop.permute.xlu1 %994 }
 0xd55   :  { %v997_v27 = vmul.f32 %v995_v18, %v992_v17 }
 0xd57   :  { %v6125_v28 = vadd.f32 %v998_v23, %v997_v27 }
 0xd59   :  { %v1054_v62 = vrot.slane %v6125_v28, %v5863_v29 }
 0xd5b   :  { %1055 = vrot.lane.b32.xlu0 %v1054_v62, %s5696_s12  ;;  %v6132_v30 = vsel %vm1611_vm5, %v6086_v10, %v1054_v62 }
 0xd5e   :  { %v1064_v38 = vpop.permute.xlu1 %1063 }
 0xdcd   :  { %v1056_v39 = vpop.permute.xlu0 %1055 }
 0xdce   :  { %v1066_v40 = vsel %vm341_vm0, %v1056_v39, %v1064_v38 }
 0xdcf   :  { %4462 = vmatmul.mubr.msk.f32.vlgmr.msra.gmra.mrb[4].mxu1 %vm160_vm1, %v1066_v40 }
 0xdd0   :  { %5005 = vmatpush1.bf16.msra.mxu1 %v5787_v8  ;;  %1496 = vmatprep.mubr.f32.mxu1 %v5692_v7 }
 0xdd1   :  { %5007 = vmatprep.subr.bf16.mxu1 %v5789_v9 }
 0xdd4   :  { %5009 = vmatpush1.bf16.msra.mxu1 %v5806_v14 }
 0xdd5   :  { %5011 = vmatprep.subr.bf16.mxu1 %v5810_v15 }
 0xdd8   :  { %5013 = vmatpush1.bf16.msra.mxu1 %v5826_v20 }
 0xdd9   :  { %5015 = vmatprep.subr.bf16.mxu1 %v5830_v21 }
 0xddc   :  { %5017 = vmatpush1.bf16.msra.mxu1 %v5840_v24 }
 0xddd   :  { %4650 = vmatprep.subr.mxu1 %v5692_v7 }
 0xea2   :  { %v1136_v6 = vpop.f32.mrb[4].mxu1 }
 0xea3   :  { %v1137_v10 = vadd.f32 %v1136_v6, %v5870_v33  ;;  %v1138_v8 = vpop.f32.mrb[5].mxu1 }
 0xea4   :  { %v1139_v41 = vadd.f32 %v1138_v8, %v5874_v34 }
 0xea5   :  { %v1155_v9 = vrot.slane %v1137_v10, %v5877_v35  ;;  %v1141_v21 = vadd.f32 %v1137_v10, %v5994_v56  ;;  %v1181_v19 = vadd.f32 %v1137_v10, %v6001_v57 }
 0xea6   :  { %v1205_v14 = vrot.slane %v1139_v41, %v5877_v35  ;;  %v1191_v32 = vadd.f32 %v1189_v42, %v1139_v41 }
 0xea7   :  { %v1162_v15 = vrot.slane %v1155_v9, %v5877_v35  ;;  %v4463_v24 = vmul.f32 -1.442695, %v1141_v21  ;;  %v4464_v44 = vmul.f32 -1.442695, %v1181_v19 }
 0xea8   :  { %v1212_v20 = vrot.slane %v1205_v14, %v5877_v35  ;;  %v4465_v43 = vmul.f32 -1.442695, %v1191_v32 }
 0xea9   :  { %1163 = vrot.lane.b32.xlu0 %v1162_v15, %s5694_s3  ;;  %5457 = vpow2.f32 %v4463_v24 }
 0xeaa   :  { %1213 = vrot.lane.b32.xlu1 %v1212_v20, %s5694_s3  ;;  %5459 = vpow2.f32 %v4464_v44 }
 0xeae   :  { %1217 = vrot.lane.b32.xlu1 %v6001_v57, %s5696_s12 }
 0xeb3   :  { %v5458_v45 = vpop.eup %5457 }
 0xeb4   :  { %v1145_v46 = vadd.f32 1.0, %v5458_v45  ;;  %v5460_v51 = vpop.eup %5459 }
 0xeb5   :  { %v1185_v52 = vadd.f32 1.0, %v5460_v51 }
 0xeb6   :  { %5461 = vrcp.f32 %v1145_v46 }
 0xeb7   :  { %5463 = vrcp.f32 %v1185_v52 }
 0xeb8   :  { %5465 = vpow2.f32 %v4465_v43  ;;  %v1370_v43 = vrot.slane %v5945_v49, 1 }
 0xec0   :  { %v5462_v53 = vpop.eup %5461 }
 0xec1   :  { %v5464_v60 = vpop.eup %5463  ;;  %v1173_v27 = vsub.f32 1.0, %v5462_v53  ;;  %v1179_v38 = vmul.f32 %v5462_v53, %v6125_v28 }
 0xec2   :  { %v5466_v0 = vpop.eup %5465 }
 0xec3   :  { %v1195_v1 = vadd.f32 1.0, %v5466_v0 }
 0xec5   :  { %5467 = vrcp.f32 %v1195_v1 }
 0xecf   :  { %v5468_v13 = vpop.eup %5467 }
 0xed0   :  { %v1227_v57 = vsub.f32 1.0, %v5468_v13  ;;  %v1229_v18 = vmul.f32 %v5468_v13, %v6116_v16 }
 0xf1b   :  { %v1164_v54 = vpop.permute.xlu0 %1163 }
 0xf1c   :  { %v1166_v36 = vmul.f32 %v5462_v53, %v1164_v54  ;;  %v1214_v58 = vpop.permute.xlu1 %1213 }
 0xf1d   :  { %v1216_v61 = vmul.f32 %v5464_v60, %v1214_v58 }
 0xf1e   :  { %1168 = vrot.lane.b32.xlu0 %v1166_v36, %s5694_s3 }
 0xf20   :  { %v1218_v2 = vpop.permute.xlu1 %1217 }
 0xf21   :  { %v1219_v11 = vrot.slane %v1218_v2, 1 }
 0xf22   :  { %1222 = vrot.lane.b32.xlu0 %v1216_v61, %s5695_s30 }
 0xf90   :  { %v1169_v4 = vpop.permute.xlu0 %1168 }
 0xf91   :  { %v1171_v47 = vadd.f32 %v1169_v4, %v5994_v56 }
 0xf93   :  { %5469 = vtanh.f32 %v1171_v47 }
 0xf94   :  { %v1223_v12 = vpop.permute.xlu0 %1222 }
 0xf95   :  { %v1225_v5 = vadd.f32 %v1223_v12, %v1219_v11 }
 0xf97   :  { %5471 = vtanh.f32 %v1225_v5 }
 0xf9d   :  { %v5470_v55 = vpop.eup %5469 }
 0xf9e   :  { %1175 = vrot.lane.b32.xlu1 %v5470_v55, %s5696_s12 }
 0xfa1   :  { %v5472_v59 = vpop.eup %5471 }
 0xfa2   :  { %v1228_v17 = vmul.f32 %v5472_v59, %v1227_v57 }
 0xfa4   :  { %v6163_v23 = vadd.f32 %v1229_v18, %v1228_v17 }
 0xfa6   :  { %v6167_v56 = vrot.slane %v6163_v23, %v5863_v29 }
 0xfa8   :  { %1244 = vrot.lane.b32.xlu1 %v6167_v56, %s5695_s30 }
0x1010   :  { %v1176_v62 = vpop.permute.xlu1 %1175 }
0x1011   :  { %v1178_v39 = vmul.f32 %v1176_v62, %v1173_v27 }
0x1013   :  { %v6172_v40 = vadd.f32 %v1179_v38, %v1178_v39 }
0x1015   :  { %v1235_v16 = vrot.slane %v6172_v40, %v5863_v29 }
0x1017   :  { %1236 = vrot.lane.b32.xlu0 %v1235_v16, %s5696_s12  ;;  %v6179_v6 = vsel %vm1613_vm6, %v6132_v30, %v1235_v16 }
0x101a   :  { %v1245_v10 = vpop.permute.xlu1 %1244 }
0x1089   :  { %v1237_v8 = vpop.permute.xlu0 %1236 }
0x108a   :  { %v1247_v41 = vsel %vm341_vm0, %v1237_v8, %v1245_v10 }
0x108b   :  { %4466 = vmatmul.mubr.msk.f32.vlgmr.msra.gmra.mrb[6].mxu0 %vm160_vm1, %v1247_v41 }
0x115e   :  { %v1317_v28 = vpop.f32.mrb[6].mxu0 }
0x115f   :  { %v1318_v9 = vadd.f32 %v1317_v28, %v5870_v33  ;;  %v1319_v14 = vpop.f32.mrb[7].mxu0 }
0x1160   :  { %v1320_v15 = vadd.f32 %v1319_v14, %v5874_v34 }
0x1161   :  { %v1336_v20 = vrot.slane %v1318_v9, %v5877_v35  ;;  %v1322_v19 = vadd.f32 %v1318_v9, %v5938_v48  ;;  %v1362_v45 = vadd.f32 %v1318_v9, %v5945_v49 }
0x1162   :  { %v1386_v21 = vrot.slane %v1320_v15, %v5877_v35  ;;  %v1372_v0 = vadd.f32 %v1370_v43, %v1320_v15 }
0x1163   :  { %v1343_v24 = vrot.slane %v1336_v20, %v5877_v35  ;;  %v4467_v44 = vmul.f32 -1.442695, %v1322_v19  ;;  %v4468_v46 = vmul.f32 -1.442695, %v1362_v45 }
0x1164   :  { %v1393_v30 = vrot.slane %v1386_v21, %v5877_v35  ;;  %v4469_v1 = vmul.f32 -1.442695, %v1372_v0 }
0x1165   :  { %1344 = vrot.lane.b32.xlu0 %v1343_v24, %s5694_s3  ;;  %5473 = vpow2.f32 %v4467_v44 }
0x1166   :  { %1394 = vrot.lane.b32.xlu1 %v1393_v30, %s5694_s3  ;;  %5475 = vpow2.f32 %v4468_v46 }
0x116a   :  { %1398 = vrot.lane.b32.xlu1 %v5945_v49, %s5696_s12 }
0x116f   :  { %v5474_v51 = vpop.eup %5473 }
0x1170   :  { %v1326_v52 = vadd.f32 1.0, %v5474_v51  ;;  %v5476_v53 = vpop.eup %5475 }
0x1171   :  { %v1366_v54 = vadd.f32 1.0, %v5476_v53 }
0x1172   :  { %5477 = vrcp.f32 %v1326_v52 }
0x1173   :  { %5479 = vrcp.f32 %v1366_v54  ;;  %v1639_v54 = vld [vmem:[%s7062_s4 + $0x8] sm:$0xff] }
0x1174   :  { %5481 = vpow2.f32 %v4469_v1 }
0x117c   :  { %v5478_v36 = vpop.eup %5477 }
0x117d   :  { %v5480_v42 = vpop.eup %5479  ;;  %v1354_v38 = vsub.f32 1.0, %v5478_v36  ;;  %v1360_v16 = vmul.f32 %v5478_v36, %v6172_v40 }
0x117e   :  { %v5482_v2 = vpop.eup %5481 }
0x117f   :  { %v1376_v4 = vadd.f32 1.0, %v5482_v2  ;;  %v1642_v2 = vld [vmem:[%s7062_s4 + $0x20] sm:$0xff] }
0x1181   :  { %5483 = vrcp.f32 %v1376_v4  ;;  %v1644_v4 = vld [vmem:[%s7062_s4 + $0x30] sm:$0xff] }
0x118b   :  { %v5484_v57 = vpop.eup %5483 }
0x118c   :  { %v1408_v49 = vsub.f32 1.0, %v5484_v57  ;;  %v1410_v27 = vmul.f32 %v5484_v57, %v6163_v23  ;;  %v1651_v57 = vld [vmem:[%s7062_s4 + $0x68] sm:$0xff] }
0x11d7   :  { %v1345_v58 = vpop.permute.xlu0 %1344 }
0x11d8   :  { %v1347_v60 = vmul.f32 %v5478_v36, %v1345_v58  ;;  %v1395_v61 = vpop.permute.xlu1 %1394  ;;  %v1641_v36 = vld [vmem:[%s7062_s4 + $0x18] sm:$0xff]  ;;  %v1638_v58 = vld [vmem:[%s7062_s4] sm:$0xff] }
0x11d9   :  { %v1397_v32 = vmul.f32 %v5480_v42, %v1395_v61  ;;  %v1640_v61 = vld [vmem:[%s7062_s4 + $0x10] sm:$0xff]  ;;  %v1643_v42 = vld [vmem:[%s7062_s4 + $0x28] sm:$0xff] }
0x11da   :  { %1349 = vrot.lane.b32.xlu0 %v1347_v60, %s5694_s3  ;;  %v6245_v60 = vpack.c.bf16 %v1641_v36, %v1639_v54  ;;  %v6256_v0 = vpack.c.bf16 %v1640_v61, %v1638_v58  ;;  %v1666_v58 = vld [vmem:[%s7062_s4 + $0xe0] sm:$0xff]  ;;  %v1668_v61 = vld [vmem:[%s7062_s4 + $0xf0] sm:$0xff] }
0x11dc   :  { %v1399_v47 = vpop.permute.xlu1 %1398  ;;  %5019 = vmatprep.subr.bf16.mxu0 %v6245_v60 }
0x11dd   :  { %v1400_v5 = vrot.slane %v1399_v47, 1  ;;  %v1647_v47 = vld [vmem:[%s7062_s4 + $0x48] sm:$0xff]  ;;  %5021 = vmatpush1.bf16.msra.mxu0 %v6256_v0 }
0x11de   :  { %1403 = vrot.lane.b32.xlu0 %v1397_v32, %s5695_s30  ;;  %v1645_v32 = vld [vmem:[%s7062_s4 + $0x38] sm:$0xff] }
0x11df   :  { %v6258_v1 = vpack.c.bf16 %v1645_v32, %v1643_v42  ;;  %v1671_v42 = vld [vmem:[%s7062_s4 + $0x108] sm:$0xff]  ;;  %v1673_v32 = vld [vmem:[%s7062_s4 + $0x118] sm:$0xff] }
0x11e1   :  { %5023 = vmatprep.subr.bf16.mxu0 %v6258_v1 }
0x124c   :  { %v1350_v11 = vpop.permute.xlu0 %1349 }
0x124d   :  { %v1352_v12 = vadd.f32 %v1350_v11, %v5938_v48  ;;  %v1649_v11 = vld [vmem:[%s7062_s4 + $0x58] sm:$0xff] }
0x124f   :  { %5485 = vtanh.f32 %v1352_v12  ;;  %v6275_v12 = vpack.c.bf16 %v1644_v4, %v1642_v2  ;;  %v6386_v2 = vpack.c.bf16 %v1673_v32, %v1671_v42  ;;  %v1670_v4 = vld [vmem:[%s7062_s4 + $0x100] sm:$0xff] }
0x1250   :  { %v1404_v13 = vpop.permute.xlu0 %1403 }
0x1251   :  { %v1406_v55 = vadd.f32 %v1404_v13, %v1400_v5  ;;  %v6278_v5 = vpack.c.bf16 %v1649_v11, %v1647_v47  ;;  %v1646_v13 = vld [vmem:[%s7062_s4 + $0x40] sm:$0xff]  ;;  %5025 = vmatpush1.bf16.msra.mxu0 %v6275_v12  ;;  %v1672_v47 = vld [vmem:[%s7062_s4 + $0x110] sm:$0xff]  ;;  %v1675_v11 = vld [vmem:[%s7062_s4 + $0x128] sm:$0xff] }
0x1253   :  { %5487 = vtanh.f32 %v1406_v55  ;;  %v1648_v55 = vld [vmem:[%s7062_s4 + $0x50] sm:$0xff]  ;;  %5027 = vmatprep.subr.bf16.mxu0 %v6278_v5 }
0x1259   :  { %v5486_v59 = vpop.eup %5485 }
0x125a   :  { %1356 = vrot.lane.b32.xlu1 %v5486_v59, %s5696_s12  ;;  %v1653_v59 = vld [vmem:[%s7062_s4 + $0x78] sm:$0xff] }
0x125d   :  { %v5488_v17 = vpop.eup %5487 }
0x125e   :  { %v1409_v18 = vmul.f32 %v5488_v17, %v1408_v49  ;;  %v6293_v49 = vpack.c.bf16 %v1648_v55, %v1646_v13  ;;  %v6296_v17 = vpack.c.bf16 %v1653_v59, %v1651_v57  ;;  %v1677_v13 = vld [vmem:[%s7062_s4 + $0x138] sm:$0xff]  ;;  %v6401_v55 = vpack.c.bf16 %v1672_v47, %v1670_v4  ;;  %v1674_v59 = vld [vmem:[%s7062_s4 + $0x120] sm:$0xff] }
0x125f   :  { %v6404_v57 = vpack.c.bf16 %v1677_v13, %v1675_v11 }
0x1260   :  { %v6201_v62 = vadd.f32 %v1410_v27, %v1409_v18  ;;  %v1650_v18 = vld [vmem:[%s7062_s4 + $0x60] sm:$0xff]  ;;  %v1652_v27 = vld [vmem:[%s7062_s4 + $0x70] sm:$0xff]  ;;  %5029 = vmatpush1.bf16.msra.mxu0 %v6293_v49 }
0x1261   :  { %5031 = vmatprep.subr.bf16.mxu0 %v6296_v17 }
0x1262   :  { %v6205_v48 = vrot.slane %v6201_v62, %v5863_v29 }
0x1264   :  { %1425 = vrot.lane.b32.xlu1 %v6205_v48, %s5695_s30 }
0x12cc   :  { %v1357_v39 = vpop.permute.xlu1 %1356 }
0x12cd   :  { %v1359_v10 = vmul.f32 %v1357_v39, %v1354_v38  ;;  %v1655_v38 = vld [vmem:[%s7062_s4 + $0x88] sm:$0xff]  ;;  %v1657_v39 = vld [vmem:[%s7062_s4 + $0x98] sm:$0xff] }
0x12cf   :  { %v6210_v8 = vadd.f32 %v1360_v16, %v1359_v10  ;;  %v6311_v16 = vpack.c.bf16 %v1652_v27, %v1650_v18  ;;  %v6314_v10 = vpack.c.bf16 %v1657_v39, %v1655_v38  ;;  %v1676_v18 = vld [vmem:[%s7062_s4 + $0x130] sm:$0xff] }
0x12d0   :  { %v6413_v27 = vpack.c.bf16 %v1676_v18, %v1674_v59 }
0x12d1   :  { %v1416_v23 = vrot.slane %v6210_v8, %v5863_v29  ;;  %5033 = vmatpush1.bf16.msra.mxu0 %v6311_v16 }
0x12d2   :  { %5035 = vmatprep.subr.bf16.mxu0 %v6314_v10 }
0x12d3   :  { %1417 = vrot.lane.b32.xlu0 %v1416_v23, %s5696_s12  ;;  %v6217_v41 = vsel %vm1615_vm7, %v6179_v6, %v1416_v23  ;;  %v5625_v6 = vld [vmem:[%s5896_s29] ss:$8 sm:$0x3] }
0x12d4   :  { %v1654_v23 = vld [vmem:[%s7062_s4 + $0x80] sm:$0xff] }
0x12d6   :  { %v1426_v28 = vpop.permute.xlu1 %1425 }
0x1345   :  { %v1418_v9 = vpop.permute.xlu0 %1417 }
0x1346   :  { %v1428_v14 = vsel %vm341_vm0, %v1418_v9, %v1426_v28  ;;  %v1656_v28 = vld [vmem:[%s7062_s4 + $0x90] sm:$0xff]  ;;  %v1659_v9 = vld [vmem:[%s7062_s4 + $0xa8] sm:$0xff] }
0x1347   :  { %4470 = vmatmul.mubr.msk.f32.vlgmr.msra.gmra.mrb[6].mxu1 %vm160_vm1, %v1428_v14  ;;  %v1661_v14 = vld [vmem:[%s7062_s4 + $0xb8] sm:$0xff] }
0x1348   :  { %4652 = vmatprep.mubr.msk.f32.mxu1 %vm5698_vm10, %v5692_v7 }
0x141a   :  { %v1498_v40 = vpop.f32.mrb[6].mxu1 }
0x141b   :  { %v6222_v15 = vadd.f32 %v1498_v40, %v5870_v33  ;;  %v6224_v20 = vpop.f32.mrb[7].mxu1  ;;  %v6329_v40 = vpack.c.bf16 %v1656_v28, %v1654_v23 }
0x141c   :  { %v1501_v23 = vadd.f32 %v6224_v20, %v5874_v34  ;;  %v6438_v20 = vand.u32 127, %v150_v25 }
0x141d   :  { %v1517_v21 = vrot.slane %v6222_v15, %v5877_v35  ;;  %v1503_v30 = vadd.f32 %v5625_v6, %v6222_v15  ;;  %5037 = vmatpush1.bf16.msra.mxu0 %v6329_v40 }
0x141e   :  { %vm1695_vm9 = vcmp.eq.s32.totalorder %v6438_v20, 101 }
0x141f   :  { %v1524_v24 = vrot.slane %v1517_v21, %v5877_v35  ;;  %v4471_v19 = vmul.f32 -1.442695, %v1503_v30  ;;  %v6332_v21 = vpack.c.bf16 %v1661_v14, %v1659_v9  ;;  %v1663_v30 = vld [vmem:[%s7062_s4 + $0xc8] sm:$0xff] }
0x1421   :  { %1525 = vrot.lane.b32.xlu0 %v1524_v24, %s5694_s3  ;;  %5489 = vpow2.f32 %v4471_v19  ;;  %v1658_v24 = vld [vmem:[%s7062_s4 + $0xa0] sm:$0xff]  ;;  %v1665_v19 = vld [vmem:[%s7062_s4 + $0xd8] sm:$0xff]  ;;  %5039 = vmatprep.subr.bf16.mxu0 %v6332_v21 }
0x142b   :  { %v5490_v44 = vpop.eup %5489 }
0x142c   :  { %v1507_v45 = vadd.f32 1.0, %v5490_v44 }
0x142e   :  { %5491 = vrcp.f32 %v1507_v45  ;;  %v6350_v45 = vpack.c.bf16 %v1665_v19, %v1663_v30  ;;  %v5697_v19 = vmov 1.0  }
0x1438   :  { %v6232_v46 = vpop.eup %5491 }
0x1439   :  { %v1535_v38 = vsub.f32 1.0, %v6232_v46  ;;  %v1541_v28 = vmul.f32 %v6232_v46, %v6210_v8  ;;  %v5626_v8 = vld [vmem:[%s5890_s0] ss:$8 sm:$0x3] }
0x1493   :  { %v1526_v33 = vpop.permute.xlu0 %1525 }
0x1494   :  { %v1528_v51 = vmul.f32 %v6232_v46, %v1526_v33  ;;  %v1662_v33 = vld [vmem:[%s7062_s4 + $0xc0] sm:$0xff] }
0x1496   :  { %1530 = vrot.lane.b32.xlu1 %v1528_v51, %s5694_s3  ;;  %v1664_v51 = vld [vmem:[%s7062_s4 + $0xd0] sm:$0xff] }
0x1497   :  { %v6365_v54 = vpack.c.bf16 %v1664_v51, %v1662_v33 }
0x1508   :  { %v1531_v52 = vpop.permute.xlu1 %1530 }
0x1509   :  { %v1533_v53 = vadd.f32 %v5625_v6, %v1531_v52  ;;  %v1660_v6 = vld [vmem:[%s7062_s4 + $0xb0] sm:$0xff]  ;;  %v1667_v52 = vld [vmem:[%s7062_s4 + $0xe8] sm:$0xff] }
0x150a   :  { %v6347_v44 = vpack.c.bf16 %v1660_v6, %v1658_v24  ;;  %v1567_v24 = vrot.slane %v1501_v23, %v5877_v35 }
0x150b   :  { %5493 = vtanh.f32 %v1533_v53  ;;  %v1669_v53 = vld [vmem:[%s7062_s4 + $0xf8] sm:$0xff] }
0x150c   :  { %5041 = vmatpush1.bf16.msra.mxu0 %v6347_v44  ;;  %v6368_v36 = vpack.c.bf16 %v1669_v53, %v1667_v52  ;;  %v1574_v34 = vrot.slane %v1567_v24, %v5877_v35  ;;  %v1678_v52 = vld [vmem:[%s7063_s5] sm:$0x3] }
0x150d   :  { %5043 = vmatprep.subr.bf16.mxu0 %v6350_v45  ;;  %v6448_v25 = vrot.slane %v1678_v52, %v5863_v29 }
0x1510   :  { %5045 = vmatpush1.bf16.msra.mxu0 %v6365_v54 }
0x1511   :  { %5047 = vmatprep.subr.bf16.mxu0 %v6368_v36 }
0x1515   :  { %v5494_v43 = vpop.eup %5493 }
0x1516   :  { %1537 = vrot.lane.b32.xlu0 %v5494_v43, %s5696_s12  ;;  %v6383_v43 = vpack.c.bf16 %v1668_v61, %v1666_v58  ;;  %v6453_v61 = vrot.slane %v1678_v52, %v156_v31 }
0x1518   :  { %5049 = vmatpush1.bf16.msra.mxu0 %v6383_v43 }
0x1519   :  { %5051 = vmatprep.subr.bf16.mxu0 %v6386_v2 }
0x151c   :  { %5053 = vmatpush1.bf16.msra.mxu0 %v6401_v55 }
0x151d   :  { %5055 = vmatprep.subr.bf16.mxu0 %v6404_v57 }
0x1520   :  { %5057 = vmatpush1.bf16.msra.mxu0 %v6413_v27 }
0x1521   :  { %4690 = vmatprep.subr.mxu0 %v5692_v7 }
0x1588   :  { %v1538_v39 = vpop.permute.xlu0 %1537 }
0x1589   :  { %v1540_v9 = vmul.f32 %v1538_v39, %v1535_v38 }
0x158b   :  { %v6423_v14 = vadd.f32 %v1541_v28, %v1540_v9 }
0x158d   :  { %v1603_v6 = vrot.slane %v6423_v14, %v5863_v29  ;;  %v1551_v29 = vrot.slane %v5626_v8, 1 }
0x158f   :  { %1698 = vrot.lane.b32.xlu1 %v1603_v6, %s5696_s12  ;;  %v6431_v30 = vsel %vm1617_vm8, %v6217_v41, %v1603_v6  ;;  %v1543_v41 = vadd.f32 %v5626_v8, %v6222_v15  ;;  %v1553_v11 = vadd.f32 %v1551_v29, %v1501_v23 }
0x1591   :  { %v4472_v33 = vmul.f32 -1.442695, %v1543_v41  ;;  %v4473_v13 = vmul.f32 -1.442695, %v1553_v11 }
0x1593   :  { %1575 = vrot.lane.b32.xlu1 %v1574_v34, %s5694_s3  ;;  %5495 = vpow2.f32 %v4472_v33 }
0x1597   :  { %1579 = vrot.lane.b32.xlu1 %v5626_v8, %s5696_s12 }
0x159d   :  { %v5496_v35 = vpop.eup %5495 }
0x159e   :  { %v1547_v51 = vadd.f32 1.0, %v5496_v35 }
0x15a0   :  { %5497 = vrcp.f32 %v1547_v51 }
0x15a1   :  { %5499 = vpow2.f32 %v4473_v13 }
0x15aa   :  { %v5498_v4 = vpop.eup %5497 }
0x15ab   :  { %v5500_v26 = vpop.eup %5499 }
0x15ac   :  { %v1557_v38 = vadd.f32 1.0, %v5500_v26 }
0x1601   :  { %v1699_v46 = vpop.permute.xlu1 %1698 }
0x1602   :  { %4475 = vmatprep.mubr.msk.f32.mxu0 %vm341_vm0, %v1699_v46 }
0x1603   :  { %4476 = vmatmul.mubr.msk.f32.vlgmr.msra.gmra.mrb[8].mxu0 %vm1695_vm9, %v5697_v19 }
0x1604   :  { %4692 = vmatprep.mubr.msk.f32.mxu0 %vm5698_vm10, %v5692_v7 }
0x1605   :  { %v1576_v32 = vpop.permute.xlu1 %1575 }
0x1606   :  { %v1578_v47 = vmul.f32 %v5498_v4, %v1576_v32 }
0x1609   :  { %v1580_v18 = vpop.permute.xlu1 %1579 }
0x160a   :  { %v1581_v9 = vrot.slane %v1580_v18, 1 }
0x16d6   :  { %v1779_v53 = vpop.f32.mrb[8].mxu0 }
0x16d7   :  { %v1780_v58 = vadd.f32 %v1779_v53, %v6448_v25  ;;  %v1781_v15 = vpop.f32.mrb[9].mxu0 }
0x16d8   :  { %v1782_v42 = vadd.f32 %v1781_v15, %v6453_v61 }
0x16d9   :  { %1785 = vrot.lane.b32.xlu0 %v1780_v58, %s5695_s30 }
0x16dd   :  { %1806 = vrot.lane.b32.xlu0 %v1782_v42, %s5696_s12 }
0x16e1   :  { %1584 = vrot.lane.b32.xlu0 %v1578_v47, %s5695_s30 }
0x16e5   :  { %1796 = vrot.lane.b32.xlu0 %v1782_v42, %s5695_s30 }
0x174b   :  { %v1786_v31 = vpop.permute.xlu0 %1785 }
0x174c   :  { %v1788_v59 = vadd.f32 %v1786_v31, %v1780_v58 }
0x174e   :  { %v4477_v39 = vmul.f32 -1.442695, %v1788_v59 }
0x174f   :  { %v1807_v28 = vpop.permute.xlu0 %1806 }
0x1750   :  { %5501 = vpow2.f32 %v4477_v39 }
0x1751   :  { %5503 = vrcp.f32 %v1557_v38 }
0x1753   :  { %v1585_v24 = vpop.permute.xlu0 %1584 }
0x1754   :  { %v1587_v6 = vadd.f32 %v1585_v24, %v1581_v9 }
0x1756   :  { %5505 = vtanh.f32 %v1587_v6 }
0x175a   :  { %v5502_v34 = vpop.eup %5501 }
0x175b   :  { %v1792_v46 = vadd.f32 1.0, %v5502_v34  ;;  %v5504_v41 = vpop.eup %5503 }
0x175c   :  { %v1589_v23 = vsub.f32 1.0, %v5504_v41  ;;  %v1591_v33 = vmul.f32 %v5504_v41, %v6201_v62 }
0x175d   :  { %5507 = vrcp.f32 %v1792_v46 }
0x1760   :  { %v5506_v8 = vpop.eup %5505 }
0x1761   :  { %v1590_v35 = vmul.f32 %v5506_v8, %v1589_v23  ;;  %v1679_v8 = vld [vmem:[%s7064_s6] sm:$0xff] }
0x1763   :  { %v1592_v51 = vadd.f32 %v1591_v33, %v1590_v35  ;;  %v1680_v33 = vld [vmem:[%s7064_s6 + $0x8] sm:$0xff]  ;;  %v1681_v35 = vld [vmem:[%s7064_s6 + $0x10] sm:$0xff] }
0x1765   :  { %v1626_v52 = vsel %vm1605_vm2, %v1592_v51, %v6205_v48  ;;  %v5699_v51 = vmov 0.0|0.0  }
0x1766   :  { %v1627_v53 = vsel %vm1607_vm3, %v1626_v52, %v6167_v56  ;;  %v6519_v52 = vpack.c.bf16 %v1680_v33, %v1679_v8 }
0x1767   :  { %v5508_v15 = vpop.eup %5507  ;;  %v1628_v42 = vsel %vm1609_vm4, %v1627_v53, %v6120_v3  ;;  %v1682_v53 = vld [vmem:[%s7064_s6 + $0x18] sm:$0xff] }
0x1768   :  { %v1809_v32 = vmul.f32 %v5508_v15, %v1807_v28  ;;  %v1629_v4 = vsel %vm1611_vm5, %v1628_v42, %v6074_v63  ;;  %v6525_v15 = vpack.c.bf16 %v1682_v53, %v1681_v35  ;;  %v1683_v42 = vld [vmem:[%s7064_s6 + $0x20] sm:$0xff]  ;;  %vm3038_vm5 = vcmp.eq.s32.totalorder %v6438_v20, 2 }
0x1769   :  { %v1630_v47 = vsel %vm1613_vm6, %v1629_v4, %v6015_v50  ;;  %vm3920_vm6 = vcmp.eq.s32.totalorder %v6438_v20, 4 }
0x176a   :  { %1811 = vrot.lane.b32.xlu1 %v1809_v32, %s5694_s3  ;;  %v1631_v62 = vsel %vm1615_vm7, %v1630_v47, %v5959_v37  ;;  %v1684_v32 = vld [vmem:[%s7064_s6 + $0x28] sm:$0xff]  ;;  %v1685_v47 = vld [vmem:[%s7064_s6 + $0x30] sm:$0xff]  ;;  %vm4361_vm7 = vcmp.eq.s32.totalorder %v6438_v20, 5 }
0x176b   :  { %v1632_v48 = vsel %vm1617_vm8, %v1631_v62, %v5907_v22  ;;  %v1797_v22 = vpop.permute.xlu0 %1796  ;;  %v6535_v4 = vpack.c.bf16 %v1684_v32, %v1683_v42  ;;  %v1686_v62 = vld [vmem:[%s7064_s6 + $0x38] sm:$0xff]  ;;  %vm4364_vm8 = vcmask 40960  }
0x176c   :  { %v1799_v50 = vadd.f32 %v1797_v22, %v1780_v58 }
0x176e   :  { %1634 = vrot.lane.b32.xlu1 %v1632_v48, %s5695_s30  ;;  %v4478_v63 = vmul.f32 -1.442695, %v1799_v50  ;;  %v6545_v48 = vpack.c.bf16 %v1686_v62, %v1685_v47 }
0x17dc   :  { %v1812_v56 = vpop.permute.xlu1 %1811 }
0x17dd   :  { %v1814_v29 = vadd.f32 %v1812_v56, %v1780_v58 }
0x17df   :  { %5509 = vtanh.f32 %v1814_v29 }
0x17e0   :  { %v1635_v3 = vpop.permute.xlu1 %1634  ;;  %5511 = vpow2.f32 %v4478_v63  ;;  %v1688_v63 = vld [vmem:[%s7066_s8] sm:$0xff] }
0x17e1   :  { %v1637_v11 = vadd.f32 %v1635_v3, %v6431_v30 }
0x17e3   :  { %1828 = vrot.lane.b32.xlu1 %v1637_v11, %s5696_s12 }
0x17e9   :  { %v5510_v37 = vpop.eup %5509 }
0x17ea   :  { %1818 = vrot.lane.b32.xlu0 %v5510_v37, %s5696_s12  ;;  %v5512_v13 = vpop.eup %5511 }
0x17eb   :  { %v1803_v26 = vadd.f32 1.0, %v5512_v13  ;;  %v1689_v13 = vld [vmem:[%s7066_s8 + $0x8] sm:$0xff] }
0x17ed   :  { %5513 = vrcp.f32 %v1803_v26  ;;  %v1690_v26 = vld [vmem:[%s7066_s8 + $0x10] sm:$0xff] }
0x17f7   :  { %v5514_v31 = vpop.eup %5513 }
0x17f8   :  { %v1816_v59 = vsub.f32 1.0, %v5514_v31  ;;  %v1822_v18 = vmul.f32 %v5514_v31, %v6423_v14  ;;  %v6565_v31 = vpack.c.bf16 %v1689_v13, %v1688_v63 }
0x1855   :  { %v6484_v30 = vpop.permute.xlu1 %1828 }
0x1856   :  { %4651 = vmatpush3.xpose.msk.msra.mxu1 %vm341_vm0, %v6484_v30  ;;  %4691 = vmatpush3.xpose.msk.msra.mxu0 %vm341_vm0, %v6484_v30 }
0x1857   :  { %4655 = vmatprep.subr.mxu1 %v5692_v7  ;;  %4695 = vmatprep.subr.mxu0 %v5692_v7 }
0x185c   :  { %v1819_v58 = vpop.permute.xlu0 %1818 }
0x185d   :  { %v1821_v38 = vmul.f32 %v1819_v58, %v1816_v59  ;;  %v1691_v59 = vld [vmem:[%s7066_s8 + $0x18] sm:$0xff] }
0x185e   :  { %v6571_v58 = vpack.c.bf16 %v1691_v59, %v1690_v26 }
0x185f   :  { %v6493_v39 = vadd.f32 %v1822_v18, %v1821_v38  ;;  %v6579_v18 = vld [vmem:[%s7065_s7] sm:$0x1] }
0x1861   :  { %1825 = vrot.lane.b32.xlu0 %v6493_v39, %s5696_s12 }
0x18d3   :  { %v6497_v28 = vpop.permute.xlu0 %1825 }
0x18d4   :  { %4653 = vmatmul.mubr.msk.f32.vlgmr.msra.gmra.mrb[8].mxu1 %vm341_vm0, %v6497_v28 }
0x18d5   :  { %4656 = vmatpush3.msra.mxu1 %v6484_v30  ;;  %4657 = vmatprep.mubr.msk.f32.mxu1 %vm5698_vm10, %v5692_v7 }
0x18d6   :  { %5058 = vmatprep.subr.bf16.mxu1 %v5699_v51 }
0x19a7   :  { %v1900_v9 = vpop.f32.mrb[8].mxu1 }
0x19a8   :  { %v4654_v24 = vpop.f32.mrb[9].mxu1  ;;  %v1905_v14 = vsel %vm1904_vm11, %v1900_v9, -inf }
0x19a9   :  { %1906 = vmax.xlane.f32.xlu1 %v1905_v14 }
0x1a36   :  { %v1907_v6 = vpop.xlane.xlu1 %1906 }
0x1a37   :  { %v1908_v34 = vsub.f32 %v1900_v9, %v1907_v6 }
0x1a39   :  { %v1909_v46 = vmul.f32 1.442695, %v1908_v34 }
0x1a3b   :  { %5515 = vpow2.f32 %v1909_v46 }
0x1a45   :  { %v5516_v41 = vpop.eup %5515 }
0x1a46   :  { %4658 = vmatmul.mubr.msk.f32.vlgmr.msra.gmra.mrb[10].mxu1 %vm1912_vm12, %v5516_v41  ;;  %v1986_v23 = vsel %vm1904_vm11, %v5516_v41, 0.0 }
0x1a47   :  { %1987 = vadd.xlane.f32.xlu0 %v1986_v23  ;;  %4676 = vmatprep.mubr.msk.f32.mxu1 %vm5698_vm10, %v5692_v7 }
0x1a48   :  { %5060 = vmatpush3.bf16.msra.mxu1 %v6519_v52 }
0x1a49   :  { %5061 = vmatprep.subr.bf16.mxu1 %v5699_v51 }
0x1a4c   :  { %5063 = vmatpush3.bf16.msra.mxu1 %v6525_v15 }
0x1a4d   :  { %5064 = vmatprep.subr.bf16.mxu1 %v5699_v51 }
0x1a50   :  { %5066 = vmatpush3.bf16.msra.mxu1 %v6535_v4 }
0x1a51   :  { %5067 = vmatprep.subr.bf16.mxu1 %v5699_v51 }
0x1a54   :  { %5069 = vmatpush3.bf16.msra.mxu1 %v6545_v48 }
0x1a55   :  { %5070 = vmatprep.subr.bf16.mxu1 %v5699_v51 }
0x1ad4   :  { %v1988_v56 = vpop.xlane.xlu0 %1987 }
0x1ad5   :  { %5517 = vrcp.f32 %v1988_v56 }
0x1adf   :  { %v5518_v29 = vpop.eup %5517 }
0x1b19   :  { %v1982_v3 = vpop.f32.mrb[10].mxu1 }
0x1b1a   :  { %v1990_v11 = vmul.f32 %v5518_v29, %v1982_v3  ;;  %v4659_v37 = vpop.f32.mrb[11].mxu1 }
0x1b1c   :  { %1993 = vrot.lane.b32.xlu0 %v1990_v11, %s5695_s30 }
0x1b8e   :  { %v1994_v22 = vpop.permute.xlu0 %1993 }
0x1b8f   :  { %v1996_v50 = vsel %vm341_vm0, %v6497_v28, %v1994_v22 }
0x1b90   :  { %4677 = vmatmul.mubr.msk.f32.vlgmr.msra.gmra.mrb[12].mxu1 %vm160_vm1, %v1996_v50 }
0x1b91   :  { %4687 = vmatprep.mubr.msk.f32.mxu1 %vm5698_vm10, %v5692_v7  ;;  %5072 = vmatpush3.bf16.msra.mxu1 %v6565_v31 }
0x1b92   :  { %5073 = vmatprep.subr.bf16.mxu1 %v5699_v51 }
0x1b95   :  { %5075 = vmatpush3.bf16.msra.mxu1 %v6571_v58 }
0x1b96   :  { %5077 = vmatprep.subr.bf16.mxu1 %v6245_v60 }
0x1c63   :  { %v2066_v38 = vpop.f32.mrb[12].mxu1 }
0x1c64   :  { %v2067_v9 = vadd.f32 %v2066_v38, %v6579_v18  ;;  %v4678_v24 = vpop.f32.mrb[13].mxu1 }
0x1c66   :  { %5519 = vtanh.f32 %v2067_v9 }
0x1c70   :  { %v5520_v14 = vpop.eup %5519 }
0x1c71   :  { %4688 = vmatmul.mubr.msk.f32.vlgmr.msra.gmra.mrb[14].mxu1 %vm341_vm0, %v5520_v14 }
0x1c72   :  { %4485 = vmatprep.mubr.msk.f32.mxu1 %vm341_vm0, %v6497_v28  ;;  %5079 = vmatpush1.bf16.msra.mxu1 %v6256_v0  ;;  %v6608_v28 = vld [vmem:[%s7067_s9] sm:$0x1] }
0x1c73   :  { %5081 = vmatprep.subr.bf16.mxu1 %v6258_v1 }
0x1c76   :  { %5083 = vmatpush1.bf16.msra.mxu1 %v6275_v12 }
0x1c77   :  { %5085 = vmatprep.subr.bf16.mxu1 %v6278_v5 }
0x1c7a   :  { %5087 = vmatpush1.bf16.msra.mxu1 %v6293_v49 }
0x1c7b   :  { %5089 = vmatprep.subr.bf16.mxu1 %v6296_v17 }
0x1c7e   :  { %5091 = vmatpush1.bf16.msra.mxu1 %v6311_v16 }
0x1c7f   :  { %5093 = vmatprep.subr.bf16.mxu1 %v6314_v10 }
0x1c82   :  { %5095 = vmatpush1.bf16.msra.mxu1 %v6329_v40 }
0x1c83   :  { %5097 = vmatprep.subr.bf16.mxu1 %v6332_v21 }
0x1c86   :  { %5099 = vmatpush1.bf16.msra.mxu1 %v6347_v44 }
0x1c87   :  { %5101 = vmatprep.subr.bf16.mxu1 %v6350_v45 }
0x1c8a   :  { %5103 = vmatpush1.bf16.msra.mxu1 %v6365_v54 }
0x1c8b   :  { %5105 = vmatprep.subr.bf16.mxu1 %v6368_v36 }
0x1c8e   :  { %5107 = vmatpush1.bf16.msra.mxu1 %v6383_v43 }
0x1c8f   :  { %5109 = vmatprep.subr.bf16.mxu1 %v6386_v2 }
0x1c92   :  { %5111 = vmatpush1.bf16.msra.mxu1 %v6401_v55 }
0x1c93   :  { %5113 = vmatprep.subr.bf16.mxu1 %v6404_v57 }
0x1c96   :  { %5115 = vmatpush1.bf16.msra.mxu1 %v6413_v27 }
0x1c97   :  { %4730 = vmatprep.subr.mxu1 %v5692_v7 }
0x1d44   :  { %v2140_v6 = vpop.f32.mrb[14].mxu1 }
0x1d45   :  { %v6611_v34 = vadd.f32 %v2140_v6, %v6608_v28  ;;  %v4689_v46 = vpop.f32.mrb[15].mxu1 }
0x1d47   :  { %v6615_v41 = vsel %vm1605_vm2, %v6611_v34, -inf }
0x1d48   :  { %2147 = vmax.index.xlane.f32.xlu1 %v6615_v41 }
0x1dd5   :  { %v6618_v23 = vpop.xlane.xlu1 %2147 }
0x1dd6   :  { %vm2159_vm13 = vcmp.eq.s32.totalorder %v6438_v20, %v6618_v23 }
0x1dd7   :  { %4486 = vmatmul.mubr.msk.f32.vlgmr.msra.gmra.mrb[16].mxu1 %vm2159_vm13, %v5697_v19 }
0x1dd8   :  { %4731 = vmatpush3.xpose.msk.msra.mxu1 %vm341_vm0, %v6484_v30  ;;  %4732 = vmatprep.mubr.msk.f32.mxu1 %vm5698_vm10, %v5692_v7 }
0x1dd9   :  { %4735 = vmatprep.subr.mxu1 %v5692_v7 }
0x1eaa   :  { %v2228_v8 = vpop.f32.mrb[16].mxu1 }
0x1eab   :  { %v2229_v33 = vadd.f32 %v2228_v8, %v6448_v25  ;;  %v2230_v35 = vpop.f32.mrb[17].mxu1 }
0x1eac   :  { %v2231_v53 = vadd.f32 %v2230_v35, %v6453_v61 }
0x1ead   :  { %2234 = vrot.lane.b32.xlu1 %v2229_v33, %s5695_s30 }
0x1eae   :  { %2255 = vrot.lane.b32.xlu0 %v2231_v53, %s5696_s12 }
0x1eb2   :  { %2245 = vrot.lane.b32.xlu0 %v2231_v53, %s5695_s30 }
0x1f1f   :  { %v2235_v42 = vpop.permute.xlu1 %2234 }
0x1f20   :  { %v2237_v32 = vadd.f32 %v2235_v42, %v2229_v33  ;;  %v2256_v3 = vpop.permute.xlu0 %2255 }
0x1f22   :  { %v4487_v47 = vmul.f32 -1.442695, %v2237_v32 }
0x1f24   :  { %5521 = vpow2.f32 %v4487_v47  ;;  %v2246_v63 = vpop.permute.xlu0 %2245 }
0x1f25   :  { %v2248_v13 = vadd.f32 %v2246_v63, %v2229_v33 }
0x1f27   :  { %v4488_v26 = vmul.f32 -1.442695, %v2248_v13 }
0x1f2e   :  { %v5522_v62 = vpop.eup %5521 }
0x1f2f   :  { %v2241_v56 = vadd.f32 1.0, %v5522_v62 }
0x1f31   :  { %5523 = vrcp.f32 %v2241_v56 }
0x1f3b   :  { %v5524_v29 = vpop.eup %5523 }
0x1f3c   :  { %v2258_v11 = vmul.f32 %v5524_v29, %v2256_v3 }
0x1f3e   :  { %2260 = vrot.lane.b32.xlu1 %v2258_v11, %s5694_s3 }
0x1fb0   :  { %v2261_v37 = vpop.permute.xlu1 %2260 }
0x1fb1   :  { %v2263_v22 = vadd.f32 %v2261_v37, %v2229_v33 }
0x1fb3   :  { %5525 = vtanh.f32 %v2263_v22 }
0x1fb4   :  { %5527 = vpow2.f32 %v4488_v26 }
0x1fbd   :  { %v5526_v50 = vpop.eup %5525 }
0x1fbe   :  { %2267 = vrot.lane.b32.xlu1 %v5526_v50, %s5696_s12  ;;  %v5528_v59 = vpop.eup %5527 }
0x1fbf   :  { %v2252_v38 = vadd.f32 1.0, %v5528_v59 }
0x1fc1   :  { %5529 = vrcp.f32 %v2252_v38 }
0x1fcb   :  { %v5530_v9 = vpop.eup %5529 }
0x1fcc   :  { %v2265_v24 = vsub.f32 1.0, %v5530_v9  ;;  %v2271_v46 = vmul.f32 %v5530_v9, %v6493_v39 }
0x2030   :  { %v2268_v14 = vpop.permute.xlu1 %2267 }
0x2031   :  { %v2270_v6 = vmul.f32 %v2268_v14, %v2265_v24 }
0x2033   :  { %v6636_v8 = vadd.f32 %v2271_v46, %v2270_v6 }
0x2035   :  { %2274 = vrot.lane.b32.xlu0 %v6636_v8, %s5696_s12 }
0x20a7   :  { %v2275_v35 = vpop.permute.xlu0 %2274 }
0x20a8   :  { %4693 = vmatmul.mubr.msk.f32.vlgmr.msra.gmra.mrb[10].mxu0 %vm341_vm0, %v2275_v35 }
0x20a9   :  { %4696 = vmatpush3.msra.mxu0 %v6484_v30  ;;  %4697 = vmatprep.mubr.msk.f32.mxu0 %vm5698_vm10, %v5692_v7 }
0x20aa   :  { %5116 = vmatprep.subr.bf16.mxu0 %v5699_v51 }
0x217b   :  { %v2344_v33 = vpop.f32.mrb[10].mxu0 }
0x217c   :  { %v4694_v53 = vpop.f32.mrb[11].mxu0  ;;  %v2348_v42 = vsel %vm1904_vm11, %v2344_v33, -inf }
0x217d   :  { %2349 = vmax.xlane.f32.xlu1 %v2348_v42 }
0x220a   :  { %v2350_v39 = vpop.xlane.xlu1 %2349 }
0x220b   :  { %v2351_v32 = vsub.f32 %v2344_v33, %v2350_v39 }
0x220d   :  { %v2352_v47 = vmul.f32 1.442695, %v2351_v32 }
0x220f   :  { %5531 = vpow2.f32 %v2352_v47 }
0x2219   :  { %v5532_v62 = vpop.eup %5531 }
0x221a   :  { %4698 = vmatmul.mubr.msk.f32.vlgmr.msra.gmra.mrb[12].mxu0 %vm1912_vm12, %v5532_v62  ;;  %v2427_v56 = vsel %vm1904_vm11, %v5532_v62, 0.0 }
0x221b   :  { %2428 = vadd.xlane.f32.xlu0 %v2427_v56  ;;  %5118 = vmatpush3.bf16.msra.mxu0 %v6519_v52 }
0x221c   :  { %5119 = vmatprep.subr.bf16.mxu0 %v5699_v51  ;;  %4716 = vmatprep.mubr.msk.f32.mxu0 %vm5698_vm10, %v5692_v7 }
0x221f   :  { %5121 = vmatpush3.bf16.msra.mxu0 %v6525_v15 }
0x2220   :  { %5122 = vmatprep.subr.bf16.mxu0 %v5699_v51 }
0x2223   :  { %5124 = vmatpush3.bf16.msra.mxu0 %v6535_v4 }
0x2224   :  { %5125 = vmatprep.subr.bf16.mxu0 %v5699_v51 }
0x2227   :  { %5127 = vmatpush3.bf16.msra.mxu0 %v6545_v48 }
0x2228   :  { %5128 = vmatprep.subr.bf16.mxu0 %v5699_v51 }
0x22a8   :  { %v2429_v29 = vpop.xlane.xlu0 %2428 }
0x22a9   :  { %5533 = vrcp.f32 %v2429_v29 }
0x22b3   :  { %v5534_v3 = vpop.eup %5533 }
0x22ed   :  { %v2423_v11 = vpop.f32.mrb[12].mxu0 }
0x22ee   :  { %v2431_v37 = vmul.f32 %v5534_v3, %v2423_v11  ;;  %v4699_v22 = vpop.f32.mrb[13].mxu0 }
0x22f0   :  { %2434 = vrot.lane.b32.xlu0 %v2431_v37, %s5695_s30 }
0x2362   :  { %v2435_v50 = vpop.permute.xlu0 %2434 }
0x2363   :  { %v2437_v63 = vsel %vm341_vm0, %v2275_v35, %v2435_v50 }
0x2364   :  { %4717 = vmatmul.mubr.msk.f32.vlgmr.msra.gmra.mrb[14].mxu0 %vm160_vm1, %v2437_v63 }
0x2365   :  { %5130 = vmatpush3.bf16.msra.mxu0 %v6565_v31  ;;  %4727 = vmatprep.mubr.msk.f32.mxu0 %vm5698_vm10, %v5692_v7 }
0x2366   :  { %5131 = vmatprep.subr.bf16.mxu0 %v5699_v51 }
0x2369   :  { %5133 = vmatpush3.bf16.msra.mxu0 %v6571_v58 }
0x236a   :  { %5135 = vmatprep.subr.bf16.mxu0 %v6245_v60 }
0x2437   :  { %v2507_v13 = vpop.f32.mrb[14].mxu0 }
0x2438   :  { %v2508_v26 = vadd.f32 %v2507_v13, %v6579_v18  ;;  %v4718_v59 = vpop.f32.mrb[15].mxu0 }
0x243a   :  { %5535 = vtanh.f32 %v2508_v26 }
0x2444   :  { %v5536_v38 = vpop.eup %5535 }
0x2445   :  { %4728 = vmatmul.mubr.msk.f32.vlgmr.msra.gmra.mrb[16].mxu0 %vm341_vm0, %v5536_v38 }
0x2446   :  { %4495 = vmatprep.mubr.msk.f32.mxu0 %vm341_vm0, %v2275_v35  ;;  %5137 = vmatpush1.bf16.msra.mxu0 %v6256_v0 }
0x2447   :  { %5139 = vmatprep.subr.bf16.mxu0 %v6258_v1 }
0x244a   :  { %5141 = vmatpush1.bf16.msra.mxu0 %v6275_v12 }
0x244b   :  { %5143 = vmatprep.subr.bf16.mxu0 %v6278_v5 }
0x244e   :  { %5145 = vmatpush1.bf16.msra.mxu0 %v6293_v49 }
0x244f   :  { %5147 = vmatprep.subr.bf16.mxu0 %v6296_v17 }
0x2452   :  { %5149 = vmatpush1.bf16.msra.mxu0 %v6311_v16 }
0x2453   :  { %5151 = vmatprep.subr.bf16.mxu0 %v6314_v10 }
0x2456   :  { %5153 = vmatpush1.bf16.msra.mxu0 %v6329_v40 }
0x2457   :  { %5155 = vmatprep.subr.bf16.mxu0 %v6332_v21 }
0x245a   :  { %5157 = vmatpush1.bf16.msra.mxu0 %v6347_v44 }
0x245b   :  { %5159 = vmatprep.subr.bf16.mxu0 %v6350_v45 }
0x245e   :  { %5161 = vmatpush1.bf16.msra.mxu0 %v6365_v54 }
0x245f   :  { %5163 = vmatprep.subr.bf16.mxu0 %v6368_v36 }
0x2462   :  { %5165 = vmatpush1.bf16.msra.mxu0 %v6383_v43 }
0x2463   :  { %5167 = vmatprep.subr.bf16.mxu0 %v6386_v2 }
0x2466   :  { %5169 = vmatpush1.bf16.msra.mxu0 %v6401_v55 }
0x2467   :  { %5171 = vmatprep.subr.bf16.mxu0 %v6404_v57 }
0x246a   :  { %5173 = vmatpush1.bf16.msra.mxu0 %v6413_v27 }
0x246b   :  { %4770 = vmatprep.subr.mxu0 %v5692_v7 }
0x2518   :  { %v2581_v9 = vpop.f32.mrb[16].mxu0 }
0x2519   :  { %v6691_v24 = vadd.f32 %v2581_v9, %v6608_v28  ;;  %v4729_v14 = vpop.f32.mrb[17].mxu0 }
0x251b   :  { %v6695_v6 = vsel %vm1605_vm2, %v6691_v24, -inf }
0x251c   :  { %2588 = vmax.index.xlane.f32.xlu1 %v6695_v6 }
0x25a9   :  { %v6698_v46 = vpop.xlane.xlu1 %2588 }
0x25aa   :  { %vm2600_vm14 = vcmp.eq.s32.totalorder %v6438_v20, %v6698_v46 }
0x25ab   :  { %4496 = vmatmul.mubr.msk.f32.vlgmr.msra.gmra.mrb[18].mxu0 %vm2600_vm14, %v5697_v19 }
0x25ac   :  { %4771 = vmatpush3.xpose.msk.msra.mxu0 %vm341_vm0, %v6484_v30  ;;  %4772 = vmatprep.mubr.msk.f32.mxu0 %vm5698_vm10, %v5692_v7 }
0x25ad   :  { %4775 = vmatprep.subr.mxu0 %v5692_v7 }
0x267e   :  { %v2669_v35 = vpop.f32.mrb[18].mxu0 }
0x267f   :  { %v2670_v33 = vadd.f32 %v2669_v35, %v6448_v25  ;;  %v2671_v53 = vpop.f32.mrb[19].mxu0 }
0x2680   :  { %v2672_v42 = vadd.f32 %v2671_v53, %v6453_v61 }
0x2681   :  { %2675 = vrot.lane.b32.xlu1 %v2670_v33, %s5695_s30 }
0x2682   :  { %2696 = vrot.lane.b32.xlu0 %v2672_v42, %s5696_s12 }
0x2686   :  { %2686 = vrot.lane.b32.xlu0 %v2672_v42, %s5695_s30 }
0x26f3   :  { %v2676_v39 = vpop.permute.xlu1 %2675 }
0x26f4   :  { %v2678_v32 = vadd.f32 %v2676_v39, %v2670_v33  ;;  %v2697_v3 = vpop.permute.xlu0 %2696 }
0x26f6   :  { %v4497_v47 = vmul.f32 -1.442695, %v2678_v32 }
0x26f8   :  { %5537 = vpow2.f32 %v4497_v47  ;;  %v2687_v63 = vpop.permute.xlu0 %2686 }
0x26f9   :  { %v2689_v13 = vadd.f32 %v2687_v63, %v2670_v33 }
0x26fb   :  { %v4498_v26 = vmul.f32 -1.442695, %v2689_v13 }
0x2702   :  { %v5538_v62 = vpop.eup %5537 }
0x2703   :  { %v2682_v56 = vadd.f32 1.0, %v5538_v62 }
0x2705   :  { %5539 = vrcp.f32 %v2682_v56 }
0x270f   :  { %v5540_v29 = vpop.eup %5539 }
0x2710   :  { %v2699_v11 = vmul.f32 %v5540_v29, %v2697_v3 }
0x2712   :  { %2701 = vrot.lane.b32.xlu1 %v2699_v11, %s5694_s3 }
0x2784   :  { %v2702_v37 = vpop.permute.xlu1 %2701 }
0x2785   :  { %v2704_v22 = vadd.f32 %v2702_v37, %v2670_v33 }
0x2787   :  { %5541 = vtanh.f32 %v2704_v22 }
0x2788   :  { %5543 = vpow2.f32 %v4498_v26 }
0x2791   :  { %v5542_v50 = vpop.eup %5541 }
0x2792   :  { %2708 = vrot.lane.b32.xlu1 %v5542_v50, %s5696_s12  ;;  %v5544_v59 = vpop.eup %5543 }
0x2793   :  { %v2693_v38 = vadd.f32 1.0, %v5544_v59 }
0x2795   :  { %5545 = vrcp.f32 %v2693_v38 }
0x279f   :  { %v5546_v9 = vpop.eup %5545 }
0x27a0   :  { %v2706_v14 = vsub.f32 1.0, %v5546_v9  ;;  %v2712_v42 = vmul.f32 %v5546_v9, %v6636_v8 }
0x2804   :  { %v2709_v35 = vpop.permute.xlu1 %2708 }
0x2805   :  { %v2711_v53 = vmul.f32 %v2709_v35, %v2706_v14 }
0x2807   :  { %v6716_v39 = vadd.f32 %v2712_v42, %v2711_v53 }
0x2809   :  { %2715 = vrot.lane.b32.xlu0 %v6716_v39, %s5696_s12 }
0x287b   :  { %v2716_v32 = vpop.permute.xlu0 %2715 }
0x287c   :  { %4733 = vmatmul.mubr.msk.f32.vlgmr.msra.gmra.mrb[18].mxu1 %vm341_vm0, %v2716_v32 }
0x287d   :  { %4736 = vmatpush3.msra.mxu1 %v6484_v30  ;;  %4737 = vmatprep.mubr.msk.f32.mxu1 %vm5698_vm10, %v5692_v7 }
0x287e   :  { %5174 = vmatprep.subr.bf16.mxu1 %v5699_v51 }
0x294f   :  { %v2785_v33 = vpop.f32.mrb[18].mxu1 }
0x2950   :  { %v4734_v47 = vpop.f32.mrb[19].mxu1  ;;  %v2789_v62 = vsel %vm1904_vm11, %v2785_v33, -inf }
0x2951   :  { %2790 = vmax.xlane.f32.xlu1 %v2789_v62 }
0x29de   :  { %v2791_v8 = vpop.xlane.xlu1 %2790 }
0x29df   :  { %v2792_v56 = vsub.f32 %v2785_v33, %v2791_v8 }
0x29e1   :  { %v2793_v29 = vmul.f32 1.442695, %v2792_v56 }
0x29e3   :  { %5547 = vpow2.f32 %v2793_v29 }
0x29ed   :  { %v5548_v3 = vpop.eup %5547 }
0x29ee   :  { %4738 = vmatmul.mubr.msk.f32.vlgmr.msra.gmra.mrb[20].mxu1 %vm1912_vm12, %v5548_v3  ;;  %v2868_v11 = vsel %vm1904_vm11, %v5548_v3, 0.0 }
0x29ef   :  { %2869 = vadd.xlane.f32.xlu0 %v2868_v11  ;;  %5176 = vmatpush3.bf16.msra.mxu1 %v6519_v52 }
0x29f0   :  { %5177 = vmatprep.subr.bf16.mxu1 %v5699_v51  ;;  %4756 = vmatprep.mubr.msk.f32.mxu1 %vm5698_vm10, %v5692_v7 }
0x29f3   :  { %5179 = vmatpush3.bf16.msra.mxu1 %v6525_v15 }
0x29f4   :  { %5180 = vmatprep.subr.bf16.mxu1 %v5699_v51 }
0x29f7   :  { %5182 = vmatpush3.bf16.msra.mxu1 %v6535_v4 }
0x29f8   :  { %5183 = vmatprep.subr.bf16.mxu1 %v5699_v51 }
0x29fb   :  { %5185 = vmatpush3.bf16.msra.mxu1 %v6545_v48 }
0x29fc   :  { %5186 = vmatprep.subr.bf16.mxu1 %v5699_v51 }
0x2a7c   :  { %v2870_v37 = vpop.xlane.xlu0 %2869 }
0x2a7d   :  { %5549 = vrcp.f32 %v2870_v37 }
0x2a87   :  { %v5550_v22 = vpop.eup %5549 }
0x2ac1   :  { %v2864_v50 = vpop.f32.mrb[20].mxu1 }
0x2ac2   :  { %v2872_v63 = vmul.f32 %v5550_v22, %v2864_v50  ;;  %v4739_v13 = vpop.f32.mrb[21].mxu1 }
0x2ac4   :  { %2875 = vrot.lane.b32.xlu0 %v2872_v63, %s5695_s30 }
0x2b36   :  { %v2876_v26 = vpop.permute.xlu0 %2875 }
0x2b37   :  { %v2878_v59 = vsel %vm341_vm0, %v2716_v32, %v2876_v26 }
0x2b38   :  { %4757 = vmatmul.mubr.msk.f32.vlgmr.msra.gmra.mrb[22].mxu1 %vm160_vm1, %v2878_v59 }
0x2b39   :  { %5188 = vmatpush3.bf16.msra.mxu1 %v6565_v31  ;;  %4767 = vmatprep.mubr.msk.f32.mxu1 %vm5698_vm10, %v5692_v7 }
0x2b3a   :  { %5189 = vmatprep.subr.bf16.mxu1 %v5699_v51 }
0x2b3d   :  { %5191 = vmatpush3.bf16.msra.mxu1 %v6571_v58 }
0x2b3e   :  { %5193 = vmatprep.subr.bf16.mxu1 %v6245_v60 }
0x2c0b   :  { %v2948_v38 = vpop.f32.mrb[22].mxu1 }
0x2c0c   :  { %v2949_v9 = vadd.f32 %v2948_v38, %v6579_v18  ;;  %v4758_v14 = vpop.f32.mrb[23].mxu1 }
0x2c0e   :  { %5551 = vtanh.f32 %v2949_v9 }
0x2c18   :  { %v5552_v35 = vpop.eup %5551 }
0x2c19   :  { %4768 = vmatmul.mubr.msk.f32.vlgmr.msra.gmra.mrb[24].mxu1 %vm341_vm0, %v5552_v35 }
0x2c1a   :  { %4505 = vmatprep.mubr.msk.f32.mxu1 %vm341_vm0, %v2716_v32  ;;  %5195 = vmatpush1.bf16.msra.mxu1 %v6256_v0 }
0x2c1b   :  { %5197 = vmatprep.subr.bf16.mxu1 %v6258_v1 }
0x2c1e   :  { %5199 = vmatpush1.bf16.msra.mxu1 %v6275_v12 }
0x2c1f   :  { %5201 = vmatprep.subr.bf16.mxu1 %v6278_v5 }
0x2c22   :  { %5203 = vmatpush1.bf16.msra.mxu1 %v6293_v49 }
0x2c23   :  { %5205 = vmatprep.subr.bf16.mxu1 %v6296_v17 }
0x2c26   :  { %5207 = vmatpush1.bf16.msra.mxu1 %v6311_v16 }
0x2c27   :  { %5209 = vmatprep.subr.bf16.mxu1 %v6314_v10 }
0x2c2a   :  { %5211 = vmatpush1.bf16.msra.mxu1 %v6329_v40 }
0x2c2b   :  { %5213 = vmatprep.subr.bf16.mxu1 %v6332_v21 }
0x2c2e   :  { %5215 = vmatpush1.bf16.msra.mxu1 %v6347_v44 }
0x2c2f   :  { %5217 = vmatprep.subr.bf16.mxu1 %v6350_v45 }
0x2c32   :  { %5219 = vmatpush1.bf16.msra.mxu1 %v6365_v54 }
0x2c33   :  { %5221 = vmatprep.subr.bf16.mxu1 %v6368_v36 }
0x2c36   :  { %5223 = vmatpush1.bf16.msra.mxu1 %v6383_v43 }
0x2c37   :  { %5225 = vmatprep.subr.bf16.mxu1 %v6386_v2 }
0x2c3a   :  { %5227 = vmatpush1.bf16.msra.mxu1 %v6401_v55 }
0x2c3b   :  { %5229 = vmatprep.subr.bf16.mxu1 %v6404_v57 }
0x2c3e   :  { %5231 = vmatpush1.bf16.msra.mxu1 %v6413_v27 }
0x2c3f   :  { %4810 = vmatprep.subr.mxu1 %v5692_v7 }
0x2cec   :  { %v3022_v53 = vpop.f32.mrb[24].mxu1 }
0x2ced   :  { %v6771_v42 = vadd.f32 %v3022_v53, %v6608_v28  ;;  %v4769_v32 = vpop.f32.mrb[25].mxu1 }
0x2cef   :  { %v6775_v33 = vsel %vm1605_vm2, %v6771_v42, -inf }
0x2cf0   :  { %3029 = vmax.index.xlane.f32.xlu1 %v6775_v33 }
0x2d7d   :  { %v6778_v47 = vpop.xlane.xlu1 %3029 }
0x2d7e   :  { %vm3041_vm15 = vcmp.eq.s32.totalorder %v6438_v20, %v6778_v47 }
0x2d7f   :  { %4506 = vmatmul.mubr.msk.f32.vlgmr.msra.gmra.mrb[26].mxu1 %vm3041_vm15, %v5697_v19 }
0x2d80   :  { %4811 = vmatpush3.xpose.msk.msra.mxu1 %vm341_vm0, %v6484_v30  ;;  %4812 = vmatprep.mubr.msk.f32.mxu1 %vm5698_vm10, %v5692_v7 }
0x2d81   :  { %4815 = vmatprep.subr.mxu1 %v5692_v7 }
0x2e52   :  { %v3110_v62 = vpop.f32.mrb[26].mxu1 }
0x2e53   :  { %v3111_v8 = vadd.f32 %v3110_v62, %v6448_v25  ;;  %v3112_v56 = vpop.f32.mrb[27].mxu1 }
0x2e54   :  { %v3113_v29 = vadd.f32 %v3112_v56, %v6453_v61 }
0x2e55   :  { %3116 = vrot.lane.b32.xlu1 %v3111_v8, %s5695_s30 }
0x2e56   :  { %3137 = vrot.lane.b32.xlu0 %v3113_v29, %s5696_s12 }
0x2e5a   :  { %3127 = vrot.lane.b32.xlu0 %v3113_v29, %s5695_s30 }
0x2ec7   :  { %v3117_v3 = vpop.permute.xlu1 %3116 }
0x2ec8   :  { %v3119_v11 = vadd.f32 %v3117_v3, %v3111_v8  ;;  %v3138_v13 = vpop.permute.xlu0 %3137 }
0x2eca   :  { %v4507_v37 = vmul.f32 -1.442695, %v3119_v11 }
0x2ecc   :  { %5553 = vpow2.f32 %v4507_v37  ;;  %v3128_v14 = vpop.permute.xlu0 %3127 }
0x2ecd   :  { %v3130_v35 = vadd.f32 %v3128_v14, %v3111_v8 }
0x2ecf   :  { %v4508_v53 = vmul.f32 -1.442695, %v3130_v35 }
0x2ed6   :  { %v5554_v22 = vpop.eup %5553 }
0x2ed7   :  { %v3123_v50 = vadd.f32 1.0, %v5554_v22 }
0x2ed9   :  { %5555 = vrcp.f32 %v3123_v50 }
0x2ee3   :  { %v5556_v63 = vpop.eup %5555 }
0x2ee4   :  { %v3140_v26 = vmul.f32 %v5556_v63, %v3138_v13 }
0x2ee6   :  { %3142 = vrot.lane.b32.xlu1 %v3140_v26, %s5694_s3 }
0x2f58   :  { %v3143_v59 = vpop.permute.xlu1 %3142 }
0x2f59   :  { %v3145_v38 = vadd.f32 %v3143_v59, %v3111_v8 }
0x2f5b   :  { %5557 = vtanh.f32 %v3145_v38 }
0x2f5c   :  { %5559 = vpow2.f32 %v4508_v53 }
0x2f65   :  { %v5558_v9 = vpop.eup %5557 }
0x2f66   :  { %3149 = vrot.lane.b32.xlu1 %v5558_v9, %s5696_s12  ;;  %v5560_v32 = vpop.eup %5559 }
0x2f67   :  { %v3134_v62 = vadd.f32 1.0, %v5560_v32 }
0x2f69   :  { %5561 = vrcp.f32 %v3134_v62 }
0x2f73   :  { %v5562_v56 = vpop.eup %5561 }
0x2f74   :  { %v3147_v29 = vsub.f32 1.0, %v5562_v56  ;;  %v3153_v37 = vmul.f32 %v5562_v56, %v6716_v39 }
0x2fd8   :  { %v3150_v3 = vpop.permute.xlu1 %3149 }
0x2fd9   :  { %v3152_v11 = vmul.f32 %v3150_v3, %v3147_v29 }
0x2fdb   :  { %v6796_v22 = vadd.f32 %v3153_v37, %v3152_v11 }
0x2fdd   :  { %3156 = vrot.lane.b32.xlu0 %v6796_v22, %s5696_s12 }
0x304f   :  { %v3157_v50 = vpop.permute.xlu0 %3156 }
0x3050   :  { %4773 = vmatmul.mubr.msk.f32.vlgmr.msra.gmra.mrb[20].mxu0 %vm341_vm0, %v3157_v50 }
0x3051   :  { %4776 = vmatpush3.msra.mxu0 %v6484_v30  ;;  %4777 = vmatprep.mubr.msk.f32.mxu0 %vm5698_vm10, %v5692_v7 }
0x3052   :  { %5232 = vmatprep.subr.bf16.mxu0 %v5699_v51 }
0x3123   :  { %v3226_v8 = vpop.f32.mrb[20].mxu0 }
0x3124   :  { %v4774_v63 = vpop.f32.mrb[21].mxu0  ;;  %v3230_v13 = vsel %vm1904_vm11, %v3226_v8, -inf }
0x3125   :  { %3231 = vmax.xlane.f32.xlu1 %v3230_v13 }
0x31b2   :  { %v3232_v39 = vpop.xlane.xlu1 %3231 }
0x31b3   :  { %v3233_v26 = vsub.f32 %v3226_v8, %v3232_v39 }
0x31b5   :  { %v3234_v59 = vmul.f32 1.442695, %v3233_v26 }
0x31b7   :  { %5563 = vpow2.f32 %v3234_v59 }
0x31c1   :  { %v5564_v38 = vpop.eup %5563 }
0x31c2   :  { %4778 = vmatmul.mubr.msk.f32.vlgmr.msra.gmra.mrb[22].mxu0 %vm1912_vm12, %v5564_v38  ;;  %v3309_v9 = vsel %vm1904_vm11, %v5564_v38, 0.0 }
0x31c3   :  { %3310 = vadd.xlane.f32.xlu0 %v3309_v9  ;;  %5234 = vmatpush3.bf16.msra.mxu0 %v6519_v52 }
0x31c4   :  { %5235 = vmatprep.subr.bf16.mxu0 %v5699_v51  ;;  %4796 = vmatprep.mubr.msk.f32.mxu0 %vm5698_vm10, %v5692_v7 }
0x31c7   :  { %5237 = vmatpush3.bf16.msra.mxu0 %v6525_v15 }
0x31c8   :  { %5238 = vmatprep.subr.bf16.mxu0 %v5699_v51 }
0x31cb   :  { %5240 = vmatpush3.bf16.msra.mxu0 %v6535_v4 }
0x31cc   :  { %5241 = vmatprep.subr.bf16.mxu0 %v5699_v51 }
0x31cf   :  { %5243 = vmatpush3.bf16.msra.mxu0 %v6545_v48 }
0x31d0   :  { %5244 = vmatprep.subr.bf16.mxu0 %v5699_v51 }
0x3250   :  { %v3311_v14 = vpop.xlane.xlu0 %3310 }
0x3251   :  { %5565 = vrcp.f32 %v3311_v14 }
0x325b   :  { %v5566_v35 = vpop.eup %5565 }
0x3295   :  { %v3305_v53 = vpop.f32.mrb[22].mxu0 }
0x3296   :  { %v3313_v32 = vmul.f32 %v5566_v35, %v3305_v53  ;;  %v4779_v62 = vpop.f32.mrb[23].mxu0 }
0x3298   :  { %3316 = vrot.lane.b32.xlu0 %v3313_v32, %s5695_s30 }
0x330a   :  { %v3317_v56 = vpop.permute.xlu0 %3316 }
0x330b   :  { %v3319_v29 = vsel %vm341_vm0, %v3157_v50, %v3317_v56 }
0x330c   :  { %4797 = vmatmul.mubr.msk.f32.vlgmr.msra.gmra.mrb[24].mxu0 %vm160_vm1, %v3319_v29 }
0x330d   :  { %5246 = vmatpush3.bf16.msra.mxu0 %v6565_v31  ;;  %4807 = vmatprep.mubr.msk.f32.mxu0 %vm5698_vm10, %v5692_v7 }
0x330e   :  { %5247 = vmatprep.subr.bf16.mxu0 %v5699_v51 }
0x3311   :  { %5249 = vmatpush3.bf16.msra.mxu0 %v6571_v58 }
0x3312   :  { %5251 = vmatprep.subr.bf16.mxu0 %v6245_v60 }
0x33df   :  { %v3389_v3 = vpop.f32.mrb[24].mxu0 }
0x33e0   :  { %v3390_v11 = vadd.f32 %v3389_v3, %v6579_v18  ;;  %v4798_v37 = vpop.f32.mrb[25].mxu0 }
0x33e2   :  { %5567 = vtanh.f32 %v3390_v11 }
0x33ec   :  { %v5568_v8 = vpop.eup %5567 }
0x33ed   :  { %4808 = vmatmul.mubr.msk.f32.vlgmr.msra.gmra.mrb[26].mxu0 %vm341_vm0, %v5568_v8 }
0x33ee   :  { %4515 = vmatprep.mubr.msk.f32.mxu0 %vm341_vm0, %v3157_v50  ;;  %5253 = vmatpush1.bf16.msra.mxu0 %v6256_v0 }
0x33ef   :  { %5255 = vmatprep.subr.bf16.mxu0 %v6258_v1 }
0x33f2   :  { %5257 = vmatpush1.bf16.msra.mxu0 %v6275_v12 }
0x33f3   :  { %5259 = vmatprep.subr.bf16.mxu0 %v6278_v5 }
0x33f6   :  { %5261 = vmatpush1.bf16.msra.mxu0 %v6293_v49 }
0x33f7   :  { %5263 = vmatprep.subr.bf16.mxu0 %v6296_v17 }
0x33fa   :  { %5265 = vmatpush1.bf16.msra.mxu0 %v6311_v16 }
0x33fb   :  { %5267 = vmatprep.subr.bf16.mxu0 %v6314_v10 }
0x33fe   :  { %5269 = vmatpush1.bf16.msra.mxu0 %v6329_v40 }
0x33ff   :  { %5271 = vmatprep.subr.bf16.mxu0 %v6332_v21 }
0x3402   :  { %5273 = vmatpush1.bf16.msra.mxu0 %v6347_v44 }
0x3403   :  { %5275 = vmatprep.subr.bf16.mxu0 %v6350_v45 }
0x3406   :  { %5277 = vmatpush1.bf16.msra.mxu0 %v6365_v54 }
0x3407   :  { %5279 = vmatprep.subr.bf16.mxu0 %v6368_v36 }
0x340a   :  { %5281 = vmatpush1.bf16.msra.mxu0 %v6383_v43 }
0x340b   :  { %5283 = vmatprep.subr.bf16.mxu0 %v6386_v2 }
0x340e   :  { %5285 = vmatpush1.bf16.msra.mxu0 %v6401_v55 }
0x340f   :  { %5287 = vmatprep.subr.bf16.mxu0 %v6404_v57 }
0x3412   :  { %5289 = vmatpush1.bf16.msra.mxu0 %v6413_v27 }
0x3413   :  { %4850 = vmatprep.subr.mxu0 %v5692_v7 }
0x34c0   :  { %v3463_v50 = vpop.f32.mrb[26].mxu0 }
0x34c1   :  { %v6851_v63 = vadd.f32 %v3463_v50, %v6608_v28  ;;  %v4809_v13 = vpop.f32.mrb[27].mxu0 }
0x34c3   :  { %v6855_v39 = vsel %vm1605_vm2, %v6851_v63, -inf }
0x34c4   :  { %3470 = vmax.index.xlane.f32.xlu1 %v6855_v39 }
0x3551   :  { %v6858_v26 = vpop.xlane.xlu1 %3470 }
0x3552   :  { %vm3482_vm3 = vcmp.eq.s32.totalorder %v6438_v20, %v6858_v26 }
0x3553   :  { %4516 = vmatmul.mubr.msk.f32.vlgmr.msra.gmra.mrb[28].mxu0 %vm3482_vm3, %v5697_v19 }
0x3554   :  { %4851 = vmatpush3.xpose.msk.msra.mxu0 %vm341_vm0, %v6484_v30  ;;  %4852 = vmatprep.mubr.msk.f32.mxu0 %vm5698_vm10, %v5692_v7 }
0x3555   :  { %4855 = vmatprep.subr.mxu0 %v5692_v7 }
0x3626   :  { %v3551_v59 = vpop.f32.mrb[28].mxu0 }
0x3627   :  { %v3552_v38 = vadd.f32 %v3551_v59, %v6448_v25  ;;  %v3553_v9 = vpop.f32.mrb[29].mxu0 }
0x3628   :  { %v3554_v14 = vadd.f32 %v3553_v9, %v6453_v61 }
0x3629   :  { %3557 = vrot.lane.b32.xlu1 %v3552_v38, %s5695_s30 }
0x362a   :  { %3578 = vrot.lane.b32.xlu0 %v3554_v14, %s5696_s12 }
0x362e   :  { %3568 = vrot.lane.b32.xlu0 %v3554_v14, %s5695_s30 }
0x369b   :  { %v3558_v35 = vpop.permute.xlu1 %3557 }
0x369c   :  { %v3560_v53 = vadd.f32 %v3558_v35, %v3552_v38  ;;  %v3579_v3 = vpop.permute.xlu0 %3578 }
0x369e   :  { %v4517_v32 = vmul.f32 -1.442695, %v3560_v53 }
0x36a0   :  { %5569 = vpow2.f32 %v4517_v32  ;;  %v3569_v13 = vpop.permute.xlu0 %3568 }
0x36a1   :  { %v3571_v59 = vadd.f32 %v3569_v13, %v3552_v38 }
0x36a3   :  { %v4518_v9 = vmul.f32 -1.442695, %v3571_v59 }
0x36aa   :  { %v5570_v62 = vpop.eup %5569 }
0x36ab   :  { %v3564_v56 = vadd.f32 1.0, %v5570_v62 }
0x36ad   :  { %5571 = vrcp.f32 %v3564_v56 }
0x36b7   :  { %v5572_v29 = vpop.eup %5571 }
0x36b8   :  { %v3581_v11 = vmul.f32 %v5572_v29, %v3579_v3 }
0x36ba   :  { %3583 = vrot.lane.b32.xlu1 %v3581_v11, %s5694_s3 }
0x372c   :  { %v3584_v37 = vpop.permute.xlu1 %3583 }
0x372d   :  { %v3586_v8 = vadd.f32 %v3584_v37, %v3552_v38 }
0x372f   :  { %5573 = vtanh.f32 %v3586_v8 }
0x3730   :  { %5575 = vpow2.f32 %v4518_v9 }
0x3739   :  { %v5574_v50 = vpop.eup %5573 }
0x373a   :  { %3590 = vrot.lane.b32.xlu1 %v5574_v50, %s5696_s12  ;;  %v5576_v14 = vpop.eup %5575 }
0x373b   :  { %v3575_v35 = vadd.f32 1.0, %v5576_v14 }
0x373d   :  { %5577 = vrcp.f32 %v3575_v35 }
0x3747   :  { %v5578_v53 = vpop.eup %5577 }
0x3748   :  { %v3588_v32 = vsub.f32 1.0, %v5578_v53  ;;  %v3594_v29 = vmul.f32 %v5578_v53, %v6796_v22 }
0x37ac   :  { %v3591_v62 = vpop.permute.xlu1 %3590 }
0x37ad   :  { %v3593_v56 = vmul.f32 %v3591_v62, %v3588_v32 }
0x37af   :  { %v6876_v3 = vadd.f32 %v3594_v29, %v3593_v56 }
0x37b1   :  { %3597 = vrot.lane.b32.xlu0 %v6876_v3, %s5696_s12 }
0x3823   :  { %v3598_v11 = vpop.permute.xlu0 %3597 }
0x3824   :  { %4813 = vmatmul.mubr.msk.f32.vlgmr.msra.gmra.mrb[28].mxu1 %vm341_vm0, %v3598_v11 }
0x3825   :  { %4816 = vmatpush3.msra.mxu1 %v6484_v30  ;;  %4817 = vmatprep.mubr.msk.f32.mxu1 %vm5698_vm10, %v5692_v7 }
0x3826   :  { %5290 = vmatprep.subr.bf16.mxu1 %v5699_v51 }
0x38f7   :  { %v3667_v38 = vpop.f32.mrb[28].mxu1 }
0x38f8   :  { %v4814_v37 = vpop.f32.mrb[29].mxu1  ;;  %v3671_v8 = vsel %vm1904_vm11, %v3667_v38, -inf }
0x38f9   :  { %3672 = vmax.xlane.f32.xlu1 %v3671_v8 }
0x3986   :  { %v3673_v22 = vpop.xlane.xlu1 %3672 }
0x3987   :  { %v3674_v50 = vsub.f32 %v3667_v38, %v3673_v22 }
0x3989   :  { %v3675_v13 = vmul.f32 1.442695, %v3674_v50 }
0x398b   :  { %5579 = vpow2.f32 %v3675_v13 }
0x3995   :  { %v5580_v59 = vpop.eup %5579 }
0x3996   :  { %4818 = vmatmul.mubr.msk.f32.vlgmr.msra.gmra.mrb[30].mxu1 %vm1912_vm12, %v5580_v59  ;;  %v3750_v9 = vsel %vm1904_vm11, %v5580_v59, 0.0 }
0x3997   :  { %3751 = vadd.xlane.f32.xlu0 %v3750_v9  ;;  %5292 = vmatpush3.bf16.msra.mxu1 %v6519_v52 }
0x3998   :  { %5293 = vmatprep.subr.bf16.mxu1 %v5699_v51  ;;  %4836 = vmatprep.mubr.msk.f32.mxu1 %vm5698_vm10, %v5692_v7 }
0x399b   :  { %5295 = vmatpush3.bf16.msra.mxu1 %v6525_v15 }
0x399c   :  { %5296 = vmatprep.subr.bf16.mxu1 %v5699_v51 }
0x399f   :  { %5298 = vmatpush3.bf16.msra.mxu1 %v6535_v4 }
0x39a0   :  { %5299 = vmatprep.subr.bf16.mxu1 %v5699_v51 }
0x39a3   :  { %5301 = vmatpush3.bf16.msra.mxu1 %v6545_v48 }
0x39a4   :  { %5302 = vmatprep.subr.bf16.mxu1 %v5699_v51 }
0x3a24   :  { %v3752_v14 = vpop.xlane.xlu0 %3751 }
0x3a25   :  { %5581 = vrcp.f32 %v3752_v14 }
0x3a2f   :  { %v5582_v35 = vpop.eup %5581 }
0x3a69   :  { %v3746_v53 = vpop.f32.mrb[30].mxu1 }
0x3a6a   :  { %v3754_v32 = vmul.f32 %v5582_v35, %v3746_v53  ;;  %v4819_v62 = vpop.f32.mrb[31].mxu1 }
0x3a6c   :  { %3757 = vrot.lane.b32.xlu0 %v3754_v32, %s5695_s30 }
0x3ade   :  { %v3758_v56 = vpop.permute.xlu0 %3757 }
0x3adf   :  { %v3760_v29 = vsel %vm341_vm0, %v3598_v11, %v3758_v56 }
0x3ae0   :  { %4837 = vmatmul.mubr.msk.f32.vlgmr.msra.gmra.mrb[32].mxu1 %vm160_vm1, %v3760_v29 }
0x3ae1   :  { %5304 = vmatpush3.bf16.msra.mxu1 %v6565_v31  ;;  %4847 = vmatprep.mubr.msk.f32.mxu1 %vm5698_vm10, %v5692_v7 }
0x3ae2   :  { %5305 = vmatprep.subr.bf16.mxu1 %v5699_v51 }
0x3ae5   :  { %5307 = vmatpush3.bf16.msra.mxu1 %v6571_v58 }
0x3ae6   :  { %5309 = vmatprep.subr.bf16.mxu1 %v6245_v60 }
0x3bb3   :  { %v3830_v38 = vpop.f32.mrb[32].mxu1 }
0x3bb4   :  { %v3831_v37 = vadd.f32 %v3830_v38, %v6579_v18  ;;  %v4838_v8 = vpop.f32.mrb[33].mxu1 }
0x3bb6   :  { %5583 = vtanh.f32 %v3831_v37 }
0x3bc0   :  { %v5584_v22 = vpop.eup %5583 }
0x3bc1   :  { %4848 = vmatmul.mubr.msk.f32.vlgmr.msra.gmra.mrb[34].mxu1 %vm341_vm0, %v5584_v22 }
0x3bc2   :  { %4525 = vmatprep.mubr.msk.f32.mxu1 %vm341_vm0, %v3598_v11  ;;  %5311 = vmatpush1.bf16.msra.mxu1 %v6256_v0 }
0x3bc3   :  { %5313 = vmatprep.subr.bf16.mxu1 %v6258_v1 }
0x3bc6   :  { %5315 = vmatpush1.bf16.msra.mxu1 %v6275_v12 }
0x3bc7   :  { %5317 = vmatprep.subr.bf16.mxu1 %v6278_v5 }
0x3bca   :  { %5319 = vmatpush1.bf16.msra.mxu1 %v6293_v49 }
0x3bcb   :  { %5321 = vmatprep.subr.bf16.mxu1 %v6296_v17 }
0x3bce   :  { %5323 = vmatpush1.bf16.msra.mxu1 %v6311_v16 }
0x3bcf   :  { %5325 = vmatprep.subr.bf16.mxu1 %v6314_v10 }
0x3bd2   :  { %5327 = vmatpush1.bf16.msra.mxu1 %v6329_v40 }
0x3bd3   :  { %5329 = vmatprep.subr.bf16.mxu1 %v6332_v21 }
0x3bd6   :  { %5331 = vmatpush1.bf16.msra.mxu1 %v6347_v44 }
0x3bd7   :  { %5333 = vmatprep.subr.bf16.mxu1 %v6350_v45 }
0x3bda   :  { %5335 = vmatpush1.bf16.msra.mxu1 %v6365_v54 }
0x3bdb   :  { %5337 = vmatprep.subr.bf16.mxu1 %v6368_v36 }
0x3bde   :  { %5339 = vmatpush1.bf16.msra.mxu1 %v6383_v43 }
0x3bdf   :  { %5341 = vmatprep.subr.bf16.mxu1 %v6386_v2 }
0x3be2   :  { %5343 = vmatpush1.bf16.msra.mxu1 %v6401_v55 }
0x3be3   :  { %5345 = vmatprep.subr.bf16.mxu1 %v6404_v57 }
0x3be6   :  { %5347 = vmatpush1.bf16.msra.mxu1 %v6413_v27 }
0x3c94   :  { %v3904_v60 = vpop.f32.mrb[34].mxu1 }
0x3c95   :  { %v6930_v0 = vadd.f32 %v3904_v60, %v6608_v28  ;;  %v4849_v1 = vpop.f32.mrb[35].mxu1 }
0x3c96   :  { %v5627_v1 = vld [vmem:[%s7065_s7] sm:$0x1] }
0x3c97   :  { %v3908_v12 = vsel %vm1605_vm2, %v6930_v0, -inf }
0x3c98   :  { %3911 = vmax.index.xlane.f32.xlu1 %v3908_v12 }
0x3d25   :  { %v6934_v5 = vpop.xlane.xlu1 %3911 }
0x3d26   :  { %vm3923_vm4 = vcmp.eq.s32.totalorder %v6438_v20, %v6934_v5 }
0x3d27   :  { %4526 = vmatmul.mubr.msk.f32.vlgmr.msra.gmra.mrb[36].mxu1 %vm3923_vm4, %v5697_v19 }
0x3dfa   :  { %v3992_v49 = vpop.f32.mrb[36].mxu1 }
0x3dfb   :  { %v3993_v17 = vadd.f32 %v3992_v49, %v6448_v25  ;;  %v3994_v16 = vpop.f32.mrb[37].mxu1 }
0x3dfc   :  { %v3995_v10 = vadd.f32 %v3994_v16, %v6453_v61 }
0x3dfd   :  { %3998 = vrot.lane.b32.xlu1 %v3993_v17, %s5695_s30 }
0x3dfe   :  { %4019 = vrot.lane.b32.xlu0 %v3995_v10, %s5696_s12 }
0x3e02   :  { %4009 = vrot.lane.b32.xlu0 %v3995_v10, %s5695_s30 }
0x3e6f   :  { %v3999_v40 = vpop.permute.xlu1 %3998 }
0x3e70   :  { %v4001_v21 = vadd.f32 %v3999_v40, %v3993_v17  ;;  %v4020_v43 = vpop.permute.xlu0 %4019 }
0x3e72   :  { %v4527_v44 = vmul.f32 -1.442695, %v4001_v21 }
0x3e74   :  { %5585 = vpow2.f32 %v4527_v44  ;;  %v4010_v19 = vpop.permute.xlu0 %4009 }
0x3e75   :  { %v4012_v25 = vadd.f32 %v4010_v19, %v3993_v17 }
0x3e77   :  { %v4528_v61 = vmul.f32 -1.442695, %v4012_v25 }
0x3e7e   :  { %v5586_v45 = vpop.eup %5585 }
0x3e7f   :  { %v4005_v54 = vadd.f32 1.0, %v5586_v45 }
0x3e81   :  { %5587 = vrcp.f32 %v4005_v54 }
0x3e8b   :  { %v5588_v36 = vpop.eup %5587 }
0x3e8c   :  { %v4022_v2 = vmul.f32 %v5588_v36, %v4020_v43  ;;  %v5628_v43 = vld [vmem:[%s7067_s9] sm:$0x1]  ;;  %s5700_s9 = smov [#allocation5]  }
0x3e8d   :  { %s4373_s14 = sshll.u32 %s5700_s9, 4  ;;  %s4374_s14 = int_to_ptr.vmem [resolvable:$true] %s4373_s14 }
0x3e8e   :  { %4024 = vrot.lane.b32.xlu1 %v4022_v2, %s5694_s3  ;;  %s5641_s15 = scalar_lea.vmem %s4374_s14, 16  ;;  %s5645_s16 = scalar_lea.vmem %s4374_s14, 32 }
0x3e8f   :  { %p5642_p5 = scmp.ne.s32.totalorder %s4374_s14, %s5641_s15  ;;  %p5646_p6 = scmp.lt.s32.totalorder %s4374_s14, %s4374_s14 }
0x3e90   :  { %p5647_p7 = scmp.lt.s32.totalorder %s5645_s16, %s5641_s15 }
0x3e92   :  { %p5648_p8 = por %p5647_p7, %p5646_p6 }
0x3e94   :  { %p5649_p9 = pnand %p5648_p8, %p5642_p5 }
0x3f00   :  { %v4025_v55 = vpop.permute.xlu1 %4024 }
0x3f01   :  { %v4027_v57 = vadd.f32 %v4025_v55, %v3993_v17 }
0x3f03   :  { %5589 = vtanh.f32 %v4027_v57 }
0x3f04   :  { %5591 = vpow2.f32 %v4528_v61 }
0x3f0d   :  { %v5590_v27 = vpop.eup %5589 }
0x3f0e   :  { %4031 = vrot.lane.b32.xlu1 %v5590_v27, %s5696_s12  ;;  %v5592_v18 = vpop.eup %5591 }
0x3f0f   :  { %v4016_v28 = vadd.f32 1.0, %v5592_v18 }
0x3f11   :  { %5593 = vrcp.f32 %v4016_v28 }
0x3f1b   :  { %v5594_v11 = vpop.eup %5593 }
0x3f1c   :  { %v4029_v50 = vsub.f32 1.0, %v5594_v11  ;;  %v4035_v9 = vmul.f32 %v5594_v11, %v6876_v3 }
0x3f80   :  { %v4032_v13 = vpop.permute.xlu1 %4031 }
0x3f81   :  { %v4034_v59 = vmul.f32 %v4032_v13, %v4029_v50 }
0x3f83   :  { %v4036_v14 = vadd.f32 %v4035_v9, %v4034_v59 }
0x3f85   :  { %4038 = vrot.lane.b32.xlu0 %v4036_v14, %s5696_s12 }
0x3ff7   :  { %v4039_v35 = vpop.permute.xlu0 %4038 }
0x3ff8   :  { %4853 = vmatmul.mubr.msk.f32.vlgmr.msra.gmra.mrb[30].mxu0 %vm341_vm0, %v4039_v35 }
0x3ff9   :  { %4856 = vmatpush3.msra.mxu0 %v6484_v30  ;;  %4857 = vmatprep.mubr.msk.f32.mxu0 %vm5698_vm10, %v5692_v7 }
0x3ffa   :  { %5348 = vmatprep.subr.bf16.mxu0 %v5699_v51 }
0x40cb   :  { %v4108_v53 = vpop.f32.mrb[30].mxu0 }
0x40cc   :  { %v4854_v32 = vpop.f32.mrb[31].mxu0  ;;  %v4112_v62 = vsel %vm1904_vm11, %v4108_v53, -inf }
0x40cd   :  { %4113 = vmax.xlane.f32.xlu1 %v4112_v62 }
0x40d1   :  { %2145 = vmax.xlane.f32.xlu1 %v6615_v41 }
0x40d5   :  { %2586 = vmax.xlane.f32.xlu1 %v6695_v6 }
0x40d9   :  { %3027 = vmax.xlane.f32.xlu1 %v6775_v33 }
0x40dd   :  { %3468 = vmax.xlane.f32.xlu1 %v6855_v39 }
0x40e1   :  { %3909 = vmax.xlane.f32.xlu1 %v3908_v12 }
0x415a   :  { %v4114_v30 = vpop.xlane.xlu1 %4113 }
0x415b   :  { %v4115_v3 = vsub.f32 %v4108_v53, %v4114_v30 }
0x415d   :  { %v4116_v56 = vmul.f32 1.442695, %v4115_v3 }
0x415e   :  { %v2146_v37 = vpop.xlane.xlu1 %2145 }
0x415f   :  { %5595 = vpow2.f32 %v4116_v56 }
0x4162   :  { %v2587_v16 = vpop.xlane.xlu1 %2586 }
0x4163   :  { %v2590_v10 = vsub.f32 %v6691_v24, %v2587_v16 }
0x4165   :  { %v2591_v40 = vmul.f32 1.442695, %v2590_v10 }
0x4169   :  { %v5596_v29 = vpop.eup %5595 }
0x416a   :  { %4858 = vmatmul.mubr.msk.f32.vlgmr.msra.gmra.mrb[32].mxu0 %vm1912_vm12, %v5596_v29  ;;  %v4191_v38 = vsel %vm1904_vm11, %v5596_v29, 0.0 }
0x416b   :  { %4192 = vadd.xlane.f32.xlu0 %v4191_v38  ;;  %5350 = vmatpush3.bf16.msra.mxu0 %v6519_v52 }
0x416c   :  { %5351 = vmatprep.subr.bf16.mxu0 %v5699_v51  ;;  %4876 = vmatprep.mubr.msk.f32.mxu0 %vm5698_vm10, %v5692_v7 }
0x416f   :  { %5353 = vmatpush3.bf16.msra.mxu0 %v6525_v15  ;;  %v2149_v15 = vsub.f32 %v6611_v34, %v2146_v37 }
0x4170   :  { %5354 = vmatprep.subr.bf16.mxu0 %v5699_v51 }
0x4171   :  { %v2150_v8 = vmul.f32 1.442695, %v2149_v15 }
0x4173   :  { %5356 = vmatpush3.bf16.msra.mxu0 %v6535_v4 }
0x4174   :  { %5357 = vmatprep.subr.bf16.mxu0 %v5699_v51 }
0x4177   :  { %5359 = vmatpush3.bf16.msra.mxu0 %v6545_v48 }
0x4178   :  { %5360 = vmatprep.subr.bf16.mxu0 %v5699_v51 }
0x41f8   :  { %v4193_v41 = vpop.xlane.xlu0 %4192 }
0x41f9   :  { %5597 = vrcp.f32 %v4193_v41 }
0x41fa   :  { %5599 = vpow2.f32 %v2150_v8 }
0x4203   :  { %v5598_v52 = vpop.eup %5597 }
0x4204   :  { %v5600_v4 = vpop.eup %5599 }
0x4205   :  { %v2152_v22 = vsel %vm1605_vm2, %v5600_v4, 0.0 }
0x423d   :  { %v4187_v6 = vpop.f32.mrb[32].mxu0 }
0x423e   :  { %v4195_v33 = vmul.f32 %v5598_v52, %v4187_v6  ;;  %v4859_v39 = vpop.f32.mrb[33].mxu0 }
0x4240   :  { %4198 = vrot.lane.b32.xlu0 %v4195_v33, %s5695_s30 }
0x425f   :  { %2153 = vadd.xlane.f32.xlu0 %v2152_v22 }
0x42b2   :  { %v4199_v48 = vpop.permute.xlu0 %4198 }
0x42b3   :  { %v4201_v60 = vsel %vm341_vm0, %v4039_v35, %v4199_v48 }
0x42b4   :  { %4877 = vmatmul.mubr.msk.f32.vlgmr.msra.gmra.mrb[34].mxu0 %vm160_vm1, %v4201_v60  ;;  %vm2597_vm1 = vcmp.eq.s32.totalorder %v6438_v20, 1 }
0x42b5   :  { %5362 = vmatpush3.bf16.msra.mxu0 %v6565_v31  ;;  %4887 = vmatprep.mubr.msk.f32.mxu0 %vm5698_vm10, %v5692_v7  ;;  %v3028_v31 = vpop.xlane.xlu1 %3027 }
0x42b6   :  { %5363 = vmatprep.subr.bf16.mxu0 %v5699_v51  ;;  %v3031_v51 = vsub.f32 %v6771_v42, %v3028_v31 }
0x42b9   :  { %5365 = vmatpush3.bf16.msra.mxu0 %v6571_v58  ;;  %v3469_v7 = vpop.xlane.xlu1 %3468  ;;  %v3032_v58 = vmul.f32 1.442695, %v3031_v51 }
0x42ba   :  { %v3472_v21 = vsub.f32 %v6851_v63, %v3469_v7 }
0x42bc   :  { %v3473_v45 = vmul.f32 1.442695, %v3472_v21 }
0x42bd   :  { %v3910_v44 = vpop.xlane.xlu1 %3909 }
0x42be   :  { %v3913_v54 = vsub.f32 %v6930_v0, %v3910_v44 }
0x42c0   :  { %v3914_v55 = vmul.f32 1.442695, %v3913_v54 }
0x42ec   :  { %v2154_v53 = vpop.xlane.xlu0 %2153 }
0x4387   :  { %v4271_v34 = vpop.f32.mrb[34].mxu0 }
0x4388   :  { %v4272_v12 = vadd.f32 %v5627_v1, %v4271_v34  ;;  %v4878_v49 = vpop.f32.mrb[35].mxu0 }
0x438a   :  { %5601 = vtanh.f32 %v4272_v12 }
0x438b   :  { %5603 = vpow2.f32 %v2591_v40 }
0x438c   :  { %5605 = vpow2.f32 %v3032_v58 }
0x438d   :  { %5607 = vpow2.f32 %v3473_v45 }
0x438e   :  { %5609 = vpow2.f32 %v3914_v55 }
0x4394   :  { %v5602_v17 = vpop.eup %5601 }
0x4395   :  { %4888 = vmatmul.mubr.msk.f32.vlgmr.msra.gmra.mrb[36].mxu0 %vm341_vm0, %v5602_v17  ;;  %v5604_v57 = vpop.eup %5603  ;;  %vm2156_vm0 = vcmp.eq.s32.totalorder %v6438_v20, 0 }
0x4396   :  { %v2593_v63 = vsel %vm1605_vm2, %v5604_v57, 0.0  ;;  %v5606_v27 = vpop.eup %5605  ;;  %v2157_v62 = vsel %vm2156_vm0, %v6618_v23, 0 }
0x4397   :  { %v3034_v0 = vsel %vm1605_vm2, %v5606_v27, 0.0  ;;  %v5608_v19 = vpop.eup %5607  ;;  %v2598_v3 = vsel %vm2597_vm1, %v6698_v46, %v2157_v62 }
0x4398   :  { %v3475_v25 = vsel %vm1605_vm2, %v5608_v19, 0.0  ;;  %v5610_v61 = vpop.eup %5609  ;;  %v3039_v56 = vsel %vm3038_vm5, %v6778_v47, %v2598_v3 }
0x4399   :  { %v3916_v18 = vsel %vm1605_vm2, %v5610_v61, 0.0 }
0x4468   :  { %v4345_v36 = vpop.f32.mrb[36].mxu0 }
0x4469   :  { %v4346_v2 = vadd.f32 %v5628_v43, %v4345_v36  ;;  %v4889_v24 = vpop.f32.mrb[37].mxu0 }
0x446b   :  { %v4349_v42 = vsel %vm1605_vm2, %v4346_v2, -inf }
0x446c   :  { %4350 = vmax.xlane.f32.xlu1 %v4349_v42 }
0x4470   :  { %2594 = vadd.xlane.f32.xlu1 %v2593_v63 }
0x4474   :  { %3035 = vadd.xlane.f32.xlu1 %v3034_v0 }
0x4478   :  { %3476 = vadd.xlane.f32.xlu1 %v3475_v25 }
0x447c   :  { %3917 = vadd.xlane.f32.xlu1 %v3916_v18 }
0x44f9   :  { %v4351_v28 = vpop.xlane.xlu1 %4350 }
0x44fa   :  { %v4354_v11 = vsub.f32 %v4346_v2, %v4351_v28 }
0x44fc   :  { %v4355_v50 = vmul.f32 1.442695, %v4354_v11 }
0x44fd   :  { %v2595_v9 = vpop.xlane.xlu1 %2594 }
0x44fe   :  { %5611 = vpow2.f32 %v4355_v50 }
0x44ff   :  { %5613 = vrcp.f32 %v2154_v53 }
0x4500   :  { %5615 = vrcp.f32 %v2595_v9 }
0x4501   :  { %v3036_v14 = vpop.xlane.xlu1 %3035 }
0x4502   :  { %5617 = vrcp.f32 %v3036_v14 }
0x4505   :  { %v3477_v35 = vpop.xlane.xlu1 %3476 }
0x4506   :  { %5619 = vrcp.f32 %v3477_v35 }
0x4508   :  { %v5612_v13 = vpop.eup %5611 }
0x4509   :  { %v4357_v59 = vsel %vm1605_vm2, %v5612_v13, 0.0  ;;  %v3918_v32 = vpop.xlane.xlu1 %3917  ;;  %vm3479_vm2 = vcmp.eq.s32.totalorder %v6438_v20, 3  ;;  %v5614_v29 = vpop.eup %5613 }
0x450a   :  { %4358 = vadd.xlane.f32.xlu1 %v4357_v59  ;;  %5621 = vrcp.f32 %v3918_v32  ;;  %v3480_v23 = vsel %vm3479_vm2, %v6858_v26, %v3039_v56  ;;  %v5616_v41 = vpop.eup %5615  ;;  %v2158_v33 = vsel %vm2156_vm0, %v5614_v29, 0.0 }
0x450b   :  { %v3921_v46 = vsel %vm3920_vm6, %v6934_v5, %v3480_v23 }
0x450c   :  { %v5618_v6 = vpop.eup %5617 }
0x450e   :  { %4352 = vmax.index.xlane.f32.xlu1 %v4349_v42 }
0x4510   :  { %v5620_v47 = vpop.eup %5619 }
0x4597   :  { %v4359_v30 = vpop.xlane.xlu1 %4358 }
0x4598   :  { %5623 = vrcp.f32 %v4359_v30 }
0x459b   :  { %v4353_v38 = vpop.xlane.xlu1 %4352 }
0x459c   :  { %v4362_v52 = vsel %vm4361_vm7, %v4353_v38, %v3921_v46 }
0x459d   :  { %4365 = vst.msk [vmem:[#allocation5] sm:$0x1] %vm4364_vm8, %v4362_v52 }
0x459e   :  { %5652 = shalt.err (!%p5649_p9)
}
0x459f   :  { %s5653_s19 = scalar_lea.hbm %s7068_s10, 16 }
0x45a0   :  { %p5654_p10 = scmp.ne.s32.totalorder %s7068_s10, %s5653_s19  ;;  %p5657_p11 = scmp.lt.u32.totalorder %s5653_s19, %s7068_s10 }
0x45a2   :  { %p5659_p12 = pnand %p5657_p11, %p5654_p10 }
0x45a4   :  { %5662 = shalt.err (!%p5659_p12)
}
0x45a5   :  { %4376 = dma.vmem_to_hbm [thread:$0]  %s4374_s14, 16, %s7068_s10, [#allocation3]   ;;  %v5622_v26 = vpop.eup %5621  ;;  %v2599_v5 = vsel %vm2597_vm1, %v5616_v41, %v2158_v33 }
0x45a6   :  { %s5701_s6 = smov [#allocation6]   ;;  %v3040_v39 = vsel %vm3038_vm5, %v5618_v6, %v2599_v5  ;;  %v5624_v15 = vpop.eup %5623 }
0x45a7   :  { %s4383_s1 = sshll.u32 %s5701_s6, 4  ;;  %v3481_v37 = vsel %vm3479_vm2, %v5620_v47, %v3040_v39  ;;  %s4384_s1 = int_to_ptr.vmem [resolvable:$true] %s4383_s1 }
0x45a8   :  { %v3922_v8 = vsel %vm3920_vm6, %v5622_v26, %v3481_v37  ;;  %s5663_s10 = scalar_lea.vmem %s4384_s1, 16  ;;  %s5667_s26 = scalar_lea.vmem %s4384_s1, 32 }
0x45a9   :  { %v4363_v4 = vsel %vm4361_vm7, %v5624_v15, %v3922_v8  ;;  %p5664_p13 = scmp.ne.s32.totalorder %s4384_s1, %s5663_s10  ;;  %p5668_p0 = scmp.lt.s32.totalorder %s4384_s1, %s4384_s1 }
0x45aa   :  { %4366 = vst.msk [vmem:[#allocation6] sm:$0x1] %vm4364_vm8, %v4363_v4  ;;  %p5669_p1 = scmp.lt.s32.totalorder %s5667_s26, %s5663_s10 }
0x45ac   :  { %p5670_p2 = por %p5669_p1, %p5668_p0 }
0x45ae   :  { %p5671_p3 = pnand %p5670_p2, %p5664_p13 }
0x45b0   :  { %5674 = shalt.err (!%p5671_p3)
}
0x45b1   :  { %s5675_s4 = scalar_lea.hbm %s7069_s11, 16 }
0x45b2   :  { %p5676_p4 = scmp.ne.s32.totalorder %s7069_s11, %s5675_s4  ;;  %p5679_p5 = scmp.lt.u32.totalorder %s5675_s4, %s7069_s11 }
0x45b4   :  { %p5681_p6 = pnand %p5679_p5, %p5676_p4 }
0x45b6   :  { %5684 = shalt.err (!%p5681_p6)
}
0x45b7   :  { %4386 = dma.vmem_to_hbm [thread:$0]  %s4384_s1, 16, %s7069_s11, [#allocation7]  }
0x45b8   :  { %5687 = dma.done.wait [#allocation3], 16  }
0x45b9   :  { %5688 = vsyncadd [#allocation3], 4294967280 }
0x45ba   :  { %5689 = dma.done.wait [#allocation7], 16  }
0x45bb   :  { %5690 = vsyncadd [#allocation7], 4294967280 }
0x45bc   :  { %4393 = vsyncpa [#allocation3], 1 }
0x45bd   :  { %4394 = vsyncpa [#allocation7], 1 }
0x45be   :  { %4395 = vsyncpa [#allocation4], 1 }

</bundles_post_ra>
